<compile_context>
chip_gen: v5e
topology: v5e:2x2
jax: 0.10.0
libtpu: 0.0.40
codegen_flags: <defaults>
</compile_context>

<pallas_src>
import functools

import jax
import jax.numpy as jnp
from jax import lax
from jax.experimental import pallas as pl
from jax.experimental.pallas import tpu as pltpu

# ----------------------------------------------------------------------------
# Deterministic "module parameters" (PointLights / Materials / BlendParams /
# camera defaults from pytorch3d).  Synthetic, initialized in-script.
# ----------------------------------------------------------------------------
LIGHT_LOCATION   = (0.0, 1.0, 0.0)
LIGHT_AMBIENT    = (0.5, 0.5, 0.5)
LIGHT_DIFFUSE    = (0.3, 0.3, 0.3)
LIGHT_SPECULAR   = (0.2, 0.2, 0.2)
MAT_AMBIENT      = (1.0, 1.0, 1.0)
MAT_DIFFUSE      = (1.0, 1.0, 1.0)
MAT_SPECULAR     = (1.0, 1.0, 1.0)
SHININESS        = 64                      # int -> exact integer_pow (6 squarings)
CAMERA_POSITION  = (0.0, 0.0, 3.0)         # stand-in for cameras.get_camera_center()
BLEND_SIGMA      = 1e-4
BLEND_GAMMA      = 1e-4
BACKGROUND_COLOR = (1.0, 1.0, 1.0)
ZNEAR, ZFAR      = 1.0, 100.0
EPS_NORM  = 1e-6                           # F.normalize eps
EPS_BLEND = 1e-10                          # softmax_rgb_blend eps

INV_SIGMA  = 1.0 / BLEND_SIGMA
INV_GAMMA  = 1.0 / BLEND_GAMMA
INV_ZRANGE = 1.0 / (ZFAR - ZNEAR)


# ----------------------------------------------------------------------------
# Pallas kernel.
#   attrs_ref: (27K, SUB, 128) bf16 -- row 27k + 9j + c; c in 0..2 vertex xyz,
#              3..5 normal xyz, 6..8 texel rgb, for vertex j of face-slot k.
#   bary_ref : (2K,  SUB, 128) f32  -- row 2k + j, j in {0,1}; b2 = 1 - b0 - b1.
#   aux_ref  : (2K,  SUB, 128) f32  -- rows [0,K): zbuf (masked -> zfar),
#              rows [K,2K): dists (masked -> +1, so sigmoid == 0).
#   out_ref  : (4,   SUB, 128) f32  -- RGBA.
# The per-pixel math runs over `chunk`-sublane slices of the block so the live
# vector state stays small regardless of the DMA block size.
# ----------------------------------------------------------------------------
def soft_phong_kernel(attrs_ref, bary_ref, aux_ref, out_ref, *, K, chunk):
    f32 = jnp.float32
    lx, ly, lz = LIGHT_LOCATION
    cx, cy, cz = CAMERA_POSITION
    amb = tuple(MAT_AMBIENT[c] * LIGHT_AMBIENT[c] for c in range(3))
    dif = tuple(MAT_DIFFUSE[c] * LIGHT_DIFFUSE[c] for c in range(3))
    spc = tuple(MAT_SPECULAR[c] * LIGHT_SPECULAR[c] for c in range(3))

    sub = out_ref.shape[1]
    n_chunks = sub // chunk

    def process(r0):
        rows = pl.ds(r0, chunk)
        tile = (chunk, 128)

        def aux(row):
            return aux_ref[row, rows, :]

        def attr(k, j, ch):
            return attrs_ref[27 * k + 9 * j + ch, rows, :].astype(f32)

        # ---- pass 1: m = max(eps, max_k z_inv_k) (rows already in VMEM) ----
        m = jnp.full(tile, EPS_BLEND, f32)
        for k in range(K):
            m = jnp.maximum(m, (ZFAR - aux(k)) * INV_ZRANGE)

        # ---- pass 2: one weighted accumulation pass over the K face slots ----
        den   = jnp.zeros(tile, f32)
        acc_r = jnp.zeros(tile, f32)
        acc_g = jnp.zeros(tile, f32)
        acc_b = jnp.zeros(tile, f32)
        bg    = jnp.ones(tile, f32)

        for k in range(K):
            b0 = bary_ref[2 * k, rows, :]
            b1 = bary_ref[2 * k + 1, rows, :]
            b2 = 1.0 - b0 - b1

            def interp(g):
                # barycentric interpolation of attribute group g (3 channels)
                return [b0 * attr(k, 0, 3 * g + c)
                        + b1 * attr(k, 1, 3 * g + c)
                        + b2 * attr(k, 2, 3 * g + c) for c in range(3)]

            # -- stage A: position -> normalized light / view directions --
            px, py, pz = interp(0)
            dx, dy, dz = lx - px, ly - py, lz - pz
            vx, vy, vz = cx - px, cy - py, cz - pz
            inv_d = lax.rsqrt(jnp.maximum(dx * dx + dy * dy + dz * dz,
                                          EPS_NORM * EPS_NORM))
            inv_v = lax.rsqrt(jnp.maximum(vx * vx + vy * vy + vz * vz,
                                          EPS_NORM * EPS_NORM))
            dx, dy, dz = dx * inv_d, dy * inv_d, dz * inv_d
            vx, vy, vz = vx * inv_v, vy * inv_v, vz * inv_v

            # -- stage B: normal -> diffuse angle + specular factor --
            nx, ny, nz = interp(1)
            inv_n = lax.rsqrt(jnp.maximum(nx * nx + ny * ny + nz * nz,
                                          EPS_NORM * EPS_NORM))
            nx, ny, nz = nx * inv_n, ny * inv_n, nz * inv_n
            cos_a = nx * dx + ny * dy + nz * dz
            angle = jnp.maximum(cos_a, 0.0)
            cmask = (cos_a > 0.0).astype(f32)
            ndv = nx * vx + ny * vy + nz * vz
            ddv = dx * vx + dy * vy + dz * vz
            # reflect.dot(view) = (2*cos*n - d).dot(v) = 2*cos*(n.v) - d.v
            spec = lax.integer_pow(
                jnp.maximum(2.0 * cos_a * ndv - ddv, 0.0) * cmask, SHININESS)

            # -- stage C: texel -> per-face-slot rgb --
            tr, tg, tb = interp(2)
            r_k = (amb[0] + dif[0] * angle) * tr + spc[0] * spec
            g_k = (amb[1] + dif[1] * angle) * tg + spc[1] * spec
            b_k = (amb[2] + dif[2] * angle) * tb + spc[2] * spec

            # -- stage D: softmax_rgb_blend accumulation (masked slots were
            #    sanitized in the wrapper: dists->+1 => prob==0, zbuf->zfar
            #    => z_inv==0, exactly reproducing the reference's mask) --
            prob  = jax.nn.sigmoid(aux(K + k) * (-INV_SIGMA))
            z_inv = (ZFAR - aux(k)) * INV_ZRANGE
            w = prob * jnp.exp((z_inv - m) * INV_GAMMA)
            den   = den + w
            acc_r = acc_r + w * r_k
            acc_g = acc_g + w * g_k
            acc_b = acc_b + w * b_k
            bg    = bg * (1.0 - prob)

        # ---- finalize blend: dense, lane-aligned per-row stores ----
        delta = jnp.maximum(jnp.exp((EPS_BLEND - m) * INV_GAMMA), EPS_BLEND)
        inv_den = pl.reciprocal(den + delta)           # full precision
        out_ref[0, rows, :] = (acc_r + delta * BACKGROUND_COLOR[0]) * inv_den
        out_ref[1, rows, :] = (acc_g + delta * BACKGROUND_COLOR[1]) * inv_den
        out_ref[2, rows, :] = (acc_b + delta * BACKGROUND_COLOR[2]) * inv_den
        out_ref[3, rows, :] = 1.0 - bg

    if n_chunks <= 1:
        process(0)
    else:
        def body(ci, carry):
            process(pl.multiple_of(ci * chunk, chunk))
            return carry
        lax.fori_loop(0, n_chunks, body, None)


def _pick_sub(nsub, max_sub=128, chunk=16):
    """Largest sublane tile (multiple of `chunk`) dividing nsub that still
    leaves >= 2 grid steps (keeps both v7x TensorCores busy via the parallel
    grid axis); falls back to a 1-step grid only when unavoidable."""
    best_single = None
    s = min(max_sub, (nsub // chunk) * chunk)
    while s >= chunk:
        if nsub % s == 0:
            if nsub // s >= 2:
                return s
            if best_single is None:
                best_single = s
        s -= chunk
    return best_single if best_single is not None else nsub


# ----------------------------------------------------------------------------
# Wrapper: gather face attributes per pixel (XLA glue, bf16 before the gather),
# rearrange to (channels, P//128, 128) and launch the Pallas kernel over pixel
# tiles of SUB*128 pixels (SUB sublanes x 128 lanes).
# ----------------------------------------------------------------------------
def soft_phong_shader(pix_to_face, bary, zbuf, dists,
                      face_verts, face_normals, face_colors,
                      attr_dtype=jnp.bfloat16, max_sub_tile=128, chunk=16):
    N, H, W, K = pix_to_face.shape
    P = N * H * W
    assert P % 128 == 0, "pixel count must be a multiple of 128 lanes"
    nsub = P // 128
    sub = _pick_sub(nsub, max_sub_tile, chunk)
    if sub % chunk:
        chunk = sub
    F = face_verts.shape[0]

    p2f = pix_to_face.reshape(P, K)
    valid = p2f >= 0
    idx = jnp.where(valid, p2f, 0)                    # safe gather index

    # Per-face table (F, 27): vertex xyz | normal xyz | color rgb.  Cast to
    # bf16 BEFORE the gather so gather output + transpose move 2 B/elem.
    face_attr = jnp.concatenate(
        [face_verts, face_normals, face_colors], axis=-1     # (F, 3, 9)
    ).reshape(F, 27).astype(attr_dtype)
    attrs = face_attr[idx]                                    # (P, K, 27) bf16
    attrs_g = attrs.transpose(1, 2, 0).reshape(27 * K, nsub, 128)

    # Two barycentric rows per slot (f32; the third is rebuilt in-kernel).
    bary_g = (bary.reshape(P, K, 3)[..., :2].astype(jnp.float32)
                  .transpose(1, 2, 0).reshape(2 * K, nsub, 128))

    # Fold the validity mask into zbuf / dists (also sanitizes NaN/inf in
    # masked slots): zbuf->zfar gives z_inv == 0, dists->+1 gives
    # sigmoid(-1/sigma) == 0, matching the reference's mask multiply exactly.
    zb = jnp.where(valid, zbuf.reshape(P, K), ZFAR).astype(jnp.float32)
    di = jnp.where(valid, dists.reshape(P, K), 1.0).astype(jnp.float32)
    aux_g = jnp.concatenate([zb.T, di.T], axis=0).reshape(2 * K, nsub, 128)

    def spec_of(nrows):
        return pl.BlockSpec((nrows, sub, 128), lambda i: (0, i, 0))

    out = pl.pallas_call(
        functools.partial(soft_phong_kernel, K=K, chunk=chunk),
        out_shape=jax.ShapeDtypeStruct((4, nsub, 128), jnp.float32),
        grid_spec=pltpu.PrefetchScalarGridSpec(
            num_scalar_prefetch=0,
            grid=(nsub // sub,),
            in_specs=[spec_of(27 * K), spec_of(2 * K), spec_of(2 * K)],
            out_specs=spec_of(4)),
        compiler_params=pltpu.CompilerParams(
            dimension_semantics=("parallel",),
            vmem_limit_bytes=32 * 1024 * 1024),
    )(attrs_g, bary_g, aux_g)

    return out.transpose(1, 2, 0).reshape(N, H, W, 4)   # NHWC RGBA, like pytorch3d


# ----------------------------------------------------------------------------
# Pure-JAX reference (same math, NHWK layout) for validation.
# ----------------------------------------------------------------------------
def reference(pix_to_face, bary, zbuf, dists, face_verts, face_normals, face_colors):
    F = face_verts.shape[0]
    mask = (pix_to_face >= 0)
    maskf = mask[..., None].astype(jnp.float32)
    idx = jnp.clip(pix_to_face, 0, F - 1)
    fv, fn, fc = face_verts[idx], face_normals[idx], face_colors[idx]   # (N,H,W,K,3,3)
    b = bary[..., None]
    coords  = (b * fv).sum(-2) * maskf
    normals = (b * fn).sum(-2) * maskf
    texels  = (b * fc).sum(-2) * maskf

    def normalize(x):
        return x / jnp.maximum(jnp.sqrt((x * x).sum(-1, keepdims=True)), EPS_NORM)

    nrm = normalize(normals)
    direction = normalize(jnp.array(LIGHT_LOCATION, jnp.float32) - coords)
    cos = (nrm * direction).sum(-1)
    angle = jnp.maximum(cos, 0.0)
    cmask = (cos > 0.0).astype(jnp.float32)
    view = normalize(jnp.array(CAMERA_POSITION, jnp.float32) - coords)
    refl = -direction + 2.0 * cos[..., None] * nrm
    sp = (jnp.maximum((view * refl).sum(-1), 0.0) * cmask) ** SHININESS

    amb = jnp.array(MAT_AMBIENT) * jnp.array(LIGHT_AMBIENT)
    dif = jnp.array(MAT_DIFFUSE) * jnp.array(LIGHT_DIFFUSE) * angle[..., None]
    spe = jnp.array(MAT_SPECULAR) * jnp.array(LIGHT_SPECULAR) * sp[..., None]
    colors = (amb + dif) * texels + spe

    prob = jax.nn.sigmoid(-dists / BLEND_SIGMA) * mask
    alpha = jnp.prod(1.0 - prob, -1)
    z_inv = (ZFAR - zbuf) / (ZFAR - ZNEAR) * mask
    z_inv_max = jnp.maximum(z_inv.max(-1, keepdims=True), EPS_BLEND)
    w_num = prob * jnp.exp((z_inv - z_inv_max) / BLEND_GAMMA)
    delta = jnp.maximum(jnp.exp((EPS_BLEND - z_inv_max) / BLEND_GAMMA), EPS_BLEND)
    denom = w_num.sum(-1, keepdims=True) + delta
    rgb = ((w_num[..., None] * colors).sum(-2) + delta * jnp.array(BACKGROUND_COLOR)) / denom
    return jnp.concatenate([rgb, (1.0 - alpha)[..., None]], -1)


if __name__ == "__main__":
    N, H, W, K, F = 2, 64, 64, 4, 128
    key = jax.random.PRNGKey(0)
    k1, k2, k3, k4, k5, k6, k7 = jax.random.split(key, 7)

    # Synthetic Fragments
    pix_to_face = jax.random.randint(k1, (N, H, W, K), -1, F, dtype=jnp.int32)
    bary_raw = jax.random.uniform(k2, (N, H, W, K, 3), jnp.float32, 1e-3, 1.0)
    bary = bary_raw / bary_raw.sum(-1, keepdims=True)
    zbuf = jax.random.uniform(k3, (N, H, W, K), jnp.float32, 1.0, 10.0)
    dists = jax.random.normal(k4, (N, H, W, K), jnp.float32) * 1e-4

    # Synthetic Meshes: per-face vertex positions / normals / colors (TexturesVertex)
    face_verts = jax.random.normal(k5, (F, 3, 3), jnp.float32)
    fn_raw = jax.random.normal(k6, (F, 3, 3), jnp.float32)
    face_normals = fn_raw / jnp.maximum(
        jnp.sqrt((fn_raw * fn_raw).sum(-1, keepdims=True)), EPS_NORM)
    face_colors = jax.random.uniform(k7, (F, 3, 3), jnp.float32, 0.0, 1.0)

    images = soft_phong_shader(pix_to_face, bary, zbuf, dists,
                               face_verts, face_normals, face_colors)
    images = jax.block_until_ready(images)

    # Validate kernel math against the same-math pure-JAX reference evaluated
    # on identically bf16-rounded geometry/colors (the kernel's storage
    # precision; barycentrics are kept f32 in both paths), isolating kernel
    # correctness from the bf16 attribute-storage choice.
    rd = lambda x: x.astype(jnp.bfloat16).astype(jnp.float32)
    ref = reference(pix_to_face, bary, zbuf, dists,
                    rd(face_verts), rd(face_normals), rd(face_colors))

    assert images.shape == (N, H, W, 4)
    assert bool(jnp.all(jnp.isfinite(images)))
    assert jnp.allclose(images, ref, rtol=1e-2, atol=1e-2)

    print("KERNEL_OK")
</pallas_src>

<mosaic_0001>
module attributes {stable_mosaic.version = 11 : i64} {
  func.func @soft_phong_kernel(%arg0: i32, %arg1: memref<108x32x128xbf16, #tpu.memory_space<vmem>>, %arg2: memref<8x32x128xf32, #tpu.memory_space<vmem>>, %arg3: memref<8x32x128xf32, #tpu.memory_space<vmem>>, %arg4: memref<4x32x128xf32, #tpu.memory_space<vmem>>) attributes {dimension_semantics = [#tpu.dimension_semantics<parallel>], iteration_bounds = array<i64: 2>, scalar_prefetch = 0 : i64, scratch_operands = 0 : i64, tpu.core_type = #tpu.core_type<tc>, window_params = [{transform_indices = @transform_0, window_bounds = array<i64: 108, 32, 128>}, {transform_indices = @transform_1, window_bounds = array<i64: 8, 32, 128>}, {transform_indices = @transform_2, window_bounds = array<i64: 8, 32, 128>}, {transform_indices = @transform_3, window_bounds = array<i64: 4, 32, 128>}]} {
    %c0_i32 = arith.constant 0 : i32
    %c2_i32 = arith.constant 2 : i32
    %0 = arith.addi %c0_i32, %c2_i32 : i32
    %c1_i32 = arith.constant 1 : i32
    scf.for %arg5 = %c0_i32 to %0 step %c1_i32  : i32 {
      %c16_i32 = arith.constant 16 : i32
      %1 = arith.muli %arg5, %c16_i32 : i32
      %2 = tpu.assume_multiple %1, 16 : i32
      %cst = arith.constant 1.000000e-10 : f32
      %3 = vector.broadcast %cst : f32 to vector<16x128xf32>
      %c0 = arith.constant 0 : index
      %4 = arith.index_cast %2 : i32 to index
      %c0_1 = arith.constant 0 : index
      %5 = vector.load %arg3[%c0, %4, %c0_1] : memref<8x32x128xf32, #tpu.memory_space<vmem>>, vector<1x16x128xf32>
      %6 = vector.shape_cast %5 : vector<1x16x128xf32> to vector<16x128xf32>
      %cst_2 = arith.constant 1.000000e+02 : f32
      %7 = vector.broadcast %cst_2 : f32 to vector<16x128xf32>
      %8 = arith.subf %7, %6 : vector<16x128xf32>
      %cst_3 = arith.constant 0.0101010101 : f32
      %9 = vector.broadcast %cst_3 : f32 to vector<16x128xf32>
      %10 = arith.mulf %8, %9 : vector<16x128xf32>
      %11 = arith.maximumf %3, %10 : vector<16x128xf32>
      %c1 = arith.constant 1 : index
      %12 = arith.index_cast %2 : i32 to index
      %c0_4 = arith.constant 0 : index
      %13 = vector.load %arg3[%c1, %12, %c0_4] : memref<8x32x128xf32, #tpu.memory_space<vmem>>, vector<1x16x128xf32>
      %14 = vector.shape_cast %13 : vector<1x16x128xf32> to vector<16x128xf32>
      %cst_5 = arith.constant 1.000000e+02 : f32
      %15 = vector.broadcast %cst_5 : f32 to vector<16x128xf32>
      %16 = arith.subf %15, %14 : vector<16x128xf32>
      %cst_6 = arith.constant 0.0101010101 : f32
      %17 = vector.broadcast %cst_6 : f32 to vector<16x128xf32>
      %18 = arith.mulf %16, %17 : vector<16x128xf32>
      %19 = arith.maximumf %11, %18 : vector<16x128xf32>
      %c2 = arith.constant 2 : index
      %20 = arith.index_cast %2 : i32 to index
      %c0_7 = arith.constant 0 : index
      %21 = vector.load %arg3[%c2, %20, %c0_7] : memref<8x32x128xf32, #tpu.memory_space<vmem>>, vector<1x16x128xf32>
      %22 = vector.shape_cast %21 : vector<1x16x128xf32> to vector<16x128xf32>
      %cst_8 = arith.constant 1.000000e+02 : f32
      %23 = vector.broadcast %cst_8 : f32 to vector<16x128xf32>
      %24 = arith.subf %23, %22 : vector<16x128xf32>
      %cst_9 = arith.constant 0.0101010101 : f32
      %25 = vector.broadcast %cst_9 : f32 to vector<16x128xf32>
      %26 = arith.mulf %24, %25 : vector<16x128xf32>
      %27 = arith.maximumf %19, %26 : vector<16x128xf32>
      %c3 = arith.constant 3 : index
      %28 = arith.index_cast %2 : i32 to index
      %c0_10 = arith.constant 0 : index
      %29 = vector.load %arg3[%c3, %28, %c0_10] : memref<8x32x128xf32, #tpu.memory_space<vmem>>, vector<1x16x128xf32>
      %30 = vector.shape_cast %29 : vector<1x16x128xf32> to vector<16x128xf32>
      %cst_11 = arith.constant 1.000000e+02 : f32
      %31 = vector.broadcast %cst_11 : f32 to vector<16x128xf32>
      %32 = arith.subf %31, %30 : vector<16x128xf32>
      %cst_12 = arith.constant 0.0101010101 : f32
      %33 = vector.broadcast %cst_12 : f32 to vector<16x128xf32>
      %34 = arith.mulf %32, %33 : vector<16x128xf32>
      %35 = arith.maximumf %27, %34 : vector<16x128xf32>
      %cst_13 = arith.constant 0.000000e+00 : f32
      %36 = vector.broadcast %cst_13 : f32 to vector<16x128xf32>
      %cst_14 = arith.constant 0.000000e+00 : f32
      %37 = vector.broadcast %cst_14 : f32 to vector<16x128xf32>
      %cst_15 = arith.constant 0.000000e+00 : f32
      %38 = vector.broadcast %cst_15 : f32 to vector<16x128xf32>
      %cst_16 = arith.constant 0.000000e+00 : f32
      %39 = vector.broadcast %cst_16 : f32 to vector<16x128xf32>
      %cst_17 = arith.constant 1.000000e+00 : f32
      %40 = vector.broadcast %cst_17 : f32 to vector<16x128xf32>
      %c0_18 = arith.constant 0 : index
      %41 = arith.index_cast %2 : i32 to index
      %c0_19 = arith.constant 0 : index
      %42 = vector.load %arg2[%c0_18, %41, %c0_19] : memref<8x32x128xf32, #tpu.memory_space<vmem>>, vector<1x16x128xf32>
      %43 = vector.shape_cast %42 : vector<1x16x128xf32> to vector<16x128xf32>
      %c1_20 = arith.constant 1 : index
      %44 = arith.index_cast %2 : i32 to index
      %c0_21 = arith.constant 0 : index
      %45 = vector.load %arg2[%c1_20, %44, %c0_21] : memref<8x32x128xf32, #tpu.memory_space<vmem>>, vector<1x16x128xf32>
      %46 = vector.shape_cast %45 : vector<1x16x128xf32> to vector<16x128xf32>
      %cst_22 = arith.constant 1.000000e+00 : f32
      %47 = vector.broadcast %cst_22 : f32 to vector<16x128xf32>
      %48 = arith.subf %47, %43 : vector<16x128xf32>
      %49 = arith.subf %48, %46 : vector<16x128xf32>
      %c0_23 = arith.constant 0 : index
      %50 = arith.index_cast %2 : i32 to index
      %c0_24 = arith.constant 0 : index
      %51 = vector.load %arg1[%c0_23, %50, %c0_24] : memref<108x32x128xbf16, #tpu.memory_space<vmem>>, vector<1x16x128xbf16>
      %52 = vector.shape_cast %51 : vector<1x16x128xbf16> to vector<16x128xbf16>
      %53 = arith.extf %52 : vector<16x128xbf16> to vector<16x128xf32>
      %54 = arith.mulf %43, %53 : vector<16x128xf32>
      %c9 = arith.constant 9 : index
      %55 = arith.index_cast %2 : i32 to index
      %c0_25 = arith.constant 0 : index
      %56 = vector.load %arg1[%c9, %55, %c0_25] : memref<108x32x128xbf16, #tpu.memory_space<vmem>>, vector<1x16x128xbf16>
      %57 = vector.shape_cast %56 : vector<1x16x128xbf16> to vector<16x128xbf16>
      %58 = arith.extf %57 : vector<16x128xbf16> to vector<16x128xf32>
      %59 = arith.mulf %46, %58 : vector<16x128xf32>
      %60 = arith.addf %54, %59 : vector<16x128xf32>
      %c18 = arith.constant 18 : index
      %61 = arith.index_cast %2 : i32 to index
      %c0_26 = arith.constant 0 : index
      %62 = vector.load %arg1[%c18, %61, %c0_26] : memref<108x32x128xbf16, #tpu.memory_space<vmem>>, vector<1x16x128xbf16>
      %63 = vector.shape_cast %62 : vector<1x16x128xbf16> to vector<16x128xbf16>
      %64 = arith.extf %63 : vector<16x128xbf16> to vector<16x128xf32>
      %65 = arith.mulf %49, %64 : vector<16x128xf32>
      %66 = arith.addf %60, %65 : vector<16x128xf32>
      %c1_27 = arith.constant 1 : index
      %67 = arith.index_cast %2 : i32 to index
      %c0_28 = arith.constant 0 : index
      %68 = vector.load %arg1[%c1_27, %67, %c0_28] : memref<108x32x128xbf16, #tpu.memory_space<vmem>>, vector<1x16x128xbf16>
      %69 = vector.shape_cast %68 : vector<1x16x128xbf16> to vector<16x128xbf16>
      %70 = arith.extf %69 : vector<16x128xbf16> to vector<16x128xf32>
      %71 = arith.mulf %43, %70 : vector<16x128xf32>
      %c10 = arith.constant 10 : index
      %72 = arith.index_cast %2 : i32 to index
      %c0_29 = arith.constant 0 : index
      %73 = vector.load %arg1[%c10, %72, %c0_29] : memref<108x32x128xbf16, #tpu.memory_space<vmem>>, vector<1x16x128xbf16>
      %74 = vector.shape_cast %73 : vector<1x16x128xbf16> to vector<16x128xbf16>
      %75 = arith.extf %74 : vector<16x128xbf16> to vector<16x128xf32>
      %76 = arith.mulf %46, %75 : vector<16x128xf32>
      %77 = arith.addf %71, %76 : vector<16x128xf32>
      %c19 = arith.constant 19 : index
      %78 = arith.index_cast %2 : i32 to index
      %c0_30 = arith.constant 0 : index
      %79 = vector.load %arg1[%c19, %78, %c0_30] : memref<108x32x128xbf16, #tpu.memory_space<vmem>>, vector<1x16x128xbf16>
      %80 = vector.shape_cast %79 : vector<1x16x128xbf16> to vector<16x128xbf16>
      %81 = arith.extf %80 : vector<16x128xbf16> to vector<16x128xf32>
      %82 = arith.mulf %49, %81 : vector<16x128xf32>
      %83 = arith.addf %77, %82 : vector<16x128xf32>
      %c2_31 = arith.constant 2 : index
      %84 = arith.index_cast %2 : i32 to index
      %c0_32 = arith.constant 0 : index
      %85 = vector.load %arg1[%c2_31, %84, %c0_32] : memref<108x32x128xbf16, #tpu.memory_space<vmem>>, vector<1x16x128xbf16>
      %86 = vector.shape_cast %85 : vector<1x16x128xbf16> to vector<16x128xbf16>
      %87 = arith.extf %86 : vector<16x128xbf16> to vector<16x128xf32>
      %88 = arith.mulf %43, %87 : vector<16x128xf32>
      %c11 = arith.constant 11 : index
      %89 = arith.index_cast %2 : i32 to index
      %c0_33 = arith.constant 0 : index
      %90 = vector.load %arg1[%c11, %89, %c0_33] : memref<108x32x128xbf16, #tpu.memory_space<vmem>>, vector<1x16x128xbf16>
      %91 = vector.shape_cast %90 : vector<1x16x128xbf16> to vector<16x128xbf16>
      %92 = arith.extf %91 : vector<16x128xbf16> to vector<16x128xf32>
      %93 = arith.mulf %46, %92 : vector<16x128xf32>
      %94 = arith.addf %88, %93 : vector<16x128xf32>
      %c20 = arith.constant 20 : index
      %95 = arith.index_cast %2 : i32 to index
      %c0_34 = arith.constant 0 : index
      %96 = vector.load %arg1[%c20, %95, %c0_34] : memref<108x32x128xbf16, #tpu.memory_space<vmem>>, vector<1x16x128xbf16>
      %97 = vector.shape_cast %96 : vector<1x16x128xbf16> to vector<16x128xbf16>
      %98 = arith.extf %97 : vector<16x128xbf16> to vector<16x128xf32>
      %99 = arith.mulf %49, %98 : vector<16x128xf32>
      %100 = arith.addf %94, %99 : vector<16x128xf32>
      %cst_35 = arith.constant 0.000000e+00 : f32
      %101 = vector.broadcast %cst_35 : f32 to vector<16x128xf32>
      %102 = arith.subf %101, %66 : vector<16x128xf32>
      %cst_36 = arith.constant 1.000000e+00 : f32
      %103 = vector.broadcast %cst_36 : f32 to vector<16x128xf32>
      %104 = arith.subf %103, %83 : vector<16x128xf32>
      %cst_37 = arith.constant 0.000000e+00 : f32
      %105 = vector.broadcast %cst_37 : f32 to vector<16x128xf32>
      %106 = arith.subf %105, %100 : vector<16x128xf32>
      %cst_38 = arith.constant 0.000000e+00 : f32
      %107 = vector.broadcast %cst_38 : f32 to vector<16x128xf32>
      %108 = arith.subf %107, %66 : vector<16x128xf32>
      %cst_39 = arith.constant 0.000000e+00 : f32
      %109 = vector.broadcast %cst_39 : f32 to vector<16x128xf32>
      %110 = arith.subf %109, %83 : vector<16x128xf32>
      %cst_40 = arith.constant 3.000000e+00 : f32
      %111 = vector.broadcast %cst_40 : f32 to vector<16x128xf32>
      %112 = arith.subf %111, %100 : vector<16x128xf32>
      %113 = arith.mulf %102, %102 : vector<16x128xf32>
      %114 = arith.mulf %104, %104 : vector<16x128xf32>
      %115 = arith.addf %113, %114 : vector<16x128xf32>
      %116 = arith.mulf %106, %106 : vector<16x128xf32>
      %117 = arith.addf %115, %116 : vector<16x128xf32>
      %cst_41 = arith.constant 9.99999996E-13 : f32
      %118 = vector.broadcast %cst_41 : f32 to vector<16x128xf32>
      %119 = arith.maximumf %117, %118 : vector<16x128xf32>
      %120 = math.rsqrt %119 : vector<16x128xf32>
      %121 = arith.mulf %108, %108 : vector<16x128xf32>
      %122 = arith.mulf %110, %110 : vector<16x128xf32>
      %123 = arith.addf %121, %122 : vector<16x128xf32>
      %124 = arith.mulf %112, %112 : vector<16x128xf32>
      %125 = arith.addf %123, %124 : vector<16x128xf32>
      %cst_42 = arith.constant 9.99999996E-13 : f32
      %126 = vector.broadcast %cst_42 : f32 to vector<16x128xf32>
      %127 = arith.maximumf %125, %126 : vector<16x128xf32>
      %128 = math.rsqrt %127 : vector<16x128xf32>
      %129 = arith.mulf %102, %120 : vector<16x128xf32>
      %130 = arith.mulf %104, %120 : vector<16x128xf32>
      %131 = arith.mulf %106, %120 : vector<16x128xf32>
      %132 = arith.mulf %108, %128 : vector<16x128xf32>
      %133 = arith.mulf %110, %128 : vector<16x128xf32>
      %134 = arith.mulf %112, %128 : vector<16x128xf32>
      %c3_43 = arith.constant 3 : index
      %135 = arith.index_cast %2 : i32 to index
      %c0_44 = arith.constant 0 : index
      %136 = vector.load %arg1[%c3_43, %135, %c0_44] : memref<108x32x128xbf16, #tpu.memory_space<vmem>>, vector<1x16x128xbf16>
      %137 = vector.shape_cast %136 : vector<1x16x128xbf16> to vector<16x128xbf16>
      %138 = arith.extf %137 : vector<16x128xbf16> to vector<16x128xf32>
      %139 = arith.mulf %43, %138 : vector<16x128xf32>
      %c12 = arith.constant 12 : index
      %140 = arith.index_cast %2 : i32 to index
      %c0_45 = arith.constant 0 : index
      %141 = vector.load %arg1[%c12, %140, %c0_45] : memref<108x32x128xbf16, #tpu.memory_space<vmem>>, vector<1x16x128xbf16>
      %142 = vector.shape_cast %141 : vector<1x16x128xbf16> to vector<16x128xbf16>
      %143 = arith.extf %142 : vector<16x128xbf16> to vector<16x128xf32>
      %144 = arith.mulf %46, %143 : vector<16x128xf32>
      %145 = arith.addf %139, %144 : vector<16x128xf32>
      %c21 = arith.constant 21 : index
      %146 = arith.index_cast %2 : i32 to index
      %c0_46 = arith.constant 0 : index
      %147 = vector.load %arg1[%c21, %146, %c0_46] : memref<108x32x128xbf16, #tpu.memory_space<vmem>>, vector<1x16x128xbf16>
      %148 = vector.shape_cast %147 : vector<1x16x128xbf16> to vector<16x128xbf16>
      %149 = arith.extf %148 : vector<16x128xbf16> to vector<16x128xf32>
      %150 = arith.mulf %49, %149 : vector<16x128xf32>
      %151 = arith.addf %145, %150 : vector<16x128xf32>
      %c4 = arith.constant 4 : index
      %152 = arith.index_cast %2 : i32 to index
      %c0_47 = arith.constant 0 : index
      %153 = vector.load %arg1[%c4, %152, %c0_47] : memref<108x32x128xbf16, #tpu.memory_space<vmem>>, vector<1x16x128xbf16>
      %154 = vector.shape_cast %153 : vector<1x16x128xbf16> to vector<16x128xbf16>
      %155 = arith.extf %154 : vector<16x128xbf16> to vector<16x128xf32>
      %156 = arith.mulf %43, %155 : vector<16x128xf32>
      %c13 = arith.constant 13 : index
      %157 = arith.index_cast %2 : i32 to index
      %c0_48 = arith.constant 0 : index
      %158 = vector.load %arg1[%c13, %157, %c0_48] : memref<108x32x128xbf16, #tpu.memory_space<vmem>>, vector<1x16x128xbf16>
      %159 = vector.shape_cast %158 : vector<1x16x128xbf16> to vector<16x128xbf16>
      %160 = arith.extf %159 : vector<16x128xbf16> to vector<16x128xf32>
      %161 = arith.mulf %46, %160 : vector<16x128xf32>
      %162 = arith.addf %156, %161 : vector<16x128xf32>
      %c22 = arith.constant 22 : index
      %163 = arith.index_cast %2 : i32 to index
      %c0_49 = arith.constant 0 : index
      %164 = vector.load %arg1[%c22, %163, %c0_49] : memref<108x32x128xbf16, #tpu.memory_space<vmem>>, vector<1x16x128xbf16>
      %165 = vector.shape_cast %164 : vector<1x16x128xbf16> to vector<16x128xbf16>
      %166 = arith.extf %165 : vector<16x128xbf16> to vector<16x128xf32>
      %167 = arith.mulf %49, %166 : vector<16x128xf32>
      %168 = arith.addf %162, %167 : vector<16x128xf32>
      %c5 = arith.constant 5 : index
      %169 = arith.index_cast %2 : i32 to index
      %c0_50 = arith.constant 0 : index
      %170 = vector.load %arg1[%c5, %169, %c0_50] : memref<108x32x128xbf16, #tpu.memory_space<vmem>>, vector<1x16x128xbf16>
      %171 = vector.shape_cast %170 : vector<1x16x128xbf16> to vector<16x128xbf16>
      %172 = arith.extf %171 : vector<16x128xbf16> to vector<16x128xf32>
      %173 = arith.mulf %43, %172 : vector<16x128xf32>
      %c14 = arith.constant 14 : index
      %174 = arith.index_cast %2 : i32 to index
      %c0_51 = arith.constant 0 : index
      %175 = vector.load %arg1[%c14, %174, %c0_51] : memref<108x32x128xbf16, #tpu.memory_space<vmem>>, vector<1x16x128xbf16>
      %176 = vector.shape_cast %175 : vector<1x16x128xbf16> to vector<16x128xbf16>
      %177 = arith.extf %176 : vector<16x128xbf16> to vector<16x128xf32>
      %178 = arith.mulf %46, %177 : vector<16x128xf32>
      %179 = arith.addf %173, %178 : vector<16x128xf32>
      %c23 = arith.constant 23 : index
      %180 = arith.index_cast %2 : i32 to index
      %c0_52 = arith.constant 0 : index
      %181 = vector.load %arg1[%c23, %180, %c0_52] : memref<108x32x128xbf16, #tpu.memory_space<vmem>>, vector<1x16x128xbf16>
      %182 = vector.shape_cast %181 : vector<1x16x128xbf16> to vector<16x128xbf16>
      %183 = arith.extf %182 : vector<16x128xbf16> to vector<16x128xf32>
      %184 = arith.mulf %49, %183 : vector<16x128xf32>
      %185 = arith.addf %179, %184 : vector<16x128xf32>
      %186 = arith.mulf %151, %151 : vector<16x128xf32>
      %187 = arith.mulf %168, %168 : vector<16x128xf32>
      %188 = arith.addf %186, %187 : vector<16x128xf32>
      %189 = arith.mulf %185, %185 : vector<16x128xf32>
      %190 = arith.addf %188, %189 : vector<16x128xf32>
      %cst_53 = arith.constant 9.99999996E-13 : f32
      %191 = vector.broadcast %cst_53 : f32 to vector<16x128xf32>
      %192 = arith.maximumf %190, %191 : vector<16x128xf32>
      %193 = math.rsqrt %192 : vector<16x128xf32>
      %194 = arith.mulf %151, %193 : vector<16x128xf32>
      %195 = arith.mulf %168, %193 : vector<16x128xf32>
      %196 = arith.mulf %185, %193 : vector<16x128xf32>
      %197 = arith.mulf %194, %129 : vector<16x128xf32>
      %198 = arith.mulf %195, %130 : vector<16x128xf32>
      %199 = arith.addf %197, %198 : vector<16x128xf32>
      %200 = arith.mulf %196, %131 : vector<16x128xf32>
      %201 = arith.addf %199, %200 : vector<16x128xf32>
      %cst_54 = arith.constant 0.000000e+00 : f32
      %202 = vector.broadcast %cst_54 : f32 to vector<16x128xf32>
      %203 = arith.maximumf %201, %202 : vector<16x128xf32>
      %cst_55 = arith.constant 0.000000e+00 : f32
      %204 = vector.broadcast %cst_55 : f32 to vector<16x128xf32>
      %205 = arith.cmpf ogt, %201, %204 : vector<16x128xf32>
      %206 = arith.extui %205 : vector<16x128xi1> to vector<16x128xi32>
      %207 = arith.sitofp %206 : vector<16x128xi32> to vector<16x128xf32>
      %208 = arith.mulf %194, %132 : vector<16x128xf32>
      %209 = arith.mulf %195, %133 : vector<16x128xf32>
      %210 = arith.addf %208, %209 : vector<16x128xf32>
      %211 = arith.mulf %196, %134 : vector<16x128xf32>
      %212 = arith.addf %210, %211 : vector<16x128xf32>
      %213 = arith.mulf %129, %132 : vector<16x128xf32>
      %214 = arith.mulf %130, %133 : vector<16x128xf32>
      %215 = arith.addf %213, %214 : vector<16x128xf32>
      %216 = arith.mulf %131, %134 : vector<16x128xf32>
      %217 = arith.addf %215, %216 : vector<16x128xf32>
      %cst_56 = arith.constant 2.000000e+00 : f32
      %218 = vector.broadcast %cst_56 : f32 to vector<16x128xf32>
      %219 = arith.mulf %218, %201 : vector<16x128xf32>
      %220 = arith.mulf %219, %212 : vector<16x128xf32>
      %221 = arith.subf %220, %217 : vector<16x128xf32>
      %cst_57 = arith.constant 0.000000e+00 : f32
      %222 = vector.broadcast %cst_57 : f32 to vector<16x128xf32>
      %223 = arith.maximumf %221, %222 : vector<16x128xf32>
      %224 = arith.mulf %223, %207 : vector<16x128xf32>
      %225 = arith.mulf %224, %224 : vector<16x128xf32>
      %226 = arith.mulf %225, %225 : vector<16x128xf32>
      %227 = arith.mulf %226, %226 : vector<16x128xf32>
      %228 = arith.mulf %227, %227 : vector<16x128xf32>
      %229 = arith.mulf %228, %228 : vector<16x128xf32>
      %230 = arith.mulf %229, %229 : vector<16x128xf32>
      %c6 = arith.constant 6 : index
      %231 = arith.index_cast %2 : i32 to index
      %c0_58 = arith.constant 0 : index
      %232 = vector.load %arg1[%c6, %231, %c0_58] : memref<108x32x128xbf16, #tpu.memory_space<vmem>>, vector<1x16x128xbf16>
      %233 = vector.shape_cast %232 : vector<1x16x128xbf16> to vector<16x128xbf16>
      %234 = arith.extf %233 : vector<16x128xbf16> to vector<16x128xf32>
      %235 = arith.mulf %43, %234 : vector<16x128xf32>
      %c15 = arith.constant 15 : index
      %236 = arith.index_cast %2 : i32 to index
      %c0_59 = arith.constant 0 : index
      %237 = vector.load %arg1[%c15, %236, %c0_59] : memref<108x32x128xbf16, #tpu.memory_space<vmem>>, vector<1x16x128xbf16>
      %238 = vector.shape_cast %237 : vector<1x16x128xbf16> to vector<16x128xbf16>
      %239 = arith.extf %238 : vector<16x128xbf16> to vector<16x128xf32>
      %240 = arith.mulf %46, %239 : vector<16x128xf32>
      %241 = arith.addf %235, %240 : vector<16x128xf32>
      %c24 = arith.constant 24 : index
      %242 = arith.index_cast %2 : i32 to index
      %c0_60 = arith.constant 0 : index
      %243 = vector.load %arg1[%c24, %242, %c0_60] : memref<108x32x128xbf16, #tpu.memory_space<vmem>>, vector<1x16x128xbf16>
      %244 = vector.shape_cast %243 : vector<1x16x128xbf16> to vector<16x128xbf16>
      %245 = arith.extf %244 : vector<16x128xbf16> to vector<16x128xf32>
      %246 = arith.mulf %49, %245 : vector<16x128xf32>
      %247 = arith.addf %241, %246 : vector<16x128xf32>
      %c7 = arith.constant 7 : index
      %248 = arith.index_cast %2 : i32 to index
      %c0_61 = arith.constant 0 : index
      %249 = vector.load %arg1[%c7, %248, %c0_61] : memref<108x32x128xbf16, #tpu.memory_space<vmem>>, vector<1x16x128xbf16>
      %250 = vector.shape_cast %249 : vector<1x16x128xbf16> to vector<16x128xbf16>
      %251 = arith.extf %250 : vector<16x128xbf16> to vector<16x128xf32>
      %252 = arith.mulf %43, %251 : vector<16x128xf32>
      %c16 = arith.constant 16 : index
      %253 = arith.index_cast %2 : i32 to index
      %c0_62 = arith.constant 0 : index
      %254 = vector.load %arg1[%c16, %253, %c0_62] : memref<108x32x128xbf16, #tpu.memory_space<vmem>>, vector<1x16x128xbf16>
      %255 = vector.shape_cast %254 : vector<1x16x128xbf16> to vector<16x128xbf16>
      %256 = arith.extf %255 : vector<16x128xbf16> to vector<16x128xf32>
      %257 = arith.mulf %46, %256 : vector<16x128xf32>
      %258 = arith.addf %252, %257 : vector<16x128xf32>
      %c25 = arith.constant 25 : index
      %259 = arith.index_cast %2 : i32 to index
      %c0_63 = arith.constant 0 : index
      %260 = vector.load %arg1[%c25, %259, %c0_63] : memref<108x32x128xbf16, #tpu.memory_space<vmem>>, vector<1x16x128xbf16>
      %261 = vector.shape_cast %260 : vector<1x16x128xbf16> to vector<16x128xbf16>
      %262 = arith.extf %261 : vector<16x128xbf16> to vector<16x128xf32>
      %263 = arith.mulf %49, %262 : vector<16x128xf32>
      %264 = arith.addf %258, %263 : vector<16x128xf32>
      %c8 = arith.constant 8 : index
      %265 = arith.index_cast %2 : i32 to index
      %c0_64 = arith.constant 0 : index
      %266 = vector.load %arg1[%c8, %265, %c0_64] : memref<108x32x128xbf16, #tpu.memory_space<vmem>>, vector<1x16x128xbf16>
      %267 = vector.shape_cast %266 : vector<1x16x128xbf16> to vector<16x128xbf16>
      %268 = arith.extf %267 : vector<16x128xbf16> to vector<16x128xf32>
      %269 = arith.mulf %43, %268 : vector<16x128xf32>
      %c17 = arith.constant 17 : index
      %270 = arith.index_cast %2 : i32 to index
      %c0_65 = arith.constant 0 : index
      %271 = vector.load %arg1[%c17, %270, %c0_65] : memref<108x32x128xbf16, #tpu.memory_space<vmem>>, vector<1x16x128xbf16>
      %272 = vector.shape_cast %271 : vector<1x16x128xbf16> to vector<16x128xbf16>
      %273 = arith.extf %272 : vector<16x128xbf16> to vector<16x128xf32>
      %274 = arith.mulf %46, %273 : vector<16x128xf32>
      %275 = arith.addf %269, %274 : vector<16x128xf32>
      %c26 = arith.constant 26 : index
      %276 = arith.index_cast %2 : i32 to index
      %c0_66 = arith.constant 0 : index
      %277 = vector.load %arg1[%c26, %276, %c0_66] : memref<108x32x128xbf16, #tpu.memory_space<vmem>>, vector<1x16x128xbf16>
      %278 = vector.shape_cast %277 : vector<1x16x128xbf16> to vector<16x128xbf16>
      %279 = arith.extf %278 : vector<16x128xbf16> to vector<16x128xf32>
      %280 = arith.mulf %49, %279 : vector<16x128xf32>
      %281 = arith.addf %275, %280 : vector<16x128xf32>
      %cst_67 = arith.constant 3.000000e-01 : f32
      %282 = vector.broadcast %cst_67 : f32 to vector<16x128xf32>
      %283 = arith.mulf %282, %203 : vector<16x128xf32>
      %cst_68 = arith.constant 5.000000e-01 : f32
      %284 = vector.broadcast %cst_68 : f32 to vector<16x128xf32>
      %285 = arith.addf %284, %283 : vector<16x128xf32>
      %286 = arith.mulf %285, %247 : vector<16x128xf32>
      %cst_69 = arith.constant 2.000000e-01 : f32
      %287 = vector.broadcast %cst_69 : f32 to vector<16x128xf32>
      %288 = arith.mulf %287, %230 : vector<16x128xf32>
      %289 = arith.addf %286, %288 : vector<16x128xf32>
      %cst_70 = arith.constant 3.000000e-01 : f32
      %290 = vector.broadcast %cst_70 : f32 to vector<16x128xf32>
      %291 = arith.mulf %290, %203 : vector<16x128xf32>
      %cst_71 = arith.constant 5.000000e-01 : f32
      %292 = vector.broadcast %cst_71 : f32 to vector<16x128xf32>
      %293 = arith.addf %292, %291 : vector<16x128xf32>
      %294 = arith.mulf %293, %264 : vector<16x128xf32>
      %cst_72 = arith.constant 2.000000e-01 : f32
      %295 = vector.broadcast %cst_72 : f32 to vector<16x128xf32>
      %296 = arith.mulf %295, %230 : vector<16x128xf32>
      %297 = arith.addf %294, %296 : vector<16x128xf32>
      %cst_73 = arith.constant 3.000000e-01 : f32
      %298 = vector.broadcast %cst_73 : f32 to vector<16x128xf32>
      %299 = arith.mulf %298, %203 : vector<16x128xf32>
      %cst_74 = arith.constant 5.000000e-01 : f32
      %300 = vector.broadcast %cst_74 : f32 to vector<16x128xf32>
      %301 = arith.addf %300, %299 : vector<16x128xf32>
      %302 = arith.mulf %301, %281 : vector<16x128xf32>
      %cst_75 = arith.constant 2.000000e-01 : f32
      %303 = vector.broadcast %cst_75 : f32 to vector<16x128xf32>
      %304 = arith.mulf %303, %230 : vector<16x128xf32>
      %305 = arith.addf %302, %304 : vector<16x128xf32>
      %c4_76 = arith.constant 4 : index
      %306 = arith.index_cast %2 : i32 to index
      %c0_77 = arith.constant 0 : index
      %307 = vector.load %arg3[%c4_76, %306, %c0_77] : memref<8x32x128xf32, #tpu.memory_space<vmem>>, vector<1x16x128xf32>
      %308 = vector.shape_cast %307 : vector<1x16x128xf32> to vector<16x128xf32>
      %cst_78 = arith.constant -1.000000e+04 : f32
      %309 = vector.broadcast %cst_78 : f32 to vector<16x128xf32>
      %310 = arith.mulf %308, %309 : vector<16x128xf32>
      %311 = arith.negf %310 : vector<16x128xf32>
      %312 = math.exp %311 : vector<16x128xf32>
      %cst_79 = arith.constant 1.000000e+00 : f32
      %313 = vector.broadcast %cst_79 : f32 to vector<16x128xf32>
      %314 = arith.addf %313, %312 : vector<16x128xf32>
      %315 = arith.divf %313, %314 : vector<16x128xf32>
      %c0_80 = arith.constant 0 : index
      %316 = arith.index_cast %2 : i32 to index
      %c0_81 = arith.constant 0 : index
      %317 = vector.load %arg3[%c0_80, %316, %c0_81] : memref<8x32x128xf32, #tpu.memory_space<vmem>>, vector<1x16x128xf32>
      %318 = vector.shape_cast %317 : vector<1x16x128xf32> to vector<16x128xf32>
      %cst_82 = arith.constant 1.000000e+02 : f32
      %319 = vector.broadcast %cst_82 : f32 to vector<16x128xf32>
      %320 = arith.subf %319, %318 : vector<16x128xf32>
      %cst_83 = arith.constant 0.0101010101 : f32
      %321 = vector.broadcast %cst_83 : f32 to vector<16x128xf32>
      %322 = arith.mulf %320, %321 : vector<16x128xf32>
      %323 = arith.subf %322, %35 : vector<16x128xf32>
      %cst_84 = arith.constant 1.000000e+04 : f32
      %324 = vector.broadcast %cst_84 : f32 to vector<16x128xf32>
      %325 = arith.mulf %323, %324 : vector<16x128xf32>
      %326 = math.exp %325 : vector<16x128xf32>
      %327 = arith.mulf %315, %326 : vector<16x128xf32>
      %328 = arith.addf %36, %327 : vector<16x128xf32>
      %329 = arith.mulf %327, %289 : vector<16x128xf32>
      %330 = arith.addf %37, %329 : vector<16x128xf32>
      %331 = arith.mulf %327, %297 : vector<16x128xf32>
      %332 = arith.addf %38, %331 : vector<16x128xf32>
      %333 = arith.mulf %327, %305 : vector<16x128xf32>
      %334 = arith.addf %39, %333 : vector<16x128xf32>
      %cst_85 = arith.constant 1.000000e+00 : f32
      %335 = vector.broadcast %cst_85 : f32 to vector<16x128xf32>
      %336 = arith.subf %335, %315 : vector<16x128xf32>
      %337 = arith.mulf %40, %336 : vector<16x128xf32>
      %c2_86 = arith.constant 2 : index
      %338 = arith.index_cast %2 : i32 to index
      %c0_87 = arith.constant 0 : index
      %339 = vector.load %arg2[%c2_86, %338, %c0_87] : memref<8x32x128xf32, #tpu.memory_space<vmem>>, vector<1x16x128xf32>
      %340 = vector.shape_cast %339 : vector<1x16x128xf32> to vector<16x128xf32>
      %c3_88 = arith.constant 3 : index
      %341 = arith.index_cast %2 : i32 to index
      %c0_89 = arith.constant 0 : index
      %342 = vector.load %arg2[%c3_88, %341, %c0_89] : memref<8x32x128xf32, #tpu.memory_space<vmem>>, vector<1x16x128xf32>
      %343 = vector.shape_cast %342 : vector<1x16x128xf32> to vector<16x128xf32>
      %cst_90 = arith.constant 1.000000e+00 : f32
      %344 = vector.broadcast %cst_90 : f32 to vector<16x128xf32>
      %345 = arith.subf %344, %340 : vector<16x128xf32>
      %346 = arith.subf %345, %343 : vector<16x128xf32>
      %c27 = arith.constant 27 : index
      %347 = arith.index_cast %2 : i32 to index
      %c0_91 = arith.constant 0 : index
      %348 = vector.load %arg1[%c27, %347, %c0_91] : memref<108x32x128xbf16, #tpu.memory_space<vmem>>, vector<1x16x128xbf16>
      %349 = vector.shape_cast %348 : vector<1x16x128xbf16> to vector<16x128xbf16>
      %350 = arith.extf %349 : vector<16x128xbf16> to vector<16x128xf32>
      %351 = arith.mulf %340, %350 : vector<16x128xf32>
      %c36 = arith.constant 36 : index
      %352 = arith.index_cast %2 : i32 to index
      %c0_92 = arith.constant 0 : index
      %353 = vector.load %arg1[%c36, %352, %c0_92] : memref<108x32x128xbf16, #tpu.memory_space<vmem>>, vector<1x16x128xbf16>
      %354 = vector.shape_cast %353 : vector<1x16x128xbf16> to vector<16x128xbf16>
      %355 = arith.extf %354 : vector<16x128xbf16> to vector<16x128xf32>
      %356 = arith.mulf %343, %355 : vector<16x128xf32>
      %357 = arith.addf %351, %356 : vector<16x128xf32>
      %c45 = arith.constant 45 : index
      %358 = arith.index_cast %2 : i32 to index
      %c0_93 = arith.constant 0 : index
      %359 = vector.load %arg1[%c45, %358, %c0_93] : memref<108x32x128xbf16, #tpu.memory_space<vmem>>, vector<1x16x128xbf16>
      %360 = vector.shape_cast %359 : vector<1x16x128xbf16> to vector<16x128xbf16>
      %361 = arith.extf %360 : vector<16x128xbf16> to vector<16x128xf32>
      %362 = arith.mulf %346, %361 : vector<16x128xf32>
      %363 = arith.addf %357, %362 : vector<16x128xf32>
      %c28 = arith.constant 28 : index
      %364 = arith.index_cast %2 : i32 to index
      %c0_94 = arith.constant 0 : index
      %365 = vector.load %arg1[%c28, %364, %c0_94] : memref<108x32x128xbf16, #tpu.memory_space<vmem>>, vector<1x16x128xbf16>
      %366 = vector.shape_cast %365 : vector<1x16x128xbf16> to vector<16x128xbf16>
      %367 = arith.extf %366 : vector<16x128xbf16> to vector<16x128xf32>
      %368 = arith.mulf %340, %367 : vector<16x128xf32>
      %c37 = arith.constant 37 : index
      %369 = arith.index_cast %2 : i32 to index
      %c0_95 = arith.constant 0 : index
      %370 = vector.load %arg1[%c37, %369, %c0_95] : memref<108x32x128xbf16, #tpu.memory_space<vmem>>, vector<1x16x128xbf16>
      %371 = vector.shape_cast %370 : vector<1x16x128xbf16> to vector<16x128xbf16>
      %372 = arith.extf %371 : vector<16x128xbf16> to vector<16x128xf32>
      %373 = arith.mulf %343, %372 : vector<16x128xf32>
      %374 = arith.addf %368, %373 : vector<16x128xf32>
      %c46 = arith.constant 46 : index
      %375 = arith.index_cast %2 : i32 to index
      %c0_96 = arith.constant 0 : index
      %376 = vector.load %arg1[%c46, %375, %c0_96] : memref<108x32x128xbf16, #tpu.memory_space<vmem>>, vector<1x16x128xbf16>
      %377 = vector.shape_cast %376 : vector<1x16x128xbf16> to vector<16x128xbf16>
      %378 = arith.extf %377 : vector<16x128xbf16> to vector<16x128xf32>
      %379 = arith.mulf %346, %378 : vector<16x128xf32>
      %380 = arith.addf %374, %379 : vector<16x128xf32>
      %c29 = arith.constant 29 : index
      %381 = arith.index_cast %2 : i32 to index
      %c0_97 = arith.constant 0 : index
      %382 = vector.load %arg1[%c29, %381, %c0_97] : memref<108x32x128xbf16, #tpu.memory_space<vmem>>, vector<1x16x128xbf16>
      %383 = vector.shape_cast %382 : vector<1x16x128xbf16> to vector<16x128xbf16>
      %384 = arith.extf %383 : vector<16x128xbf16> to vector<16x128xf32>
      %385 = arith.mulf %340, %384 : vector<16x128xf32>
      %c38 = arith.constant 38 : index
      %386 = arith.index_cast %2 : i32 to index
      %c0_98 = arith.constant 0 : index
      %387 = vector.load %arg1[%c38, %386, %c0_98] : memref<108x32x128xbf16, #tpu.memory_space<vmem>>, vector<1x16x128xbf16>
      %388 = vector.shape_cast %387 : vector<1x16x128xbf16> to vector<16x128xbf16>
      %389 = arith.extf %388 : vector<16x128xbf16> to vector<16x128xf32>
      %390 = arith.mulf %343, %389 : vector<16x128xf32>
      %391 = arith.addf %385, %390 : vector<16x128xf32>
      %c47 = arith.constant 47 : index
      %392 = arith.index_cast %2 : i32 to index
      %c0_99 = arith.constant 0 : index
      %393 = vector.load %arg1[%c47, %392, %c0_99] : memref<108x32x128xbf16, #tpu.memory_space<vmem>>, vector<1x16x128xbf16>
      %394 = vector.shape_cast %393 : vector<1x16x128xbf16> to vector<16x128xbf16>
      %395 = arith.extf %394 : vector<16x128xbf16> to vector<16x128xf32>
      %396 = arith.mulf %346, %395 : vector<16x128xf32>
      %397 = arith.addf %391, %396 : vector<16x128xf32>
      %cst_100 = arith.constant 0.000000e+00 : f32
      %398 = vector.broadcast %cst_100 : f32 to vector<16x128xf32>
      %399 = arith.subf %398, %363 : vector<16x128xf32>
      %cst_101 = arith.constant 1.000000e+00 : f32
      %400 = vector.broadcast %cst_101 : f32 to vector<16x128xf32>
      %401 = arith.subf %400, %380 : vector<16x128xf32>
      %cst_102 = arith.constant 0.000000e+00 : f32
      %402 = vector.broadcast %cst_102 : f32 to vector<16x128xf32>
      %403 = arith.subf %402, %397 : vector<16x128xf32>
      %cst_103 = arith.constant 0.000000e+00 : f32
      %404 = vector.broadcast %cst_103 : f32 to vector<16x128xf32>
      %405 = arith.subf %404, %363 : vector<16x128xf32>
      %cst_104 = arith.constant 0.000000e+00 : f32
      %406 = vector.broadcast %cst_104 : f32 to vector<16x128xf32>
      %407 = arith.subf %406, %380 : vector<16x128xf32>
      %cst_105 = arith.constant 3.000000e+00 : f32
      %408 = vector.broadcast %cst_105 : f32 to vector<16x128xf32>
      %409 = arith.subf %408, %397 : vector<16x128xf32>
      %410 = arith.mulf %399, %399 : vector<16x128xf32>
      %411 = arith.mulf %401, %401 : vector<16x128xf32>
      %412 = arith.addf %410, %411 : vector<16x128xf32>
      %413 = arith.mulf %403, %403 : vector<16x128xf32>
      %414 = arith.addf %412, %413 : vector<16x128xf32>
      %cst_106 = arith.constant 9.99999996E-13 : f32
      %415 = vector.broadcast %cst_106 : f32 to vector<16x128xf32>
      %416 = arith.maximumf %414, %415 : vector<16x128xf32>
      %417 = math.rsqrt %416 : vector<16x128xf32>
      %418 = arith.mulf %405, %405 : vector<16x128xf32>
      %419 = arith.mulf %407, %407 : vector<16x128xf32>
      %420 = arith.addf %418, %419 : vector<16x128xf32>
      %421 = arith.mulf %409, %409 : vector<16x128xf32>
      %422 = arith.addf %420, %421 : vector<16x128xf32>
      %cst_107 = arith.constant 9.99999996E-13 : f32
      %423 = vector.broadcast %cst_107 : f32 to vector<16x128xf32>
      %424 = arith.maximumf %422, %423 : vector<16x128xf32>
      %425 = math.rsqrt %424 : vector<16x128xf32>
      %426 = arith.mulf %399, %417 : vector<16x128xf32>
      %427 = arith.mulf %401, %417 : vector<16x128xf32>
      %428 = arith.mulf %403, %417 : vector<16x128xf32>
      %429 = arith.mulf %405, %425 : vector<16x128xf32>
      %430 = arith.mulf %407, %425 : vector<16x128xf32>
      %431 = arith.mulf %409, %425 : vector<16x128xf32>
      %c30 = arith.constant 30 : index
      %432 = arith.index_cast %2 : i32 to index
      %c0_108 = arith.constant 0 : index
      %433 = vector.load %arg1[%c30, %432, %c0_108] : memref<108x32x128xbf16, #tpu.memory_space<vmem>>, vector<1x16x128xbf16>
      %434 = vector.shape_cast %433 : vector<1x16x128xbf16> to vector<16x128xbf16>
      %435 = arith.extf %434 : vector<16x128xbf16> to vector<16x128xf32>
      %436 = arith.mulf %340, %435 : vector<16x128xf32>
      %c39 = arith.constant 39 : index
      %437 = arith.index_cast %2 : i32 to index
      %c0_109 = arith.constant 0 : index
      %438 = vector.load %arg1[%c39, %437, %c0_109] : memref<108x32x128xbf16, #tpu.memory_space<vmem>>, vector<1x16x128xbf16>
      %439 = vector.shape_cast %438 : vector<1x16x128xbf16> to vector<16x128xbf16>
      %440 = arith.extf %439 : vector<16x128xbf16> to vector<16x128xf32>
      %441 = arith.mulf %343, %440 : vector<16x128xf32>
      %442 = arith.addf %436, %441 : vector<16x128xf32>
      %c48 = arith.constant 48 : index
      %443 = arith.index_cast %2 : i32 to index
      %c0_110 = arith.constant 0 : index
      %444 = vector.load %arg1[%c48, %443, %c0_110] : memref<108x32x128xbf16, #tpu.memory_space<vmem>>, vector<1x16x128xbf16>
      %445 = vector.shape_cast %444 : vector<1x16x128xbf16> to vector<16x128xbf16>
      %446 = arith.extf %445 : vector<16x128xbf16> to vector<16x128xf32>
      %447 = arith.mulf %346, %446 : vector<16x128xf32>
      %448 = arith.addf %442, %447 : vector<16x128xf32>
      %c31 = arith.constant 31 : index
      %449 = arith.index_cast %2 : i32 to index
      %c0_111 = arith.constant 0 : index
      %450 = vector.load %arg1[%c31, %449, %c0_111] : memref<108x32x128xbf16, #tpu.memory_space<vmem>>, vector<1x16x128xbf16>
      %451 = vector.shape_cast %450 : vector<1x16x128xbf16> to vector<16x128xbf16>
      %452 = arith.extf %451 : vector<16x128xbf16> to vector<16x128xf32>
      %453 = arith.mulf %340, %452 : vector<16x128xf32>
      %c40 = arith.constant 40 : index
      %454 = arith.index_cast %2 : i32 to index
      %c0_112 = arith.constant 0 : index
      %455 = vector.load %arg1[%c40, %454, %c0_112] : memref<108x32x128xbf16, #tpu.memory_space<vmem>>, vector<1x16x128xbf16>
      %456 = vector.shape_cast %455 : vector<1x16x128xbf16> to vector<16x128xbf16>
      %457 = arith.extf %456 : vector<16x128xbf16> to vector<16x128xf32>
      %458 = arith.mulf %343, %457 : vector<16x128xf32>
      %459 = arith.addf %453, %458 : vector<16x128xf32>
      %c49 = arith.constant 49 : index
      %460 = arith.index_cast %2 : i32 to index
      %c0_113 = arith.constant 0 : index
      %461 = vector.load %arg1[%c49, %460, %c0_113] : memref<108x32x128xbf16, #tpu.memory_space<vmem>>, vector<1x16x128xbf16>
      %462 = vector.shape_cast %461 : vector<1x16x128xbf16> to vector<16x128xbf16>
      %463 = arith.extf %462 : vector<16x128xbf16> to vector<16x128xf32>
      %464 = arith.mulf %346, %463 : vector<16x128xf32>
      %465 = arith.addf %459, %464 : vector<16x128xf32>
      %c32 = arith.constant 32 : index
      %466 = arith.index_cast %2 : i32 to index
      %c0_114 = arith.constant 0 : index
      %467 = vector.load %arg1[%c32, %466, %c0_114] : memref<108x32x128xbf16, #tpu.memory_space<vmem>>, vector<1x16x128xbf16>
      %468 = vector.shape_cast %467 : vector<1x16x128xbf16> to vector<16x128xbf16>
      %469 = arith.extf %468 : vector<16x128xbf16> to vector<16x128xf32>
      %470 = arith.mulf %340, %469 : vector<16x128xf32>
      %c41 = arith.constant 41 : index
      %471 = arith.index_cast %2 : i32 to index
      %c0_115 = arith.constant 0 : index
      %472 = vector.load %arg1[%c41, %471, %c0_115] : memref<108x32x128xbf16, #tpu.memory_space<vmem>>, vector<1x16x128xbf16>
      %473 = vector.shape_cast %472 : vector<1x16x128xbf16> to vector<16x128xbf16>
      %474 = arith.extf %473 : vector<16x128xbf16> to vector<16x128xf32>
      %475 = arith.mulf %343, %474 : vector<16x128xf32>
      %476 = arith.addf %470, %475 : vector<16x128xf32>
      %c50 = arith.constant 50 : index
      %477 = arith.index_cast %2 : i32 to index
      %c0_116 = arith.constant 0 : index
      %478 = vector.load %arg1[%c50, %477, %c0_116] : memref<108x32x128xbf16, #tpu.memory_space<vmem>>, vector<1x16x128xbf16>
      %479 = vector.shape_cast %478 : vector<1x16x128xbf16> to vector<16x128xbf16>
      %480 = arith.extf %479 : vector<16x128xbf16> to vector<16x128xf32>
      %481 = arith.mulf %346, %480 : vector<16x128xf32>
      %482 = arith.addf %476, %481 : vector<16x128xf32>
      %483 = arith.mulf %448, %448 : vector<16x128xf32>
      %484 = arith.mulf %465, %465 : vector<16x128xf32>
      %485 = arith.addf %483, %484 : vector<16x128xf32>
      %486 = arith.mulf %482, %482 : vector<16x128xf32>
      %487 = arith.addf %485, %486 : vector<16x128xf32>
      %cst_117 = arith.constant 9.99999996E-13 : f32
      %488 = vector.broadcast %cst_117 : f32 to vector<16x128xf32>
      %489 = arith.maximumf %487, %488 : vector<16x128xf32>
      %490 = math.rsqrt %489 : vector<16x128xf32>
      %491 = arith.mulf %448, %490 : vector<16x128xf32>
      %492 = arith.mulf %465, %490 : vector<16x128xf32>
      %493 = arith.mulf %482, %490 : vector<16x128xf32>
      %494 = arith.mulf %491, %426 : vector<16x128xf32>
      %495 = arith.mulf %492, %427 : vector<16x128xf32>
      %496 = arith.addf %494, %495 : vector<16x128xf32>
      %497 = arith.mulf %493, %428 : vector<16x128xf32>
      %498 = arith.addf %496, %497 : vector<16x128xf32>
      %cst_118 = arith.constant 0.000000e+00 : f32
      %499 = vector.broadcast %cst_118 : f32 to vector<16x128xf32>
      %500 = arith.maximumf %498, %499 : vector<16x128xf32>
      %cst_119 = arith.constant 0.000000e+00 : f32
      %501 = vector.broadcast %cst_119 : f32 to vector<16x128xf32>
      %502 = arith.cmpf ogt, %498, %501 : vector<16x128xf32>
      %503 = arith.extui %502 : vector<16x128xi1> to vector<16x128xi32>
      %504 = arith.sitofp %503 : vector<16x128xi32> to vector<16x128xf32>
      %505 = arith.mulf %491, %429 : vector<16x128xf32>
      %506 = arith.mulf %492, %430 : vector<16x128xf32>
      %507 = arith.addf %505, %506 : vector<16x128xf32>
      %508 = arith.mulf %493, %431 : vector<16x128xf32>
      %509 = arith.addf %507, %508 : vector<16x128xf32>
      %510 = arith.mulf %426, %429 : vector<16x128xf32>
      %511 = arith.mulf %427, %430 : vector<16x128xf32>
      %512 = arith.addf %510, %511 : vector<16x128xf32>
      %513 = arith.mulf %428, %431 : vector<16x128xf32>
      %514 = arith.addf %512, %513 : vector<16x128xf32>
      %cst_120 = arith.constant 2.000000e+00 : f32
      %515 = vector.broadcast %cst_120 : f32 to vector<16x128xf32>
      %516 = arith.mulf %515, %498 : vector<16x128xf32>
      %517 = arith.mulf %516, %509 : vector<16x128xf32>
      %518 = arith.subf %517, %514 : vector<16x128xf32>
      %cst_121 = arith.constant 0.000000e+00 : f32
      %519 = vector.broadcast %cst_121 : f32 to vector<16x128xf32>
      %520 = arith.maximumf %518, %519 : vector<16x128xf32>
      %521 = arith.mulf %520, %504 : vector<16x128xf32>
      %522 = arith.mulf %521, %521 : vector<16x128xf32>
      %523 = arith.mulf %522, %522 : vector<16x128xf32>
      %524 = arith.mulf %523, %523 : vector<16x128xf32>
      %525 = arith.mulf %524, %524 : vector<16x128xf32>
      %526 = arith.mulf %525, %525 : vector<16x128xf32>
      %527 = arith.mulf %526, %526 : vector<16x128xf32>
      %c33 = arith.constant 33 : index
      %528 = arith.index_cast %2 : i32 to index
      %c0_122 = arith.constant 0 : index
      %529 = vector.load %arg1[%c33, %528, %c0_122] : memref<108x32x128xbf16, #tpu.memory_space<vmem>>, vector<1x16x128xbf16>
      %530 = vector.shape_cast %529 : vector<1x16x128xbf16> to vector<16x128xbf16>
      %531 = arith.extf %530 : vector<16x128xbf16> to vector<16x128xf32>
      %532 = arith.mulf %340, %531 : vector<16x128xf32>
      %c42 = arith.constant 42 : index
      %533 = arith.index_cast %2 : i32 to index
      %c0_123 = arith.constant 0 : index
      %534 = vector.load %arg1[%c42, %533, %c0_123] : memref<108x32x128xbf16, #tpu.memory_space<vmem>>, vector<1x16x128xbf16>
      %535 = vector.shape_cast %534 : vector<1x16x128xbf16> to vector<16x128xbf16>
      %536 = arith.extf %535 : vector<16x128xbf16> to vector<16x128xf32>
      %537 = arith.mulf %343, %536 : vector<16x128xf32>
      %538 = arith.addf %532, %537 : vector<16x128xf32>
      %c51 = arith.constant 51 : index
      %539 = arith.index_cast %2 : i32 to index
      %c0_124 = arith.constant 0 : index
      %540 = vector.load %arg1[%c51, %539, %c0_124] : memref<108x32x128xbf16, #tpu.memory_space<vmem>>, vector<1x16x128xbf16>
      %541 = vector.shape_cast %540 : vector<1x16x128xbf16> to vector<16x128xbf16>
      %542 = arith.extf %541 : vector<16x128xbf16> to vector<16x128xf32>
      %543 = arith.mulf %346, %542 : vector<16x128xf32>
      %544 = arith.addf %538, %543 : vector<16x128xf32>
      %c34 = arith.constant 34 : index
      %545 = arith.index_cast %2 : i32 to index
      %c0_125 = arith.constant 0 : index
      %546 = vector.load %arg1[%c34, %545, %c0_125] : memref<108x32x128xbf16, #tpu.memory_space<vmem>>, vector<1x16x128xbf16>
      %547 = vector.shape_cast %546 : vector<1x16x128xbf16> to vector<16x128xbf16>
      %548 = arith.extf %547 : vector<16x128xbf16> to vector<16x128xf32>
      %549 = arith.mulf %340, %548 : vector<16x128xf32>
      %c43 = arith.constant 43 : index
      %550 = arith.index_cast %2 : i32 to index
      %c0_126 = arith.constant 0 : index
      %551 = vector.load %arg1[%c43, %550, %c0_126] : memref<108x32x128xbf16, #tpu.memory_space<vmem>>, vector<1x16x128xbf16>
      %552 = vector.shape_cast %551 : vector<1x16x128xbf16> to vector<16x128xbf16>
      %553 = arith.extf %552 : vector<16x128xbf16> to vector<16x128xf32>
      %554 = arith.mulf %343, %553 : vector<16x128xf32>
      %555 = arith.addf %549, %554 : vector<16x128xf32>
      %c52 = arith.constant 52 : index
      %556 = arith.index_cast %2 : i32 to index
      %c0_127 = arith.constant 0 : index
      %557 = vector.load %arg1[%c52, %556, %c0_127] : memref<108x32x128xbf16, #tpu.memory_space<vmem>>, vector<1x16x128xbf16>
      %558 = vector.shape_cast %557 : vector<1x16x128xbf16> to vector<16x128xbf16>
      %559 = arith.extf %558 : vector<16x128xbf16> to vector<16x128xf32>
      %560 = arith.mulf %346, %559 : vector<16x128xf32>
      %561 = arith.addf %555, %560 : vector<16x128xf32>
      %c35 = arith.constant 35 : index
      %562 = arith.index_cast %2 : i32 to index
      %c0_128 = arith.constant 0 : index
      %563 = vector.load %arg1[%c35, %562, %c0_128] : memref<108x32x128xbf16, #tpu.memory_space<vmem>>, vector<1x16x128xbf16>
      %564 = vector.shape_cast %563 : vector<1x16x128xbf16> to vector<16x128xbf16>
      %565 = arith.extf %564 : vector<16x128xbf16> to vector<16x128xf32>
      %566 = arith.mulf %340, %565 : vector<16x128xf32>
      %c44 = arith.constant 44 : index
      %567 = arith.index_cast %2 : i32 to index
      %c0_129 = arith.constant 0 : index
      %568 = vector.load %arg1[%c44, %567, %c0_129] : memref<108x32x128xbf16, #tpu.memory_space<vmem>>, vector<1x16x128xbf16>
      %569 = vector.shape_cast %568 : vector<1x16x128xbf16> to vector<16x128xbf16>
      %570 = arith.extf %569 : vector<16x128xbf16> to vector<16x128xf32>
      %571 = arith.mulf %343, %570 : vector<16x128xf32>
      %572 = arith.addf %566, %571 : vector<16x128xf32>
      %c53 = arith.constant 53 : index
      %573 = arith.index_cast %2 : i32 to index
      %c0_130 = arith.constant 0 : index
      %574 = vector.load %arg1[%c53, %573, %c0_130] : memref<108x32x128xbf16, #tpu.memory_space<vmem>>, vector<1x16x128xbf16>
      %575 = vector.shape_cast %574 : vector<1x16x128xbf16> to vector<16x128xbf16>
      %576 = arith.extf %575 : vector<16x128xbf16> to vector<16x128xf32>
      %577 = arith.mulf %346, %576 : vector<16x128xf32>
      %578 = arith.addf %572, %577 : vector<16x128xf32>
      %cst_131 = arith.constant 3.000000e-01 : f32
      %579 = vector.broadcast %cst_131 : f32 to vector<16x128xf32>
      %580 = arith.mulf %579, %500 : vector<16x128xf32>
      %cst_132 = arith.constant 5.000000e-01 : f32
      %581 = vector.broadcast %cst_132 : f32 to vector<16x128xf32>
      %582 = arith.addf %581, %580 : vector<16x128xf32>
      %583 = arith.mulf %582, %544 : vector<16x128xf32>
      %cst_133 = arith.constant 2.000000e-01 : f32
      %584 = vector.broadcast %cst_133 : f32 to vector<16x128xf32>
      %585 = arith.mulf %584, %527 : vector<16x128xf32>
      %586 = arith.addf %583, %585 : vector<16x128xf32>
      %cst_134 = arith.constant 3.000000e-01 : f32
      %587 = vector.broadcast %cst_134 : f32 to vector<16x128xf32>
      %588 = arith.mulf %587, %500 : vector<16x128xf32>
      %cst_135 = arith.constant 5.000000e-01 : f32
      %589 = vector.broadcast %cst_135 : f32 to vector<16x128xf32>
      %590 = arith.addf %589, %588 : vector<16x128xf32>
      %591 = arith.mulf %590, %561 : vector<16x128xf32>
      %cst_136 = arith.constant 2.000000e-01 : f32
      %592 = vector.broadcast %cst_136 : f32 to vector<16x128xf32>
      %593 = arith.mulf %592, %527 : vector<16x128xf32>
      %594 = arith.addf %591, %593 : vector<16x128xf32>
      %cst_137 = arith.constant 3.000000e-01 : f32
      %595 = vector.broadcast %cst_137 : f32 to vector<16x128xf32>
      %596 = arith.mulf %595, %500 : vector<16x128xf32>
      %cst_138 = arith.constant 5.000000e-01 : f32
      %597 = vector.broadcast %cst_138 : f32 to vector<16x128xf32>
      %598 = arith.addf %597, %596 : vector<16x128xf32>
      %599 = arith.mulf %598, %578 : vector<16x128xf32>
      %cst_139 = arith.constant 2.000000e-01 : f32
      %600 = vector.broadcast %cst_139 : f32 to vector<16x128xf32>
      %601 = arith.mulf %600, %527 : vector<16x128xf32>
      %602 = arith.addf %599, %601 : vector<16x128xf32>
      %c5_140 = arith.constant 5 : index
      %603 = arith.index_cast %2 : i32 to index
      %c0_141 = arith.constant 0 : index
      %604 = vector.load %arg3[%c5_140, %603, %c0_141] : memref<8x32x128xf32, #tpu.memory_space<vmem>>, vector<1x16x128xf32>
      %605 = vector.shape_cast %604 : vector<1x16x128xf32> to vector<16x128xf32>
      %cst_142 = arith.constant -1.000000e+04 : f32
      %606 = vector.broadcast %cst_142 : f32 to vector<16x128xf32>
      %607 = arith.mulf %605, %606 : vector<16x128xf32>
      %608 = arith.negf %607 : vector<16x128xf32>
      %609 = math.exp %608 : vector<16x128xf32>
      %cst_143 = arith.constant 1.000000e+00 : f32
      %610 = vector.broadcast %cst_143 : f32 to vector<16x128xf32>
      %611 = arith.addf %610, %609 : vector<16x128xf32>
      %612 = arith.divf %610, %611 : vector<16x128xf32>
      %c1_144 = arith.constant 1 : index
      %613 = arith.index_cast %2 : i32 to index
      %c0_145 = arith.constant 0 : index
      %614 = vector.load %arg3[%c1_144, %613, %c0_145] : memref<8x32x128xf32, #tpu.memory_space<vmem>>, vector<1x16x128xf32>
      %615 = vector.shape_cast %614 : vector<1x16x128xf32> to vector<16x128xf32>
      %cst_146 = arith.constant 1.000000e+02 : f32
      %616 = vector.broadcast %cst_146 : f32 to vector<16x128xf32>
      %617 = arith.subf %616, %615 : vector<16x128xf32>
      %cst_147 = arith.constant 0.0101010101 : f32
      %618 = vector.broadcast %cst_147 : f32 to vector<16x128xf32>
      %619 = arith.mulf %617, %618 : vector<16x128xf32>
      %620 = arith.subf %619, %35 : vector<16x128xf32>
      %cst_148 = arith.constant 1.000000e+04 : f32
      %621 = vector.broadcast %cst_148 : f32 to vector<16x128xf32>
      %622 = arith.mulf %620, %621 : vector<16x128xf32>
      %623 = math.exp %622 : vector<16x128xf32>
      %624 = arith.mulf %612, %623 : vector<16x128xf32>
      %625 = arith.addf %328, %624 : vector<16x128xf32>
      %626 = arith.mulf %624, %586 : vector<16x128xf32>
      %627 = arith.addf %330, %626 : vector<16x128xf32>
      %628 = arith.mulf %624, %594 : vector<16x128xf32>
      %629 = arith.addf %332, %628 : vector<16x128xf32>
      %630 = arith.mulf %624, %602 : vector<16x128xf32>
      %631 = arith.addf %334, %630 : vector<16x128xf32>
      %cst_149 = arith.constant 1.000000e+00 : f32
      %632 = vector.broadcast %cst_149 : f32 to vector<16x128xf32>
      %633 = arith.subf %632, %612 : vector<16x128xf32>
      %634 = arith.mulf %337, %633 : vector<16x128xf32>
      %c4_150 = arith.constant 4 : index
      %635 = arith.index_cast %2 : i32 to index
      %c0_151 = arith.constant 0 : index
      %636 = vector.load %arg2[%c4_150, %635, %c0_151] : memref<8x32x128xf32, #tpu.memory_space<vmem>>, vector<1x16x128xf32>
      %637 = vector.shape_cast %636 : vector<1x16x128xf32> to vector<16x128xf32>
      %c5_152 = arith.constant 5 : index
      %638 = arith.index_cast %2 : i32 to index
      %c0_153 = arith.constant 0 : index
      %639 = vector.load %arg2[%c5_152, %638, %c0_153] : memref<8x32x128xf32, #tpu.memory_space<vmem>>, vector<1x16x128xf32>
      %640 = vector.shape_cast %639 : vector<1x16x128xf32> to vector<16x128xf32>
      %cst_154 = arith.constant 1.000000e+00 : f32
      %641 = vector.broadcast %cst_154 : f32 to vector<16x128xf32>
      %642 = arith.subf %641, %637 : vector<16x128xf32>
      %643 = arith.subf %642, %640 : vector<16x128xf32>
      %c54 = arith.constant 54 : index
      %644 = arith.index_cast %2 : i32 to index
      %c0_155 = arith.constant 0 : index
      %645 = vector.load %arg1[%c54, %644, %c0_155] : memref<108x32x128xbf16, #tpu.memory_space<vmem>>, vector<1x16x128xbf16>
      %646 = vector.shape_cast %645 : vector<1x16x128xbf16> to vector<16x128xbf16>
      %647 = arith.extf %646 : vector<16x128xbf16> to vector<16x128xf32>
      %648 = arith.mulf %637, %647 : vector<16x128xf32>
      %c63 = arith.constant 63 : index
      %649 = arith.index_cast %2 : i32 to index
      %c0_156 = arith.constant 0 : index
      %650 = vector.load %arg1[%c63, %649, %c0_156] : memref<108x32x128xbf16, #tpu.memory_space<vmem>>, vector<1x16x128xbf16>
      %651 = vector.shape_cast %650 : vector<1x16x128xbf16> to vector<16x128xbf16>
      %652 = arith.extf %651 : vector<16x128xbf16> to vector<16x128xf32>
      %653 = arith.mulf %640, %652 : vector<16x128xf32>
      %654 = arith.addf %648, %653 : vector<16x128xf32>
      %c72 = arith.constant 72 : index
      %655 = arith.index_cast %2 : i32 to index
      %c0_157 = arith.constant 0 : index
      %656 = vector.load %arg1[%c72, %655, %c0_157] : memref<108x32x128xbf16, #tpu.memory_space<vmem>>, vector<1x16x128xbf16>
      %657 = vector.shape_cast %656 : vector<1x16x128xbf16> to vector<16x128xbf16>
      %658 = arith.extf %657 : vector<16x128xbf16> to vector<16x128xf32>
      %659 = arith.mulf %643, %658 : vector<16x128xf32>
      %660 = arith.addf %654, %659 : vector<16x128xf32>
      %c55 = arith.constant 55 : index
      %661 = arith.index_cast %2 : i32 to index
      %c0_158 = arith.constant 0 : index
      %662 = vector.load %arg1[%c55, %661, %c0_158] : memref<108x32x128xbf16, #tpu.memory_space<vmem>>, vector<1x16x128xbf16>
      %663 = vector.shape_cast %662 : vector<1x16x128xbf16> to vector<16x128xbf16>
      %664 = arith.extf %663 : vector<16x128xbf16> to vector<16x128xf32>
      %665 = arith.mulf %637, %664 : vector<16x128xf32>
      %c64 = arith.constant 64 : index
      %666 = arith.index_cast %2 : i32 to index
      %c0_159 = arith.constant 0 : index
      %667 = vector.load %arg1[%c64, %666, %c0_159] : memref<108x32x128xbf16, #tpu.memory_space<vmem>>, vector<1x16x128xbf16>
      %668 = vector.shape_cast %667 : vector<1x16x128xbf16> to vector<16x128xbf16>
      %669 = arith.extf %668 : vector<16x128xbf16> to vector<16x128xf32>
      %670 = arith.mulf %640, %669 : vector<16x128xf32>
      %671 = arith.addf %665, %670 : vector<16x128xf32>
      %c73 = arith.constant 73 : index
      %672 = arith.index_cast %2 : i32 to index
      %c0_160 = arith.constant 0 : index
      %673 = vector.load %arg1[%c73, %672, %c0_160] : memref<108x32x128xbf16, #tpu.memory_space<vmem>>, vector<1x16x128xbf16>
      %674 = vector.shape_cast %673 : vector<1x16x128xbf16> to vector<16x128xbf16>
      %675 = arith.extf %674 : vector<16x128xbf16> to vector<16x128xf32>
      %676 = arith.mulf %643, %675 : vector<16x128xf32>
      %677 = arith.addf %671, %676 : vector<16x128xf32>
      %c56 = arith.constant 56 : index
      %678 = arith.index_cast %2 : i32 to index
      %c0_161 = arith.constant 0 : index
      %679 = vector.load %arg1[%c56, %678, %c0_161] : memref<108x32x128xbf16, #tpu.memory_space<vmem>>, vector<1x16x128xbf16>
      %680 = vector.shape_cast %679 : vector<1x16x128xbf16> to vector<16x128xbf16>
      %681 = arith.extf %680 : vector<16x128xbf16> to vector<16x128xf32>
      %682 = arith.mulf %637, %681 : vector<16x128xf32>
      %c65 = arith.constant 65 : index
      %683 = arith.index_cast %2 : i32 to index
      %c0_162 = arith.constant 0 : index
      %684 = vector.load %arg1[%c65, %683, %c0_162] : memref<108x32x128xbf16, #tpu.memory_space<vmem>>, vector<1x16x128xbf16>
      %685 = vector.shape_cast %684 : vector<1x16x128xbf16> to vector<16x128xbf16>
      %686 = arith.extf %685 : vector<16x128xbf16> to vector<16x128xf32>
      %687 = arith.mulf %640, %686 : vector<16x128xf32>
      %688 = arith.addf %682, %687 : vector<16x128xf32>
      %c74 = arith.constant 74 : index
      %689 = arith.index_cast %2 : i32 to index
      %c0_163 = arith.constant 0 : index
      %690 = vector.load %arg1[%c74, %689, %c0_163] : memref<108x32x128xbf16, #tpu.memory_space<vmem>>, vector<1x16x128xbf16>
      %691 = vector.shape_cast %690 : vector<1x16x128xbf16> to vector<16x128xbf16>
      %692 = arith.extf %691 : vector<16x128xbf16> to vector<16x128xf32>
      %693 = arith.mulf %643, %692 : vector<16x128xf32>
      %694 = arith.addf %688, %693 : vector<16x128xf32>
      %cst_164 = arith.constant 0.000000e+00 : f32
      %695 = vector.broadcast %cst_164 : f32 to vector<16x128xf32>
      %696 = arith.subf %695, %660 : vector<16x128xf32>
      %cst_165 = arith.constant 1.000000e+00 : f32
      %697 = vector.broadcast %cst_165 : f32 to vector<16x128xf32>
      %698 = arith.subf %697, %677 : vector<16x128xf32>
      %cst_166 = arith.constant 0.000000e+00 : f32
      %699 = vector.broadcast %cst_166 : f32 to vector<16x128xf32>
      %700 = arith.subf %699, %694 : vector<16x128xf32>
      %cst_167 = arith.constant 0.000000e+00 : f32
      %701 = vector.broadcast %cst_167 : f32 to vector<16x128xf32>
      %702 = arith.subf %701, %660 : vector<16x128xf32>
      %cst_168 = arith.constant 0.000000e+00 : f32
      %703 = vector.broadcast %cst_168 : f32 to vector<16x128xf32>
      %704 = arith.subf %703, %677 : vector<16x128xf32>
      %cst_169 = arith.constant 3.000000e+00 : f32
      %705 = vector.broadcast %cst_169 : f32 to vector<16x128xf32>
      %706 = arith.subf %705, %694 : vector<16x128xf32>
      %707 = arith.mulf %696, %696 : vector<16x128xf32>
      %708 = arith.mulf %698, %698 : vector<16x128xf32>
      %709 = arith.addf %707, %708 : vector<16x128xf32>
      %710 = arith.mulf %700, %700 : vector<16x128xf32>
      %711 = arith.addf %709, %710 : vector<16x128xf32>
      %cst_170 = arith.constant 9.99999996E-13 : f32
      %712 = vector.broadcast %cst_170 : f32 to vector<16x128xf32>
      %713 = arith.maximumf %711, %712 : vector<16x128xf32>
      %714 = math.rsqrt %713 : vector<16x128xf32>
      %715 = arith.mulf %702, %702 : vector<16x128xf32>
      %716 = arith.mulf %704, %704 : vector<16x128xf32>
      %717 = arith.addf %715, %716 : vector<16x128xf32>
      %718 = arith.mulf %706, %706 : vector<16x128xf32>
      %719 = arith.addf %717, %718 : vector<16x128xf32>
      %cst_171 = arith.constant 9.99999996E-13 : f32
      %720 = vector.broadcast %cst_171 : f32 to vector<16x128xf32>
      %721 = arith.maximumf %719, %720 : vector<16x128xf32>
      %722 = math.rsqrt %721 : vector<16x128xf32>
      %723 = arith.mulf %696, %714 : vector<16x128xf32>
      %724 = arith.mulf %698, %714 : vector<16x128xf32>
      %725 = arith.mulf %700, %714 : vector<16x128xf32>
      %726 = arith.mulf %702, %722 : vector<16x128xf32>
      %727 = arith.mulf %704, %722 : vector<16x128xf32>
      %728 = arith.mulf %706, %722 : vector<16x128xf32>
      %c57 = arith.constant 57 : index
      %729 = arith.index_cast %2 : i32 to index
      %c0_172 = arith.constant 0 : index
      %730 = vector.load %arg1[%c57, %729, %c0_172] : memref<108x32x128xbf16, #tpu.memory_space<vmem>>, vector<1x16x128xbf16>
      %731 = vector.shape_cast %730 : vector<1x16x128xbf16> to vector<16x128xbf16>
      %732 = arith.extf %731 : vector<16x128xbf16> to vector<16x128xf32>
      %733 = arith.mulf %637, %732 : vector<16x128xf32>
      %c66 = arith.constant 66 : index
      %734 = arith.index_cast %2 : i32 to index
      %c0_173 = arith.constant 0 : index
      %735 = vector.load %arg1[%c66, %734, %c0_173] : memref<108x32x128xbf16, #tpu.memory_space<vmem>>, vector<1x16x128xbf16>
      %736 = vector.shape_cast %735 : vector<1x16x128xbf16> to vector<16x128xbf16>
      %737 = arith.extf %736 : vector<16x128xbf16> to vector<16x128xf32>
      %738 = arith.mulf %640, %737 : vector<16x128xf32>
      %739 = arith.addf %733, %738 : vector<16x128xf32>
      %c75 = arith.constant 75 : index
      %740 = arith.index_cast %2 : i32 to index
      %c0_174 = arith.constant 0 : index
      %741 = vector.load %arg1[%c75, %740, %c0_174] : memref<108x32x128xbf16, #tpu.memory_space<vmem>>, vector<1x16x128xbf16>
      %742 = vector.shape_cast %741 : vector<1x16x128xbf16> to vector<16x128xbf16>
      %743 = arith.extf %742 : vector<16x128xbf16> to vector<16x128xf32>
      %744 = arith.mulf %643, %743 : vector<16x128xf32>
      %745 = arith.addf %739, %744 : vector<16x128xf32>
      %c58 = arith.constant 58 : index
      %746 = arith.index_cast %2 : i32 to index
      %c0_175 = arith.constant 0 : index
      %747 = vector.load %arg1[%c58, %746, %c0_175] : memref<108x32x128xbf16, #tpu.memory_space<vmem>>, vector<1x16x128xbf16>
      %748 = vector.shape_cast %747 : vector<1x16x128xbf16> to vector<16x128xbf16>
      %749 = arith.extf %748 : vector<16x128xbf16> to vector<16x128xf32>
      %750 = arith.mulf %637, %749 : vector<16x128xf32>
      %c67 = arith.constant 67 : index
      %751 = arith.index_cast %2 : i32 to index
      %c0_176 = arith.constant 0 : index
      %752 = vector.load %arg1[%c67, %751, %c0_176] : memref<108x32x128xbf16, #tpu.memory_space<vmem>>, vector<1x16x128xbf16>
      %753 = vector.shape_cast %752 : vector<1x16x128xbf16> to vector<16x128xbf16>
      %754 = arith.extf %753 : vector<16x128xbf16> to vector<16x128xf32>
      %755 = arith.mulf %640, %754 : vector<16x128xf32>
      %756 = arith.addf %750, %755 : vector<16x128xf32>
      %c76 = arith.constant 76 : index
      %757 = arith.index_cast %2 : i32 to index
      %c0_177 = arith.constant 0 : index
      %758 = vector.load %arg1[%c76, %757, %c0_177] : memref<108x32x128xbf16, #tpu.memory_space<vmem>>, vector<1x16x128xbf16>
      %759 = vector.shape_cast %758 : vector<1x16x128xbf16> to vector<16x128xbf16>
      %760 = arith.extf %759 : vector<16x128xbf16> to vector<16x128xf32>
      %761 = arith.mulf %643, %760 : vector<16x128xf32>
      %762 = arith.addf %756, %761 : vector<16x128xf32>
      %c59 = arith.constant 59 : index
      %763 = arith.index_cast %2 : i32 to index
      %c0_178 = arith.constant 0 : index
      %764 = vector.load %arg1[%c59, %763, %c0_178] : memref<108x32x128xbf16, #tpu.memory_space<vmem>>, vector<1x16x128xbf16>
      %765 = vector.shape_cast %764 : vector<1x16x128xbf16> to vector<16x128xbf16>
      %766 = arith.extf %765 : vector<16x128xbf16> to vector<16x128xf32>
      %767 = arith.mulf %637, %766 : vector<16x128xf32>
      %c68 = arith.constant 68 : index
      %768 = arith.index_cast %2 : i32 to index
      %c0_179 = arith.constant 0 : index
      %769 = vector.load %arg1[%c68, %768, %c0_179] : memref<108x32x128xbf16, #tpu.memory_space<vmem>>, vector<1x16x128xbf16>
      %770 = vector.shape_cast %769 : vector<1x16x128xbf16> to vector<16x128xbf16>
      %771 = arith.extf %770 : vector<16x128xbf16> to vector<16x128xf32>
      %772 = arith.mulf %640, %771 : vector<16x128xf32>
      %773 = arith.addf %767, %772 : vector<16x128xf32>
      %c77 = arith.constant 77 : index
      %774 = arith.index_cast %2 : i32 to index
      %c0_180 = arith.constant 0 : index
      %775 = vector.load %arg1[%c77, %774, %c0_180] : memref<108x32x128xbf16, #tpu.memory_space<vmem>>, vector<1x16x128xbf16>
      %776 = vector.shape_cast %775 : vector<1x16x128xbf16> to vector<16x128xbf16>
      %777 = arith.extf %776 : vector<16x128xbf16> to vector<16x128xf32>
      %778 = arith.mulf %643, %777 : vector<16x128xf32>
      %779 = arith.addf %773, %778 : vector<16x128xf32>
      %780 = arith.mulf %745, %745 : vector<16x128xf32>
      %781 = arith.mulf %762, %762 : vector<16x128xf32>
      %782 = arith.addf %780, %781 : vector<16x128xf32>
      %783 = arith.mulf %779, %779 : vector<16x128xf32>
      %784 = arith.addf %782, %783 : vector<16x128xf32>
      %cst_181 = arith.constant 9.99999996E-13 : f32
      %785 = vector.broadcast %cst_181 : f32 to vector<16x128xf32>
      %786 = arith.maximumf %784, %785 : vector<16x128xf32>
      %787 = math.rsqrt %786 : vector<16x128xf32>
      %788 = arith.mulf %745, %787 : vector<16x128xf32>
      %789 = arith.mulf %762, %787 : vector<16x128xf32>
      %790 = arith.mulf %779, %787 : vector<16x128xf32>
      %791 = arith.mulf %788, %723 : vector<16x128xf32>
      %792 = arith.mulf %789, %724 : vector<16x128xf32>
      %793 = arith.addf %791, %792 : vector<16x128xf32>
      %794 = arith.mulf %790, %725 : vector<16x128xf32>
      %795 = arith.addf %793, %794 : vector<16x128xf32>
      %cst_182 = arith.constant 0.000000e+00 : f32
      %796 = vector.broadcast %cst_182 : f32 to vector<16x128xf32>
      %797 = arith.maximumf %795, %796 : vector<16x128xf32>
      %cst_183 = arith.constant 0.000000e+00 : f32
      %798 = vector.broadcast %cst_183 : f32 to vector<16x128xf32>
      %799 = arith.cmpf ogt, %795, %798 : vector<16x128xf32>
      %800 = arith.extui %799 : vector<16x128xi1> to vector<16x128xi32>
      %801 = arith.sitofp %800 : vector<16x128xi32> to vector<16x128xf32>
      %802 = arith.mulf %788, %726 : vector<16x128xf32>
      %803 = arith.mulf %789, %727 : vector<16x128xf32>
      %804 = arith.addf %802, %803 : vector<16x128xf32>
      %805 = arith.mulf %790, %728 : vector<16x128xf32>
      %806 = arith.addf %804, %805 : vector<16x128xf32>
      %807 = arith.mulf %723, %726 : vector<16x128xf32>
      %808 = arith.mulf %724, %727 : vector<16x128xf32>
      %809 = arith.addf %807, %808 : vector<16x128xf32>
      %810 = arith.mulf %725, %728 : vector<16x128xf32>
      %811 = arith.addf %809, %810 : vector<16x128xf32>
      %cst_184 = arith.constant 2.000000e+00 : f32
      %812 = vector.broadcast %cst_184 : f32 to vector<16x128xf32>
      %813 = arith.mulf %812, %795 : vector<16x128xf32>
      %814 = arith.mulf %813, %806 : vector<16x128xf32>
      %815 = arith.subf %814, %811 : vector<16x128xf32>
      %cst_185 = arith.constant 0.000000e+00 : f32
      %816 = vector.broadcast %cst_185 : f32 to vector<16x128xf32>
      %817 = arith.maximumf %815, %816 : vector<16x128xf32>
      %818 = arith.mulf %817, %801 : vector<16x128xf32>
      %819 = arith.mulf %818, %818 : vector<16x128xf32>
      %820 = arith.mulf %819, %819 : vector<16x128xf32>
      %821 = arith.mulf %820, %820 : vector<16x128xf32>
      %822 = arith.mulf %821, %821 : vector<16x128xf32>
      %823 = arith.mulf %822, %822 : vector<16x128xf32>
      %824 = arith.mulf %823, %823 : vector<16x128xf32>
      %c60 = arith.constant 60 : index
      %825 = arith.index_cast %2 : i32 to index
      %c0_186 = arith.constant 0 : index
      %826 = vector.load %arg1[%c60, %825, %c0_186] : memref<108x32x128xbf16, #tpu.memory_space<vmem>>, vector<1x16x128xbf16>
      %827 = vector.shape_cast %826 : vector<1x16x128xbf16> to vector<16x128xbf16>
      %828 = arith.extf %827 : vector<16x128xbf16> to vector<16x128xf32>
      %829 = arith.mulf %637, %828 : vector<16x128xf32>
      %c69 = arith.constant 69 : index
      %830 = arith.index_cast %2 : i32 to index
      %c0_187 = arith.constant 0 : index
      %831 = vector.load %arg1[%c69, %830, %c0_187] : memref<108x32x128xbf16, #tpu.memory_space<vmem>>, vector<1x16x128xbf16>
      %832 = vector.shape_cast %831 : vector<1x16x128xbf16> to vector<16x128xbf16>
      %833 = arith.extf %832 : vector<16x128xbf16> to vector<16x128xf32>
      %834 = arith.mulf %640, %833 : vector<16x128xf32>
      %835 = arith.addf %829, %834 : vector<16x128xf32>
      %c78 = arith.constant 78 : index
      %836 = arith.index_cast %2 : i32 to index
      %c0_188 = arith.constant 0 : index
      %837 = vector.load %arg1[%c78, %836, %c0_188] : memref<108x32x128xbf16, #tpu.memory_space<vmem>>, vector<1x16x128xbf16>
      %838 = vector.shape_cast %837 : vector<1x16x128xbf16> to vector<16x128xbf16>
      %839 = arith.extf %838 : vector<16x128xbf16> to vector<16x128xf32>
      %840 = arith.mulf %643, %839 : vector<16x128xf32>
      %841 = arith.addf %835, %840 : vector<16x128xf32>
      %c61 = arith.constant 61 : index
      %842 = arith.index_cast %2 : i32 to index
      %c0_189 = arith.constant 0 : index
      %843 = vector.load %arg1[%c61, %842, %c0_189] : memref<108x32x128xbf16, #tpu.memory_space<vmem>>, vector<1x16x128xbf16>
      %844 = vector.shape_cast %843 : vector<1x16x128xbf16> to vector<16x128xbf16>
      %845 = arith.extf %844 : vector<16x128xbf16> to vector<16x128xf32>
      %846 = arith.mulf %637, %845 : vector<16x128xf32>
      %c70 = arith.constant 70 : index
      %847 = arith.index_cast %2 : i32 to index
      %c0_190 = arith.constant 0 : index
      %848 = vector.load %arg1[%c70, %847, %c0_190] : memref<108x32x128xbf16, #tpu.memory_space<vmem>>, vector<1x16x128xbf16>
      %849 = vector.shape_cast %848 : vector<1x16x128xbf16> to vector<16x128xbf16>
      %850 = arith.extf %849 : vector<16x128xbf16> to vector<16x128xf32>
      %851 = arith.mulf %640, %850 : vector<16x128xf32>
      %852 = arith.addf %846, %851 : vector<16x128xf32>
      %c79 = arith.constant 79 : index
      %853 = arith.index_cast %2 : i32 to index
      %c0_191 = arith.constant 0 : index
      %854 = vector.load %arg1[%c79, %853, %c0_191] : memref<108x32x128xbf16, #tpu.memory_space<vmem>>, vector<1x16x128xbf16>
      %855 = vector.shape_cast %854 : vector<1x16x128xbf16> to vector<16x128xbf16>
      %856 = arith.extf %855 : vector<16x128xbf16> to vector<16x128xf32>
      %857 = arith.mulf %643, %856 : vector<16x128xf32>
      %858 = arith.addf %852, %857 : vector<16x128xf32>
      %c62 = arith.constant 62 : index
      %859 = arith.index_cast %2 : i32 to index
      %c0_192 = arith.constant 0 : index
      %860 = vector.load %arg1[%c62, %859, %c0_192] : memref<108x32x128xbf16, #tpu.memory_space<vmem>>, vector<1x16x128xbf16>
      %861 = vector.shape_cast %860 : vector<1x16x128xbf16> to vector<16x128xbf16>
      %862 = arith.extf %861 : vector<16x128xbf16> to vector<16x128xf32>
      %863 = arith.mulf %637, %862 : vector<16x128xf32>
      %c71 = arith.constant 71 : index
      %864 = arith.index_cast %2 : i32 to index
      %c0_193 = arith.constant 0 : index
      %865 = vector.load %arg1[%c71, %864, %c0_193] : memref<108x32x128xbf16, #tpu.memory_space<vmem>>, vector<1x16x128xbf16>
      %866 = vector.shape_cast %865 : vector<1x16x128xbf16> to vector<16x128xbf16>
      %867 = arith.extf %866 : vector<16x128xbf16> to vector<16x128xf32>
      %868 = arith.mulf %640, %867 : vector<16x128xf32>
      %869 = arith.addf %863, %868 : vector<16x128xf32>
      %c80 = arith.constant 80 : index
      %870 = arith.index_cast %2 : i32 to index
      %c0_194 = arith.constant 0 : index
      %871 = vector.load %arg1[%c80, %870, %c0_194] : memref<108x32x128xbf16, #tpu.memory_space<vmem>>, vector<1x16x128xbf16>
      %872 = vector.shape_cast %871 : vector<1x16x128xbf16> to vector<16x128xbf16>
      %873 = arith.extf %872 : vector<16x128xbf16> to vector<16x128xf32>
      %874 = arith.mulf %643, %873 : vector<16x128xf32>
      %875 = arith.addf %869, %874 : vector<16x128xf32>
      %cst_195 = arith.constant 3.000000e-01 : f32
      %876 = vector.broadcast %cst_195 : f32 to vector<16x128xf32>
      %877 = arith.mulf %876, %797 : vector<16x128xf32>
      %cst_196 = arith.constant 5.000000e-01 : f32
      %878 = vector.broadcast %cst_196 : f32 to vector<16x128xf32>
      %879 = arith.addf %878, %877 : vector<16x128xf32>
      %880 = arith.mulf %879, %841 : vector<16x128xf32>
      %cst_197 = arith.constant 2.000000e-01 : f32
      %881 = vector.broadcast %cst_197 : f32 to vector<16x128xf32>
      %882 = arith.mulf %881, %824 : vector<16x128xf32>
      %883 = arith.addf %880, %882 : vector<16x128xf32>
      %cst_198 = arith.constant 3.000000e-01 : f32
      %884 = vector.broadcast %cst_198 : f32 to vector<16x128xf32>
      %885 = arith.mulf %884, %797 : vector<16x128xf32>
      %cst_199 = arith.constant 5.000000e-01 : f32
      %886 = vector.broadcast %cst_199 : f32 to vector<16x128xf32>
      %887 = arith.addf %886, %885 : vector<16x128xf32>
      %888 = arith.mulf %887, %858 : vector<16x128xf32>
      %cst_200 = arith.constant 2.000000e-01 : f32
      %889 = vector.broadcast %cst_200 : f32 to vector<16x128xf32>
      %890 = arith.mulf %889, %824 : vector<16x128xf32>
      %891 = arith.addf %888, %890 : vector<16x128xf32>
      %cst_201 = arith.constant 3.000000e-01 : f32
      %892 = vector.broadcast %cst_201 : f32 to vector<16x128xf32>
      %893 = arith.mulf %892, %797 : vector<16x128xf32>
      %cst_202 = arith.constant 5.000000e-01 : f32
      %894 = vector.broadcast %cst_202 : f32 to vector<16x128xf32>
      %895 = arith.addf %894, %893 : vector<16x128xf32>
      %896 = arith.mulf %895, %875 : vector<16x128xf32>
      %cst_203 = arith.constant 2.000000e-01 : f32
      %897 = vector.broadcast %cst_203 : f32 to vector<16x128xf32>
      %898 = arith.mulf %897, %824 : vector<16x128xf32>
      %899 = arith.addf %896, %898 : vector<16x128xf32>
      %c6_204 = arith.constant 6 : index
      %900 = arith.index_cast %2 : i32 to index
      %c0_205 = arith.constant 0 : index
      %901 = vector.load %arg3[%c6_204, %900, %c0_205] : memref<8x32x128xf32, #tpu.memory_space<vmem>>, vector<1x16x128xf32>
      %902 = vector.shape_cast %901 : vector<1x16x128xf32> to vector<16x128xf32>
      %cst_206 = arith.constant -1.000000e+04 : f32
      %903 = vector.broadcast %cst_206 : f32 to vector<16x128xf32>
      %904 = arith.mulf %902, %903 : vector<16x128xf32>
      %905 = arith.negf %904 : vector<16x128xf32>
      %906 = math.exp %905 : vector<16x128xf32>
      %cst_207 = arith.constant 1.000000e+00 : f32
      %907 = vector.broadcast %cst_207 : f32 to vector<16x128xf32>
      %908 = arith.addf %907, %906 : vector<16x128xf32>
      %909 = arith.divf %907, %908 : vector<16x128xf32>
      %c2_208 = arith.constant 2 : index
      %910 = arith.index_cast %2 : i32 to index
      %c0_209 = arith.constant 0 : index
      %911 = vector.load %arg3[%c2_208, %910, %c0_209] : memref<8x32x128xf32, #tpu.memory_space<vmem>>, vector<1x16x128xf32>
      %912 = vector.shape_cast %911 : vector<1x16x128xf32> to vector<16x128xf32>
      %cst_210 = arith.constant 1.000000e+02 : f32
      %913 = vector.broadcast %cst_210 : f32 to vector<16x128xf32>
      %914 = arith.subf %913, %912 : vector<16x128xf32>
      %cst_211 = arith.constant 0.0101010101 : f32
      %915 = vector.broadcast %cst_211 : f32 to vector<16x128xf32>
      %916 = arith.mulf %914, %915 : vector<16x128xf32>
      %917 = arith.subf %916, %35 : vector<16x128xf32>
      %cst_212 = arith.constant 1.000000e+04 : f32
      %918 = vector.broadcast %cst_212 : f32 to vector<16x128xf32>
      %919 = arith.mulf %917, %918 : vector<16x128xf32>
      %920 = math.exp %919 : vector<16x128xf32>
      %921 = arith.mulf %909, %920 : vector<16x128xf32>
      %922 = arith.addf %625, %921 : vector<16x128xf32>
      %923 = arith.mulf %921, %883 : vector<16x128xf32>
      %924 = arith.addf %627, %923 : vector<16x128xf32>
      %925 = arith.mulf %921, %891 : vector<16x128xf32>
      %926 = arith.addf %629, %925 : vector<16x128xf32>
      %927 = arith.mulf %921, %899 : vector<16x128xf32>
      %928 = arith.addf %631, %927 : vector<16x128xf32>
      %cst_213 = arith.constant 1.000000e+00 : f32
      %929 = vector.broadcast %cst_213 : f32 to vector<16x128xf32>
      %930 = arith.subf %929, %909 : vector<16x128xf32>
      %931 = arith.mulf %634, %930 : vector<16x128xf32>
      %c6_214 = arith.constant 6 : index
      %932 = arith.index_cast %2 : i32 to index
      %c0_215 = arith.constant 0 : index
      %933 = vector.load %arg2[%c6_214, %932, %c0_215] : memref<8x32x128xf32, #tpu.memory_space<vmem>>, vector<1x16x128xf32>
      %934 = vector.shape_cast %933 : vector<1x16x128xf32> to vector<16x128xf32>
      %c7_216 = arith.constant 7 : index
      %935 = arith.index_cast %2 : i32 to index
      %c0_217 = arith.constant 0 : index
      %936 = vector.load %arg2[%c7_216, %935, %c0_217] : memref<8x32x128xf32, #tpu.memory_space<vmem>>, vector<1x16x128xf32>
      %937 = vector.shape_cast %936 : vector<1x16x128xf32> to vector<16x128xf32>
      %cst_218 = arith.constant 1.000000e+00 : f32
      %938 = vector.broadcast %cst_218 : f32 to vector<16x128xf32>
      %939 = arith.subf %938, %934 : vector<16x128xf32>
      %940 = arith.subf %939, %937 : vector<16x128xf32>
      %c81 = arith.constant 81 : index
      %941 = arith.index_cast %2 : i32 to index
      %c0_219 = arith.constant 0 : index
      %942 = vector.load %arg1[%c81, %941, %c0_219] : memref<108x32x128xbf16, #tpu.memory_space<vmem>>, vector<1x16x128xbf16>
      %943 = vector.shape_cast %942 : vector<1x16x128xbf16> to vector<16x128xbf16>
      %944 = arith.extf %943 : vector<16x128xbf16> to vector<16x128xf32>
      %945 = arith.mulf %934, %944 : vector<16x128xf32>
      %c90 = arith.constant 90 : index
      %946 = arith.index_cast %2 : i32 to index
      %c0_220 = arith.constant 0 : index
      %947 = vector.load %arg1[%c90, %946, %c0_220] : memref<108x32x128xbf16, #tpu.memory_space<vmem>>, vector<1x16x128xbf16>
      %948 = vector.shape_cast %947 : vector<1x16x128xbf16> to vector<16x128xbf16>
      %949 = arith.extf %948 : vector<16x128xbf16> to vector<16x128xf32>
      %950 = arith.mulf %937, %949 : vector<16x128xf32>
      %951 = arith.addf %945, %950 : vector<16x128xf32>
      %c99 = arith.constant 99 : index
      %952 = arith.index_cast %2 : i32 to index
      %c0_221 = arith.constant 0 : index
      %953 = vector.load %arg1[%c99, %952, %c0_221] : memref<108x32x128xbf16, #tpu.memory_space<vmem>>, vector<1x16x128xbf16>
      %954 = vector.shape_cast %953 : vector<1x16x128xbf16> to vector<16x128xbf16>
      %955 = arith.extf %954 : vector<16x128xbf16> to vector<16x128xf32>
      %956 = arith.mulf %940, %955 : vector<16x128xf32>
      %957 = arith.addf %951, %956 : vector<16x128xf32>
      %c82 = arith.constant 82 : index
      %958 = arith.index_cast %2 : i32 to index
      %c0_222 = arith.constant 0 : index
      %959 = vector.load %arg1[%c82, %958, %c0_222] : memref<108x32x128xbf16, #tpu.memory_space<vmem>>, vector<1x16x128xbf16>
      %960 = vector.shape_cast %959 : vector<1x16x128xbf16> to vector<16x128xbf16>
      %961 = arith.extf %960 : vector<16x128xbf16> to vector<16x128xf32>
      %962 = arith.mulf %934, %961 : vector<16x128xf32>
      %c91 = arith.constant 91 : index
      %963 = arith.index_cast %2 : i32 to index
      %c0_223 = arith.constant 0 : index
      %964 = vector.load %arg1[%c91, %963, %c0_223] : memref<108x32x128xbf16, #tpu.memory_space<vmem>>, vector<1x16x128xbf16>
      %965 = vector.shape_cast %964 : vector<1x16x128xbf16> to vector<16x128xbf16>
      %966 = arith.extf %965 : vector<16x128xbf16> to vector<16x128xf32>
      %967 = arith.mulf %937, %966 : vector<16x128xf32>
      %968 = arith.addf %962, %967 : vector<16x128xf32>
      %c100 = arith.constant 100 : index
      %969 = arith.index_cast %2 : i32 to index
      %c0_224 = arith.constant 0 : index
      %970 = vector.load %arg1[%c100, %969, %c0_224] : memref<108x32x128xbf16, #tpu.memory_space<vmem>>, vector<1x16x128xbf16>
      %971 = vector.shape_cast %970 : vector<1x16x128xbf16> to vector<16x128xbf16>
      %972 = arith.extf %971 : vector<16x128xbf16> to vector<16x128xf32>
      %973 = arith.mulf %940, %972 : vector<16x128xf32>
      %974 = arith.addf %968, %973 : vector<16x128xf32>
      %c83 = arith.constant 83 : index
      %975 = arith.index_cast %2 : i32 to index
      %c0_225 = arith.constant 0 : index
      %976 = vector.load %arg1[%c83, %975, %c0_225] : memref<108x32x128xbf16, #tpu.memory_space<vmem>>, vector<1x16x128xbf16>
      %977 = vector.shape_cast %976 : vector<1x16x128xbf16> to vector<16x128xbf16>
      %978 = arith.extf %977 : vector<16x128xbf16> to vector<16x128xf32>
      %979 = arith.mulf %934, %978 : vector<16x128xf32>
      %c92 = arith.constant 92 : index
      %980 = arith.index_cast %2 : i32 to index
      %c0_226 = arith.constant 0 : index
      %981 = vector.load %arg1[%c92, %980, %c0_226] : memref<108x32x128xbf16, #tpu.memory_space<vmem>>, vector<1x16x128xbf16>
      %982 = vector.shape_cast %981 : vector<1x16x128xbf16> to vector<16x128xbf16>
      %983 = arith.extf %982 : vector<16x128xbf16> to vector<16x128xf32>
      %984 = arith.mulf %937, %983 : vector<16x128xf32>
      %985 = arith.addf %979, %984 : vector<16x128xf32>
      %c101 = arith.constant 101 : index
      %986 = arith.index_cast %2 : i32 to index
      %c0_227 = arith.constant 0 : index
      %987 = vector.load %arg1[%c101, %986, %c0_227] : memref<108x32x128xbf16, #tpu.memory_space<vmem>>, vector<1x16x128xbf16>
      %988 = vector.shape_cast %987 : vector<1x16x128xbf16> to vector<16x128xbf16>
      %989 = arith.extf %988 : vector<16x128xbf16> to vector<16x128xf32>
      %990 = arith.mulf %940, %989 : vector<16x128xf32>
      %991 = arith.addf %985, %990 : vector<16x128xf32>
      %cst_228 = arith.constant 0.000000e+00 : f32
      %992 = vector.broadcast %cst_228 : f32 to vector<16x128xf32>
      %993 = arith.subf %992, %957 : vector<16x128xf32>
      %cst_229 = arith.constant 1.000000e+00 : f32
      %994 = vector.broadcast %cst_229 : f32 to vector<16x128xf32>
      %995 = arith.subf %994, %974 : vector<16x128xf32>
      %cst_230 = arith.constant 0.000000e+00 : f32
      %996 = vector.broadcast %cst_230 : f32 to vector<16x128xf32>
      %997 = arith.subf %996, %991 : vector<16x128xf32>
      %cst_231 = arith.constant 0.000000e+00 : f32
      %998 = vector.broadcast %cst_231 : f32 to vector<16x128xf32>
      %999 = arith.subf %998, %957 : vector<16x128xf32>
      %cst_232 = arith.constant 0.000000e+00 : f32
      %1000 = vector.broadcast %cst_232 : f32 to vector<16x128xf32>
      %1001 = arith.subf %1000, %974 : vector<16x128xf32>
      %cst_233 = arith.constant 3.000000e+00 : f32
      %1002 = vector.broadcast %cst_233 : f32 to vector<16x128xf32>
      %1003 = arith.subf %1002, %991 : vector<16x128xf32>
      %1004 = arith.mulf %993, %993 : vector<16x128xf32>
      %1005 = arith.mulf %995, %995 : vector<16x128xf32>
      %1006 = arith.addf %1004, %1005 : vector<16x128xf32>
      %1007 = arith.mulf %997, %997 : vector<16x128xf32>
      %1008 = arith.addf %1006, %1007 : vector<16x128xf32>
      %cst_234 = arith.constant 9.99999996E-13 : f32
      %1009 = vector.broadcast %cst_234 : f32 to vector<16x128xf32>
      %1010 = arith.maximumf %1008, %1009 : vector<16x128xf32>
      %1011 = math.rsqrt %1010 : vector<16x128xf32>
      %1012 = arith.mulf %999, %999 : vector<16x128xf32>
      %1013 = arith.mulf %1001, %1001 : vector<16x128xf32>
      %1014 = arith.addf %1012, %1013 : vector<16x128xf32>
      %1015 = arith.mulf %1003, %1003 : vector<16x128xf32>
      %1016 = arith.addf %1014, %1015 : vector<16x128xf32>
      %cst_235 = arith.constant 9.99999996E-13 : f32
      %1017 = vector.broadcast %cst_235 : f32 to vector<16x128xf32>
      %1018 = arith.maximumf %1016, %1017 : vector<16x128xf32>
      %1019 = math.rsqrt %1018 : vector<16x128xf32>
      %1020 = arith.mulf %993, %1011 : vector<16x128xf32>
      %1021 = arith.mulf %995, %1011 : vector<16x128xf32>
      %1022 = arith.mulf %997, %1011 : vector<16x128xf32>
      %1023 = arith.mulf %999, %1019 : vector<16x128xf32>
      %1024 = arith.mulf %1001, %1019 : vector<16x128xf32>
      %1025 = arith.mulf %1003, %1019 : vector<16x128xf32>
      %c84 = arith.constant 84 : index
      %1026 = arith.index_cast %2 : i32 to index
      %c0_236 = arith.constant 0 : index
      %1027 = vector.load %arg1[%c84, %1026, %c0_236] : memref<108x32x128xbf16, #tpu.memory_space<vmem>>, vector<1x16x128xbf16>
      %1028 = vector.shape_cast %1027 : vector<1x16x128xbf16> to vector<16x128xbf16>
      %1029 = arith.extf %1028 : vector<16x128xbf16> to vector<16x128xf32>
      %1030 = arith.mulf %934, %1029 : vector<16x128xf32>
      %c93 = arith.constant 93 : index
      %1031 = arith.index_cast %2 : i32 to index
      %c0_237 = arith.constant 0 : index
      %1032 = vector.load %arg1[%c93, %1031, %c0_237] : memref<108x32x128xbf16, #tpu.memory_space<vmem>>, vector<1x16x128xbf16>
      %1033 = vector.shape_cast %1032 : vector<1x16x128xbf16> to vector<16x128xbf16>
      %1034 = arith.extf %1033 : vector<16x128xbf16> to vector<16x128xf32>
      %1035 = arith.mulf %937, %1034 : vector<16x128xf32>
      %1036 = arith.addf %1030, %1035 : vector<16x128xf32>
      %c102 = arith.constant 102 : index
      %1037 = arith.index_cast %2 : i32 to index
      %c0_238 = arith.constant 0 : index
      %1038 = vector.load %arg1[%c102, %1037, %c0_238] : memref<108x32x128xbf16, #tpu.memory_space<vmem>>, vector<1x16x128xbf16>
      %1039 = vector.shape_cast %1038 : vector<1x16x128xbf16> to vector<16x128xbf16>
      %1040 = arith.extf %1039 : vector<16x128xbf16> to vector<16x128xf32>
      %1041 = arith.mulf %940, %1040 : vector<16x128xf32>
      %1042 = arith.addf %1036, %1041 : vector<16x128xf32>
      %c85 = arith.constant 85 : index
      %1043 = arith.index_cast %2 : i32 to index
      %c0_239 = arith.constant 0 : index
      %1044 = vector.load %arg1[%c85, %1043, %c0_239] : memref<108x32x128xbf16, #tpu.memory_space<vmem>>, vector<1x16x128xbf16>
      %1045 = vector.shape_cast %1044 : vector<1x16x128xbf16> to vector<16x128xbf16>
      %1046 = arith.extf %1045 : vector<16x128xbf16> to vector<16x128xf32>
      %1047 = arith.mulf %934, %1046 : vector<16x128xf32>
      %c94 = arith.constant 94 : index
      %1048 = arith.index_cast %2 : i32 to index
      %c0_240 = arith.constant 0 : index
      %1049 = vector.load %arg1[%c94, %1048, %c0_240] : memref<108x32x128xbf16, #tpu.memory_space<vmem>>, vector<1x16x128xbf16>
      %1050 = vector.shape_cast %1049 : vector<1x16x128xbf16> to vector<16x128xbf16>
      %1051 = arith.extf %1050 : vector<16x128xbf16> to vector<16x128xf32>
      %1052 = arith.mulf %937, %1051 : vector<16x128xf32>
      %1053 = arith.addf %1047, %1052 : vector<16x128xf32>
      %c103 = arith.constant 103 : index
      %1054 = arith.index_cast %2 : i32 to index
      %c0_241 = arith.constant 0 : index
      %1055 = vector.load %arg1[%c103, %1054, %c0_241] : memref<108x32x128xbf16, #tpu.memory_space<vmem>>, vector<1x16x128xbf16>
      %1056 = vector.shape_cast %1055 : vector<1x16x128xbf16> to vector<16x128xbf16>
      %1057 = arith.extf %1056 : vector<16x128xbf16> to vector<16x128xf32>
      %1058 = arith.mulf %940, %1057 : vector<16x128xf32>
      %1059 = arith.addf %1053, %1058 : vector<16x128xf32>
      %c86 = arith.constant 86 : index
      %1060 = arith.index_cast %2 : i32 to index
      %c0_242 = arith.constant 0 : index
      %1061 = vector.load %arg1[%c86, %1060, %c0_242] : memref<108x32x128xbf16, #tpu.memory_space<vmem>>, vector<1x16x128xbf16>
      %1062 = vector.shape_cast %1061 : vector<1x16x128xbf16> to vector<16x128xbf16>
      %1063 = arith.extf %1062 : vector<16x128xbf16> to vector<16x128xf32>
      %1064 = arith.mulf %934, %1063 : vector<16x128xf32>
      %c95 = arith.constant 95 : index
      %1065 = arith.index_cast %2 : i32 to index
      %c0_243 = arith.constant 0 : index
      %1066 = vector.load %arg1[%c95, %1065, %c0_243] : memref<108x32x128xbf16, #tpu.memory_space<vmem>>, vector<1x16x128xbf16>
      %1067 = vector.shape_cast %1066 : vector<1x16x128xbf16> to vector<16x128xbf16>
      %1068 = arith.extf %1067 : vector<16x128xbf16> to vector<16x128xf32>
      %1069 = arith.mulf %937, %1068 : vector<16x128xf32>
      %1070 = arith.addf %1064, %1069 : vector<16x128xf32>
      %c104 = arith.constant 104 : index
      %1071 = arith.index_cast %2 : i32 to index
      %c0_244 = arith.constant 0 : index
      %1072 = vector.load %arg1[%c104, %1071, %c0_244] : memref<108x32x128xbf16, #tpu.memory_space<vmem>>, vector<1x16x128xbf16>
      %1073 = vector.shape_cast %1072 : vector<1x16x128xbf16> to vector<16x128xbf16>
      %1074 = arith.extf %1073 : vector<16x128xbf16> to vector<16x128xf32>
      %1075 = arith.mulf %940, %1074 : vector<16x128xf32>
      %1076 = arith.addf %1070, %1075 : vector<16x128xf32>
      %1077 = arith.mulf %1042, %1042 : vector<16x128xf32>
      %1078 = arith.mulf %1059, %1059 : vector<16x128xf32>
      %1079 = arith.addf %1077, %1078 : vector<16x128xf32>
      %1080 = arith.mulf %1076, %1076 : vector<16x128xf32>
      %1081 = arith.addf %1079, %1080 : vector<16x128xf32>
      %cst_245 = arith.constant 9.99999996E-13 : f32
      %1082 = vector.broadcast %cst_245 : f32 to vector<16x128xf32>
      %1083 = arith.maximumf %1081, %1082 : vector<16x128xf32>
      %1084 = math.rsqrt %1083 : vector<16x128xf32>
      %1085 = arith.mulf %1042, %1084 : vector<16x128xf32>
      %1086 = arith.mulf %1059, %1084 : vector<16x128xf32>
      %1087 = arith.mulf %1076, %1084 : vector<16x128xf32>
      %1088 = arith.mulf %1085, %1020 : vector<16x128xf32>
      %1089 = arith.mulf %1086, %1021 : vector<16x128xf32>
      %1090 = arith.addf %1088, %1089 : vector<16x128xf32>
      %1091 = arith.mulf %1087, %1022 : vector<16x128xf32>
      %1092 = arith.addf %1090, %1091 : vector<16x128xf32>
      %cst_246 = arith.constant 0.000000e+00 : f32
      %1093 = vector.broadcast %cst_246 : f32 to vector<16x128xf32>
      %1094 = arith.maximumf %1092, %1093 : vector<16x128xf32>
      %cst_247 = arith.constant 0.000000e+00 : f32
      %1095 = vector.broadcast %cst_247 : f32 to vector<16x128xf32>
      %1096 = arith.cmpf ogt, %1092, %1095 : vector<16x128xf32>
      %1097 = arith.extui %1096 : vector<16x128xi1> to vector<16x128xi32>
      %1098 = arith.sitofp %1097 : vector<16x128xi32> to vector<16x128xf32>
      %1099 = arith.mulf %1085, %1023 : vector<16x128xf32>
      %1100 = arith.mulf %1086, %1024 : vector<16x128xf32>
      %1101 = arith.addf %1099, %1100 : vector<16x128xf32>
      %1102 = arith.mulf %1087, %1025 : vector<16x128xf32>
      %1103 = arith.addf %1101, %1102 : vector<16x128xf32>
      %1104 = arith.mulf %1020, %1023 : vector<16x128xf32>
      %1105 = arith.mulf %1021, %1024 : vector<16x128xf32>
      %1106 = arith.addf %1104, %1105 : vector<16x128xf32>
      %1107 = arith.mulf %1022, %1025 : vector<16x128xf32>
      %1108 = arith.addf %1106, %1107 : vector<16x128xf32>
      %cst_248 = arith.constant 2.000000e+00 : f32
      %1109 = vector.broadcast %cst_248 : f32 to vector<16x128xf32>
      %1110 = arith.mulf %1109, %1092 : vector<16x128xf32>
      %1111 = arith.mulf %1110, %1103 : vector<16x128xf32>
      %1112 = arith.subf %1111, %1108 : vector<16x128xf32>
      %cst_249 = arith.constant 0.000000e+00 : f32
      %1113 = vector.broadcast %cst_249 : f32 to vector<16x128xf32>
      %1114 = arith.maximumf %1112, %1113 : vector<16x128xf32>
      %1115 = arith.mulf %1114, %1098 : vector<16x128xf32>
      %1116 = arith.mulf %1115, %1115 : vector<16x128xf32>
      %1117 = arith.mulf %1116, %1116 : vector<16x128xf32>
      %1118 = arith.mulf %1117, %1117 : vector<16x128xf32>
      %1119 = arith.mulf %1118, %1118 : vector<16x128xf32>
      %1120 = arith.mulf %1119, %1119 : vector<16x128xf32>
      %1121 = arith.mulf %1120, %1120 : vector<16x128xf32>
      %c87 = arith.constant 87 : index
      %1122 = arith.index_cast %2 : i32 to index
      %c0_250 = arith.constant 0 : index
      %1123 = vector.load %arg1[%c87, %1122, %c0_250] : memref<108x32x128xbf16, #tpu.memory_space<vmem>>, vector<1x16x128xbf16>
      %1124 = vector.shape_cast %1123 : vector<1x16x128xbf16> to vector<16x128xbf16>
      %1125 = arith.extf %1124 : vector<16x128xbf16> to vector<16x128xf32>
      %1126 = arith.mulf %934, %1125 : vector<16x128xf32>
      %c96 = arith.constant 96 : index
      %1127 = arith.index_cast %2 : i32 to index
      %c0_251 = arith.constant 0 : index
      %1128 = vector.load %arg1[%c96, %1127, %c0_251] : memref<108x32x128xbf16, #tpu.memory_space<vmem>>, vector<1x16x128xbf16>
      %1129 = vector.shape_cast %1128 : vector<1x16x128xbf16> to vector<16x128xbf16>
      %1130 = arith.extf %1129 : vector<16x128xbf16> to vector<16x128xf32>
      %1131 = arith.mulf %937, %1130 : vector<16x128xf32>
      %1132 = arith.addf %1126, %1131 : vector<16x128xf32>
      %c105 = arith.constant 105 : index
      %1133 = arith.index_cast %2 : i32 to index
      %c0_252 = arith.constant 0 : index
      %1134 = vector.load %arg1[%c105, %1133, %c0_252] : memref<108x32x128xbf16, #tpu.memory_space<vmem>>, vector<1x16x128xbf16>
      %1135 = vector.shape_cast %1134 : vector<1x16x128xbf16> to vector<16x128xbf16>
      %1136 = arith.extf %1135 : vector<16x128xbf16> to vector<16x128xf32>
      %1137 = arith.mulf %940, %1136 : vector<16x128xf32>
      %1138 = arith.addf %1132, %1137 : vector<16x128xf32>
      %c88 = arith.constant 88 : index
      %1139 = arith.index_cast %2 : i32 to index
      %c0_253 = arith.constant 0 : index
      %1140 = vector.load %arg1[%c88, %1139, %c0_253] : memref<108x32x128xbf16, #tpu.memory_space<vmem>>, vector<1x16x128xbf16>
      %1141 = vector.shape_cast %1140 : vector<1x16x128xbf16> to vector<16x128xbf16>
      %1142 = arith.extf %1141 : vector<16x128xbf16> to vector<16x128xf32>
      %1143 = arith.mulf %934, %1142 : vector<16x128xf32>
      %c97 = arith.constant 97 : index
      %1144 = arith.index_cast %2 : i32 to index
      %c0_254 = arith.constant 0 : index
      %1145 = vector.load %arg1[%c97, %1144, %c0_254] : memref<108x32x128xbf16, #tpu.memory_space<vmem>>, vector<1x16x128xbf16>
      %1146 = vector.shape_cast %1145 : vector<1x16x128xbf16> to vector<16x128xbf16>
      %1147 = arith.extf %1146 : vector<16x128xbf16> to vector<16x128xf32>
      %1148 = arith.mulf %937, %1147 : vector<16x128xf32>
      %1149 = arith.addf %1143, %1148 : vector<16x128xf32>
      %c106 = arith.constant 106 : index
      %1150 = arith.index_cast %2 : i32 to index
      %c0_255 = arith.constant 0 : index
      %1151 = vector.load %arg1[%c106, %1150, %c0_255] : memref<108x32x128xbf16, #tpu.memory_space<vmem>>, vector<1x16x128xbf16>
      %1152 = vector.shape_cast %1151 : vector<1x16x128xbf16> to vector<16x128xbf16>
      %1153 = arith.extf %1152 : vector<16x128xbf16> to vector<16x128xf32>
      %1154 = arith.mulf %940, %1153 : vector<16x128xf32>
      %1155 = arith.addf %1149, %1154 : vector<16x128xf32>
      %c89 = arith.constant 89 : index
      %1156 = arith.index_cast %2 : i32 to index
      %c0_256 = arith.constant 0 : index
      %1157 = vector.load %arg1[%c89, %1156, %c0_256] : memref<108x32x128xbf16, #tpu.memory_space<vmem>>, vector<1x16x128xbf16>
      %1158 = vector.shape_cast %1157 : vector<1x16x128xbf16> to vector<16x128xbf16>
      %1159 = arith.extf %1158 : vector<16x128xbf16> to vector<16x128xf32>
      %1160 = arith.mulf %934, %1159 : vector<16x128xf32>
      %c98 = arith.constant 98 : index
      %1161 = arith.index_cast %2 : i32 to index
      %c0_257 = arith.constant 0 : index
      %1162 = vector.load %arg1[%c98, %1161, %c0_257] : memref<108x32x128xbf16, #tpu.memory_space<vmem>>, vector<1x16x128xbf16>
      %1163 = vector.shape_cast %1162 : vector<1x16x128xbf16> to vector<16x128xbf16>
      %1164 = arith.extf %1163 : vector<16x128xbf16> to vector<16x128xf32>
      %1165 = arith.mulf %937, %1164 : vector<16x128xf32>
      %1166 = arith.addf %1160, %1165 : vector<16x128xf32>
      %c107 = arith.constant 107 : index
      %1167 = arith.index_cast %2 : i32 to index
      %c0_258 = arith.constant 0 : index
      %1168 = vector.load %arg1[%c107, %1167, %c0_258] : memref<108x32x128xbf16, #tpu.memory_space<vmem>>, vector<1x16x128xbf16>
      %1169 = vector.shape_cast %1168 : vector<1x16x128xbf16> to vector<16x128xbf16>
      %1170 = arith.extf %1169 : vector<16x128xbf16> to vector<16x128xf32>
      %1171 = arith.mulf %940, %1170 : vector<16x128xf32>
      %1172 = arith.addf %1166, %1171 : vector<16x128xf32>
      %cst_259 = arith.constant 3.000000e-01 : f32
      %1173 = vector.broadcast %cst_259 : f32 to vector<16x128xf32>
      %1174 = arith.mulf %1173, %1094 : vector<16x128xf32>
      %cst_260 = arith.constant 5.000000e-01 : f32
      %1175 = vector.broadcast %cst_260 : f32 to vector<16x128xf32>
      %1176 = arith.addf %1175, %1174 : vector<16x128xf32>
      %1177 = arith.mulf %1176, %1138 : vector<16x128xf32>
      %cst_261 = arith.constant 2.000000e-01 : f32
      %1178 = vector.broadcast %cst_261 : f32 to vector<16x128xf32>
      %1179 = arith.mulf %1178, %1121 : vector<16x128xf32>
      %1180 = arith.addf %1177, %1179 : vector<16x128xf32>
      %cst_262 = arith.constant 3.000000e-01 : f32
      %1181 = vector.broadcast %cst_262 : f32 to vector<16x128xf32>
      %1182 = arith.mulf %1181, %1094 : vector<16x128xf32>
      %cst_263 = arith.constant 5.000000e-01 : f32
      %1183 = vector.broadcast %cst_263 : f32 to vector<16x128xf32>
      %1184 = arith.addf %1183, %1182 : vector<16x128xf32>
      %1185 = arith.mulf %1184, %1155 : vector<16x128xf32>
      %cst_264 = arith.constant 2.000000e-01 : f32
      %1186 = vector.broadcast %cst_264 : f32 to vector<16x128xf32>
      %1187 = arith.mulf %1186, %1121 : vector<16x128xf32>
      %1188 = arith.addf %1185, %1187 : vector<16x128xf32>
      %cst_265 = arith.constant 3.000000e-01 : f32
      %1189 = vector.broadcast %cst_265 : f32 to vector<16x128xf32>
      %1190 = arith.mulf %1189, %1094 : vector<16x128xf32>
      %cst_266 = arith.constant 5.000000e-01 : f32
      %1191 = vector.broadcast %cst_266 : f32 to vector<16x128xf32>
      %1192 = arith.addf %1191, %1190 : vector<16x128xf32>
      %1193 = arith.mulf %1192, %1172 : vector<16x128xf32>
      %cst_267 = arith.constant 2.000000e-01 : f32
      %1194 = vector.broadcast %cst_267 : f32 to vector<16x128xf32>
      %1195 = arith.mulf %1194, %1121 : vector<16x128xf32>
      %1196 = arith.addf %1193, %1195 : vector<16x128xf32>
      %c7_268 = arith.constant 7 : index
      %1197 = arith.index_cast %2 : i32 to index
      %c0_269 = arith.constant 0 : index
      %1198 = vector.load %arg3[%c7_268, %1197, %c0_269] : memref<8x32x128xf32, #tpu.memory_space<vmem>>, vector<1x16x128xf32>
      %1199 = vector.shape_cast %1198 : vector<1x16x128xf32> to vector<16x128xf32>
      %cst_270 = arith.constant -1.000000e+04 : f32
      %1200 = vector.broadcast %cst_270 : f32 to vector<16x128xf32>
      %1201 = arith.mulf %1199, %1200 : vector<16x128xf32>
      %1202 = arith.negf %1201 : vector<16x128xf32>
      %1203 = math.exp %1202 : vector<16x128xf32>
      %cst_271 = arith.constant 1.000000e+00 : f32
      %1204 = vector.broadcast %cst_271 : f32 to vector<16x128xf32>
      %1205 = arith.addf %1204, %1203 : vector<16x128xf32>
      %1206 = arith.divf %1204, %1205 : vector<16x128xf32>
      %c3_272 = arith.constant 3 : index
      %1207 = arith.index_cast %2 : i32 to index
      %c0_273 = arith.constant 0 : index
      %1208 = vector.load %arg3[%c3_272, %1207, %c0_273] : memref<8x32x128xf32, #tpu.memory_space<vmem>>, vector<1x16x128xf32>
      %1209 = vector.shape_cast %1208 : vector<1x16x128xf32> to vector<16x128xf32>
      %cst_274 = arith.constant 1.000000e+02 : f32
      %1210 = vector.broadcast %cst_274 : f32 to vector<16x128xf32>
      %1211 = arith.subf %1210, %1209 : vector<16x128xf32>
      %cst_275 = arith.constant 0.0101010101 : f32
      %1212 = vector.broadcast %cst_275 : f32 to vector<16x128xf32>
      %1213 = arith.mulf %1211, %1212 : vector<16x128xf32>
      %1214 = arith.subf %1213, %35 : vector<16x128xf32>
      %cst_276 = arith.constant 1.000000e+04 : f32
      %1215 = vector.broadcast %cst_276 : f32 to vector<16x128xf32>
      %1216 = arith.mulf %1214, %1215 : vector<16x128xf32>
      %1217 = math.exp %1216 : vector<16x128xf32>
      %1218 = arith.mulf %1206, %1217 : vector<16x128xf32>
      %1219 = arith.addf %922, %1218 : vector<16x128xf32>
      %1220 = arith.mulf %1218, %1180 : vector<16x128xf32>
      %1221 = arith.addf %924, %1220 : vector<16x128xf32>
      %1222 = arith.mulf %1218, %1188 : vector<16x128xf32>
      %1223 = arith.addf %926, %1222 : vector<16x128xf32>
      %1224 = arith.mulf %1218, %1196 : vector<16x128xf32>
      %1225 = arith.addf %928, %1224 : vector<16x128xf32>
      %cst_277 = arith.constant 1.000000e+00 : f32
      %1226 = vector.broadcast %cst_277 : f32 to vector<16x128xf32>
      %1227 = arith.subf %1226, %1206 : vector<16x128xf32>
      %1228 = arith.mulf %931, %1227 : vector<16x128xf32>
      %cst_278 = arith.constant 1.000000e-10 : f32
      %1229 = vector.broadcast %cst_278 : f32 to vector<16x128xf32>
      %1230 = arith.subf %1229, %35 : vector<16x128xf32>
      %cst_279 = arith.constant 1.000000e+04 : f32
      %1231 = vector.broadcast %cst_279 : f32 to vector<16x128xf32>
      %1232 = arith.mulf %1230, %1231 : vector<16x128xf32>
      %1233 = math.exp %1232 : vector<16x128xf32>
      %cst_280 = arith.constant 1.000000e-10 : f32
      %1234 = vector.broadcast %cst_280 : f32 to vector<16x128xf32>
      %1235 = arith.maximumf %1233, %1234 : vector<16x128xf32>
      %1236 = arith.addf %1219, %1235 : vector<16x128xf32>
      %1237 = tpu.reciprocal %1236 : vector<16x128xf32> -> vector<16x128xf32>
      %cst_281 = arith.constant 1.000000e+00 : f32
      %1238 = vector.broadcast %cst_281 : f32 to vector<16x128xf32>
      %1239 = arith.mulf %1235, %1238 : vector<16x128xf32>
      %1240 = arith.addf %1221, %1239 : vector<16x128xf32>
      %1241 = arith.mulf %1240, %1237 : vector<16x128xf32>
      %c0_282 = arith.constant 0 : index
      %1242 = arith.index_cast %2 : i32 to index
      %c0_283 = arith.constant 0 : index
      %1243 = vector.load %arg4[%c0_282, %1242, %c0_283] : memref<4x32x128xf32, #tpu.memory_space<vmem>>, vector<1x16x128xf32>
      %1244 = vector.shape_cast %1243 : vector<1x16x128xf32> to vector<16x128xf32>
      %1245 = vector.shape_cast %1241 : vector<16x128xf32> to vector<1x16x128xf32>
      tpu.vector_store %arg4[%c0_282, %1242, %c0_283], %1245 {strides = array<i32>} : memref<4x32x128xf32, #tpu.memory_space<vmem>>, vector<1x16x128xf32>,
      %cst_284 = arith.constant 1.000000e+00 : f32
      %1246 = vector.broadcast %cst_284 : f32 to vector<16x128xf32>
      %1247 = arith.mulf %1235, %1246 : vector<16x128xf32>
      %1248 = arith.addf %1223, %1247 : vector<16x128xf32>
      %1249 = arith.mulf %1248, %1237 : vector<16x128xf32>
      %c1_285 = arith.constant 1 : index
      %1250 = arith.index_cast %2 : i32 to index
      %c0_286 = arith.constant 0 : index
      %1251 = vector.load %arg4[%c1_285, %1250, %c0_286] : memref<4x32x128xf32, #tpu.memory_space<vmem>>, vector<1x16x128xf32>
      %1252 = vector.shape_cast %1251 : vector<1x16x128xf32> to vector<16x128xf32>
      %1253 = vector.shape_cast %1249 : vector<16x128xf32> to vector<1x16x128xf32>
      tpu.vector_store %arg4[%c1_285, %1250, %c0_286], %1253 {strides = array<i32>} : memref<4x32x128xf32, #tpu.memory_space<vmem>>, vector<1x16x128xf32>,
      %cst_287 = arith.constant 1.000000e+00 : f32
      %1254 = vector.broadcast %cst_287 : f32 to vector<16x128xf32>
      %1255 = arith.mulf %1235, %1254 : vector<16x128xf32>
      %1256 = arith.addf %1225, %1255 : vector<16x128xf32>
      %1257 = arith.mulf %1256, %1237 : vector<16x128xf32>
      %c2_288 = arith.constant 2 : index
      %1258 = arith.index_cast %2 : i32 to index
      %c0_289 = arith.constant 0 : index
      %1259 = vector.load %arg4[%c2_288, %1258, %c0_289] : memref<4x32x128xf32, #tpu.memory_space<vmem>>, vector<1x16x128xf32>
      %1260 = vector.shape_cast %1259 : vector<1x16x128xf32> to vector<16x128xf32>
      %1261 = vector.shape_cast %1257 : vector<16x128xf32> to vector<1x16x128xf32>
      tpu.vector_store %arg4[%c2_288, %1258, %c0_289], %1261 {strides = array<i32>} : memref<4x32x128xf32, #tpu.memory_space<vmem>>, vector<1x16x128xf32>,
      %cst_290 = arith.constant 1.000000e+00 : f32
      %1262 = vector.broadcast %cst_290 : f32 to vector<16x128xf32>
      %1263 = arith.subf %1262, %1228 : vector<16x128xf32>
      %c3_291 = arith.constant 3 : index
      %1264 = arith.index_cast %2 : i32 to index
      %c0_292 = arith.constant 0 : index
      %1265 = vector.load %arg4[%c3_291, %1264, %c0_292] : memref<4x32x128xf32, #tpu.memory_space<vmem>>, vector<1x16x128xf32>
      %1266 = vector.shape_cast %1265 : vector<1x16x128xf32> to vector<16x128xf32>
      %1267 = vector.shape_cast %1263 : vector<16x128xf32> to vector<1x16x128xf32>
      tpu.vector_store %arg4[%c3_291, %1264, %c0_292], %1267 {strides = array<i32>} : memref<4x32x128xf32, #tpu.memory_space<vmem>>, vector<1x16x128xf32>,
    }
    %c2_i32_0 = arith.constant 2 : i32
    return
  }
  func.func @transform_0(%arg0: i32) -> (i32, i32, i32) {
    %c0_i32 = arith.constant 0 : i32
    %c0_i32_0 = arith.constant 0 : i32
    %c0_i32_1 = arith.constant 0 : i32
    return %c0_i32, %arg0, %c0_i32_0 : i32, i32, i32
  }
  func.func @transform_1(%arg0: i32) -> (i32, i32, i32) {
    %c0_i32 = arith.constant 0 : i32
    %c0_i32_0 = arith.constant 0 : i32
    %c0_i32_1 = arith.constant 0 : i32
    return %c0_i32, %arg0, %c0_i32_0 : i32, i32, i32
  }
  func.func @transform_2(%arg0: i32) -> (i32, i32, i32) {
    %c0_i32 = arith.constant 0 : i32
    %c0_i32_0 = arith.constant 0 : i32
    %c0_i32_1 = arith.constant 0 : i32
    return %c0_i32, %arg0, %c0_i32_0 : i32, i32, i32
  }
  func.func @transform_3(%arg0: i32) -> (i32, i32, i32) {
    %c0_i32 = arith.constant 0 : i32
    %c0_i32_0 = arith.constant 0 : i32
    %c0_i32_1 = arith.constant 0 : i32
    return %c0_i32, %arg0, %c0_i32_0 : i32, i32, i32
  }
}

</mosaic_0001>

<bundles_post_ra>
// kernel: tpu_custom_call.1
= control target key start
LH: loop header
LB: loop body
LE: loop exit
PB: predicated region body
PF: predicated region fallthrough
CT: control target
= control target key end

     0   :  { %8 = vsyncpa [#allocation3], 0  ;;  %s6763_s0 = inlined_call_operand.hbm [shape: bf16[108,64,128], index: 0, kind: input, shape index: {}]   ;;  %s6764_s1 = inlined_call_operand.hbm [shape: f32[8,64,128], index: 1, kind: input, shape index: {}]   ;;  %s6765_s2 = inlined_call_operand.hbm [shape: f32[8,64,128], index: 2, kind: input, shape index: {}]   ;;  %s6766_s3 = inlined_call_operand.hbm [shape: f32[4,64,128], index: 3, kind: output, shape index: {}]  }
   0x1   :  { %10 = vsyncpa [#allocation3 + $0x1], 0 }
   0x2   :  { %11 = vsyncpa [#allocation6], 0 }
   0x3   :  { %13 = vsyncpa [#allocation6 + $0x1], 0 }
   0x4   :  { %14 = vsyncpa [#allocation4], 0 }
   0x5   :  { %16 = vsyncpa [#allocation4 + $0x1], 0  ;;  %s4525_s12 = smov 0   ;;  %s4527_s13 = smov 0  }
   0x6   :  { %s4529_s14 = smov 0   ;;  %s4531_s15 = smov 0  }
   0x7 LB: > { %s4546_s16 = sadd.s32 4294967295, %s4474_s15   ;;  %s3246_s17 = sadd.s32 4294967294, %s4474_s15   ;;  %s4474_s15 = sphi %s4531_s15, %s7024_s15   ;;  %s4470_s14 = sphi %s4529_s14, %s7023_s14   ;;  %s4466_s13 = sphi %s4527_s13, %s7022_s13   ;;  %s4462_s12 = sphi %s4525_s12, %s7021_s12  }
   0x8   : > { %s4550_s18 = sadd.s32 1, %s4474_s15   ;;  %s29_s19 = sadd.s32 1, %s4470_s14 }
   0x9   : > { %s26_s20 = ssub.s32 %s4474_s15, %s4550_s18  ;;  %p36_p0 = scmp.ne.s32.totalorder %s4470_s14, %s4466_s13 }
   0xa   : > { %p27_p1 = scmp.eq.s32.totalorder %s26_s20, 0  ;;  %p37_p2 = scmp.eq.s32.totalorder %s4474_s15, 0 }
   0xb   : > { %p42_p3 = scmp.ne.s32.totalorder %s4466_s13, %s4462_s12  ;;  %p43_p4 = scmp.eq.s32.totalorder %s4546_s16, 0 }
   0xc   : > { %s4562_s21 = scalar_select %p27_p1, %s4470_s14, %s29_s19  }
   0xd   : > { %p4564_p5 = por %p37_p2, %p36_p0  ;;  %p4568_p6 = por %p43_p4, %p42_p3 }
   0xe   : > { %p118_p7 = scmp.eq.s32.totalorder %s4546_s16, 1  ;;  %p124_p8 = scmp.eq.s32.totalorder %s3246_s17, 1 }
   0xf   : > { %p3248_p11 = scmp.ge.s32.totalorder %s4474_s15, 2 }
  0x10   : > { %p4573_p9 = por %p118_p7, %p36_p0  ;;  %p4577_p10 = por %p124_p8, %p42_p3 }
  0x11   : > { %140 = sbr.rel (%p3248_p11) target bundleno = 62 (0x3e), region = 16 }
  0x16   : > { %s4585_s26 = sand.u32 1, %s4470_s14   ;;  %s3662_s27 = sshll.u32 %s4474_s15, 4 }
  0x17   : > { %s4205_s28 = smul.u32 1728, %s4585_s26  ;;  %s153_s4 = scalar_lea.hbm %s6763_s0, %s3662_s27 }
  0x18   : > { %s166_s5 = sshll.u32 %s153_s4, 4  ;;  %s4480_s10 = smov 512   ;;  %s167_s5 = int_to_ptr.hbm [resolvable:$true] %s166_s5 }
  0x19   : > { %s4207_s6 = scalar_select %p4564_p5, [#allocation0], [#allocation17] }
  0x1a   : > { %s148_s8 = scalar_lea.vmem [#allocation2], %s4205_s28  ;;  %4208 = sst [smem:[#allocation10]] (%p4564_p5), %s4480_s10 }
  0x1b   : > { %s158_s7 = sld [smem:[%s4207_s6]]   ;;  %s168_s9 = sshll.u32 %s148_s8, 4  ;;  %s169_s9 = int_to_ptr.vmem [resolvable:$true] %s168_s9 }
  0x1c   : > { %s4481_s11 = smov 256   ;;  %s4482_s17 = smov 4  }
  0x1d   : > { %4209 = sst [smem:[#allocation10 + $0x1]] (%p4564_p5), %s4481_s11  ;;  %s4483_s19 = smov 64  }
  0x1e   : > { %4210 = sst [smem:[#allocation10 + $0x2]] (%p4564_p5), %s4482_s17  ;;  %s145_s28 = scalar_lea.sflag [#allocation3], %s4585_s26 }
  0x1f   : > { %4211 = sst [smem:[#allocation10 + $0x3]] (%p4564_p5), %s4483_s19  ;;  %s4484_s29 = smov [#allocation9]  }
  0x20   : > { %4212 = sst [smem:[#allocation10 + $0x4]] (%p4564_p5), %s4483_s19 }
  0x21   : > { %s3251_s20 = sshll.u32 %s158_s7, 26  ;;  %4213 = sst [smem:[#allocation10 + $0x5]] (%p4564_p5), %s4482_s17 }
  0x22   : > { %s3252_s27 = sadd.s32 134217728, %s3251_s20 }
  0x23   : > { %4214 = dma.general (%p4564_p5), %s167_s5, 27648, %s169_s9, %s145_s28, %s4484_s29, [#allocation10], %s3252_s27, 0  }
  0x24   : > { %s191_s30 = sand.u32 1, %s4474_s15   ;;  %s6767_s4 = sshll.u32 %s4585_s26, 8 }
  0x25   : > { %s3663_s6 = sshll.u32 %s4474_s15, 5  ;;  %s195_s7 = scalar_lea.vmem [#allocation5], %s6767_s4 }
  0x26   : > { %s215_s8 = sshll.u32 %s195_s7, 4  ;;  %s200_s5 = scalar_lea.hbm %s6764_s1, %s3663_s6  ;;  %s216_s8 = int_to_ptr.vmem [resolvable:$true] %s215_s8 }
  0x27   : > { %s4215_s9 = scalar_select %p4564_p5, [#allocation0], [#allocation18] }
  0x28   : > { %s213_s17 = sshll.u32 %s200_s5, 4  ;;  %s4485_s20 = smov 1024   ;;  %s214_s17 = int_to_ptr.hbm [resolvable:$true] %s213_s17 }
  0x29   : > { %s205_s19 = sld [smem:[%s4215_s9]]   ;;  %s4486_s27 = smov 512  }
  0x2a   : > { %4216 = sst [smem:[#allocation12]] (%p4564_p5), %s4485_s20  ;;  %s4487_s28 = smov 4  }
  0x2b   : > { %4217 = sst [smem:[#allocation12 + $0x1]] (%p4564_p5), %s4486_s27  ;;  %s4488_s29 = smov 128  }
  0x2c   : > { %4218 = sst [smem:[#allocation12 + $0x2]] (%p4564_p5), %s4487_s28  ;;  %s4489_s10 = smov 8  }
  0x2d   : > { %4219 = sst [smem:[#allocation12 + $0x3]] (%p4564_p5), %s4488_s29  ;;  %s192_s5 = scalar_lea.sflag [#allocation6], %s191_s30 }
  0x2e   : > { %4220 = sst [smem:[#allocation12 + $0x4]] (%p4564_p5), %s4488_s29  ;;  %s4490_s9 = smov [#allocation11]  }
  0x2f   : > { %s3256_s7 = sshll.u32 %s205_s19, 26  ;;  %4221 = sst [smem:[#allocation12 + $0x5]] (%p4564_p5), %s4489_s10 }
  0x30   : > { %s3257_s11 = sadd.s32 134217728, %s3256_s7 }
  0x31   : > { %4222 = dma.general (%p4564_p5), %s214_s17, 4096, %s216_s8, %s192_s5, %s4490_s9, [#allocation12], %s3257_s11, 0  }
  0x32   : > { %s247_s27 = scalar_lea.hbm %s6765_s2, %s3663_s6  ;;  %s6833_s29 = sshll.u32 %s4585_s26, 8 }
  0x33   : > { %s4223_s19 = scalar_select %p4564_p5, [#allocation0], [#allocation19] }
  0x34   : > { %s260_s28 = sshll.u32 %s247_s27, 4  ;;  %s242_s7 = scalar_lea.vmem [#allocation7], %s6833_s29  ;;  %s261_s28 = int_to_ptr.hbm [resolvable:$true] %s260_s28 }
  0x35   : > { %s262_s30 = sshll.u32 %s242_s7, 4  ;;  %s252_s10 = sld [smem:[%s4223_s19]]   ;;  %s263_s30 = int_to_ptr.vmem [resolvable:$true] %s262_s30 }
  0x36   : > { %s4491_s4 = smov 1024   ;;  %s4492_s8 = smov 512  }
  0x37   : > { %4224 = sst [smem:[#allocation14]] (%p4564_p5), %s4491_s4  ;;  %s4493_s17 = smov 4  }
  0x38   : > { %4225 = sst [smem:[#allocation14 + $0x1]] (%p4564_p5), %s4492_s8  ;;  %s4494_s6 = smov 128  }
  0x39   : > { %4226 = sst [smem:[#allocation14 + $0x2]] (%p4564_p5), %s4493_s17  ;;  %s4495_s9 = smov 8  }
  0x3a   : > { %4227 = sst [smem:[#allocation14 + $0x3]] (%p4564_p5), %s4494_s6  ;;  %s4496_s20 = smov [#allocation13]  }
  0x3b   : > { %s3261_s26 = sshll.u32 %s252_s10, 26  ;;  %4228 = sst [smem:[#allocation14 + $0x4]] (%p4564_p5), %s4494_s6 }
  0x3c   : > { %s3262_s11 = sadd.s32 134217728, %s3261_s26  ;;  %4229 = sst [smem:[#allocation14 + $0x5]] (%p4564_p5), %s4495_s9 }
  0x3d   : > { %4230 = dma.general (%p4564_p5), %s261_s28, 4096, %s263_s30, %s192_s5, %s4496_s20, [#allocation14], %s3262_s11, 0  }
  0x3e PF: > { %p3263_p12 = scmp.ge.s32.totalorder %s4474_s15, 1  ;;  %p283_p13 = scmp.lt.s32.totalorder %s4474_s15, 3 }
  0x40   : > { %p284_p0 = pnand %p3263_p12, %p283_p13 }
  0x41   : > { %s4657_s27 = sand.u32 (!%p284_p0), 1, %s4466_s13  }
  0x42   : > { %287 = sbr.rel (%p284_p0) target bundleno = 523 (0x20b), region = 32  ;;  %s290_s29 = scalar_lea.sflag (!%p284_p0), [#allocation3], %s4657_s27 }
  0x43   : > { %s4206_s19 = smul.u32 (!%p284_p0), 1728, %s4657_s27 }
  0x45   : > { %s4661_s7 = scalar_lea.vmem (!%p284_p0), [#allocation2], %s4206_s19 }
  0x47   : > { %4449 = dma.done.wait (%p4568_p6), %s290_s29, 27648  }
  0x48   : > { %4451 = vsyncadd (%p4568_p6), %s290_s29, 4294939648  ;;  %s299_s22 = sand.u32 1, %s4546_s16   ;;  %s3264_s5 = sshll.u32 %s4657_s27, 8 }
  0x49   : > { %s300_s28 = scalar_lea.sflag [#allocation6], %s299_s22  ;;  %s4669_s30 = scalar_lea.vmem [#allocation5], %s3264_s5 }
  0x4a   : > { %4453 = dma.done.wait (%p4568_p6), %s300_s28, 8192  }
  0x4b   : > { %4455 = vsyncadd (%p4568_p6), %s300_s28, 4294959104  ;;  %s3266_s10 = sshll.u32 %s4657_s27, 7  ;;  %s4676_s4 = scalar_lea.vmem [#allocation7], %s3264_s5 }
  0x4c   : > { %s4678_s8 = scalar_lea.vmem [#allocation8], %s3266_s10  ;;  %s4680_s17 = smov 0  }
  0x4d LB: >> { %s4686_s6 = sshll.u32 %s4478_s17, 4  ;;  %s356_s17 = sadd.s32 1, %s4478_s17   ;;  %s4478_s17 = sphi %s4680_s17, %s356_s17  }
  0x4e   : >> { %s4690_s23 = scalar_lea.vmem %s4669_s30, %s4686_s6 [#allocation5]  ;;  %s407_s26 = sshra.s32 %s4686_s6, 3 }
  0x4f   : >> { %v4693_v0 = vld [vmem:[%s4690_s23] sm:$0xff]  ;;  %v4697_v1 = vld [vmem:[%s4690_s23 + $0x8] sm:$0xff]  ;;  %s3280_s11 = sshll.u32 %s407_s26, 2  ;;  %s4848_s20 = scalar_lea.vmem %s4676_s4, %s4686_s6 [#allocation7] }
  0x50   : >> { %v4700_v2 = vld [vmem:[%s4690_s23 + $0x20] sm:$0xff]  ;;  %v403_v3 = vsub.f32 1.0, %v4693_v0  ;;  %v4704_v4 = vld [vmem:[%s4690_s23 + $0x28] sm:$0xff]  ;;  %s4707_s9 = scalar_lea.vmem %s4661_s7, %s3280_s11 [#allocation2]  ;;  %v404_v5 = vsub.f32 1.0, %v4697_v1  ;;  %s6657_s19 = scalar_lea.vmem %s4678_s8, %s4686_s6 [#allocation8] }
  0x51   : >> { %v3667_v7 = vld [vmem:[%s4707_s9] sm:$0xff]   ;;  %v4098_v8 = vld [vmem:[%s4707_s9 + $0x90] sm:$0xff]   ;;  %p353_p1 = scmp.ge.s32.totalorder %s356_s17, 2  }
  0x52   : >> { %v4711_v6 = vsub.f32 %v403_v3, %v4700_v2  ;;  %v4099_v9 = vld [vmem:[%s4707_s9 + $0x120] sm:$0xff]   ;;  %v3668_v10 = vunpack.c.l.bf16 %v3667_v7  ;;  %v3669_v11 = vunpack.c.h.bf16 %v3667_v7  ;;  %v4717_v12 = vsub.f32 %v404_v5, %v4704_v4  ;;  %v4100_v16 = vld [vmem:[%s4707_s9 + $0x10] sm:$0xff]   ;;  %s2707_s29 = scalar_lea.sflag (%p353_p1), [#allocation4], %s4657_s27 }
  0x53   : >> { %v3672_v13 = vunpack.c.l.bf16 %v4098_v8  ;;  %v3673_v14 = vunpack.c.h.bf16 %v4098_v8  ;;  %v3676_v15 = vunpack.c.l.bf16 %v4099_v9  ;;  %v4101_v17 = vld [vmem:[%s4707_s9 + $0xa0] sm:$0xff]   ;;  %v4102_v20 = vld [vmem:[%s4707_s9 + $0x130] sm:$0xff]   ;;  %v3677_v23 = vunpack.c.h.bf16 %v4099_v9 }
  0x54   : >> { %v415_v18 = vmul.f32 %v3668_v10, %v4693_v0  ;;  %v416_v19 = vmul.f32 %v3669_v11, %v4697_v1  ;;  %v3680_v25 = vunpack.c.l.bf16 %v4100_v16  ;;  %v3681_v26 = vunpack.c.h.bf16 %v4100_v16  ;;  %v4103_v33 = vld [vmem:[%s4707_s9 + $0x20] sm:$0xff]   ;;  %v4104_v38 = vld [vmem:[%s4707_s9 + $0xb0] sm:$0xff]  }
  0x55   : >> { %v424_v21 = vmul.f32 %v3672_v13, %v4700_v2  ;;  %v425_v22 = vmul.f32 %v3673_v14, %v4704_v4  ;;  %v435_v24 = vmul.f32 %v3676_v15, %v4711_v6  ;;  %v3684_v27 = vunpack.c.l.bf16 %v4101_v17  ;;  %v4105_v39 = vld [vmem:[%s4707_s9 + $0x140] sm:$0xff]  }
  0x56   : >> { %v3685_v28 = vunpack.c.h.bf16 %v4101_v17  ;;  %v436_v31 = vmul.f32 %v3677_v23, %v4717_v12  ;;  %v3688_v32 = vunpack.c.l.bf16 %v4102_v20  ;;  %v446_v34 = vmul.f32 %v3680_v25, %v4693_v0 }
  0x57   : >> { %v426_v29 = vadd.f32 %v424_v21, %v415_v18  ;;  %v427_v30 = vadd.f32 %v425_v22, %v416_v19  ;;  %v447_v35 = vmul.f32 %v3681_v26, %v4697_v1  ;;  %v455_v36 = vmul.f32 %v3684_v27, %v4700_v2  ;;  %v4106_v26 = vld [vmem:[%s4707_s9 + $0x30] sm:$0xff]  }
  0x58   : >> { %v456_v37 = vmul.f32 %v3685_v28, %v4704_v4  ;;  %v3689_v42 = vunpack.c.h.bf16 %v4102_v20  ;;  %v466_v43 = vmul.f32 %v3688_v32, %v4711_v6  ;;  %v3692_v46 = vunpack.c.l.bf16 %v4103_v33 }
  0x59   : >> { %v437_v40 = vadd.f32 %v435_v24, %v426_v29  ;;  %v438_v41 = vadd.f32 %v436_v31, %v427_v30  ;;  %v457_v44 = vadd.f32 %v455_v36, %v446_v34  ;;  %v3693_v47 = vunpack.c.h.bf16 %v4103_v33  ;;  %v4107_v30 = vld [vmem:[%s4707_s9 + $0xc0] sm:$0xff]  }
  0x5a   : >> { %v458_v45 = vadd.f32 %v456_v37, %v447_v35  ;;  %v467_v48 = vmul.f32 %v3689_v42, %v4717_v12  ;;  %v3696_v49 = vunpack.c.l.bf16 %v4104_v38  ;;  %v3697_v50 = vunpack.c.h.bf16 %v4104_v38  ;;  %v4109_v33 = vld [vmem:[%s4707_s9 + $0x40] sm:$0xff]  }
  0x5b   : >> { %v3700_v51 = vunpack.c.l.bf16 %v4105_v39  ;;  %v468_v52 = vadd.f32 %v466_v43, %v457_v44  ;;  %v477_v53 = vmul.f32 %v3692_v46, %v4693_v0  ;;  %v478_v54 = vmul.f32 %v3693_v47, %v4697_v1  ;;  %v4110_v46 = vld [vmem:[%s4707_s9 + $0xd0] sm:$0xff]  }
  0x5c   : >> { %v3701_v55 = vunpack.c.h.bf16 %v4105_v39  ;;  %v469_v56 = vadd.f32 %v467_v48, %v458_v45  ;;  %v486_v57 = vmul.f32 %v3696_v49, %v4700_v2  ;;  %v487_v58 = vmul.f32 %v3697_v50, %v4704_v4  ;;  %v4111_v50 = vld [vmem:[%s4707_s9 + $0x160] sm:$0xff]  }
  0x5d   : >> { %v497_v59 = vmul.f32 %v3700_v51, %v4711_v6  ;;  %v4743_v61 = vsub.f32 0.0, %v437_v40  ;;  %v4745_v62 = vsub.f32 0.0, %v438_v41  ;;  %v4747_v63 = vsub.f32 1.0, %v468_v52  ;;  %v4108_v41 = vld [vmem:[%s4707_s9 + $0x150] sm:$0xff]  }
  0x5e   : >> { %v498_v60 = vmul.f32 %v3701_v55, %v4717_v12  ;;  %v488_v3 = vadd.f32 %v486_v57, %v477_v53  ;;  %v489_v5 = vadd.f32 %v487_v58, %v478_v54  ;;  %v4749_v7 = vsub.f32 1.0, %v469_v56  ;;  %v4112_v55 = vld [vmem:[%s4707_s9 + $0x50] sm:$0xff]  }
  0x5f   : >> { %v4751_v8 = vsub.f32 0.0, %v468_v52  ;;  %v4753_v9 = vsub.f32 0.0, %v469_v56  ;;  %v511_v10 = vmul.f32 %v4743_v61, %v4743_v61  ;;  %v512_v11 = vmul.f32 %v4745_v62, %v4745_v62 }
  0x60   : >> { %v513_v13 = vmul.f32 %v4747_v63, %v4747_v63  ;;  %v499_v14 = vadd.f32 %v497_v59, %v488_v3  ;;  %v500_v15 = vadd.f32 %v498_v60, %v489_v5  ;;  %v514_v16 = vmul.f32 %v4749_v7, %v4749_v7  ;;  %v4113_v59 = vld [vmem:[%s4707_s9 + $0xe0] sm:$0xff]  }
  0x61   : >> { %v543_v17 = vmul.f32 %v4751_v8, %v4751_v8  ;;  %v544_v19 = vmul.f32 %v4753_v9, %v4753_v9  ;;  %v3704_v36 = vunpack.c.l.bf16 %v4106_v26  ;;  %v3705_v37 = vunpack.c.h.bf16 %v4106_v26 }
  0x62   : >> { %v515_v18 = vadd.f32 %v513_v13, %v511_v10  ;;  %v4767_v20 = vsub.f32 0.0, %v499_v14  ;;  %v4769_v21 = vsub.f32 0.0, %v500_v15  ;;  %v4771_v22 = vsub.f32 3.0, %v499_v14 }
  0x63   : >> { %v4773_v23 = vsub.f32 3.0, %v500_v15  ;;  %v516_v24 = vadd.f32 %v514_v16, %v512_v11  ;;  %v545_v25 = vadd.f32 %v543_v17, %v511_v10  ;;  %v546_v31 = vadd.f32 %v544_v19, %v512_v11 }
  0x64   : >> { %v517_v27 = vmul.f32 %v4767_v20, %v4767_v20  ;;  %v518_v28 = vmul.f32 %v4769_v21, %v4769_v21  ;;  %v547_v29 = vmul.f32 %v4771_v22, %v4771_v22  ;;  %v3708_v39 = vunpack.c.l.bf16 %v4107_v30 }
  0x65   : >> { %v548_v32 = vmul.f32 %v4773_v23, %v4773_v23  ;;  %v3709_v40 = vunpack.c.h.bf16 %v4107_v30  ;;  %v3716_v43 = vunpack.c.l.bf16 %v4109_v33  ;;  %v592_v47 = vmul.f32 %v3704_v36, %v4693_v0 }
  0x66   : >> { %v519_v34 = vadd.f32 %v517_v27, %v515_v18  ;;  %v549_v35 = vadd.f32 %v547_v29, %v545_v25  ;;  %v520_v38 = vadd.f32 %v518_v28, %v516_v24  ;;  %v593_v48 = vmul.f32 %v3705_v37, %v4697_v1 }
  0x67   : >> { %v550_v44 = vadd.f32 %v548_v32, %v546_v31  ;;  %v3712_v49 = vunpack.c.l.bf16 %v4108_v41  ;;  %v601_v52 = vmul.f32 %v3708_v39, %v4700_v2  ;;  %v602_v53 = vmul.f32 %v3709_v40, %v4704_v4 }
  0x68   : >> { %v4787_v42 = vmax.f32 %v519_v34, 1e-12  ;;  %v4789_v45 = vmax.f32 %v549_v35, 1e-12  ;;  %v4795_v51 = vmax.f32 %v520_v38, 1e-12  ;;  %v3713_v54 = vunpack.c.h.bf16 %v4108_v41 }
  0x69   : >> { %v3717_v56 = vunpack.c.h.bf16 %v4109_v33  ;;  %v623_v57 = vmul.f32 %v3716_v43, %v4693_v0  ;;  %v3720_v58 = vunpack.c.l.bf16 %v4110_v46  ;;  %v4803_v60 = vmax.f32 %v550_v44, 1e-12  ;;  %v4114_v34 = vld [vmem:[%s4707_s9 + $0x170] sm:$0xff]  }
  0x6a   : >> { %4312 = vrsqrt.f32 %v4787_v42  ;;  %v3721_v3 = vunpack.c.h.bf16 %v4110_v46  ;;  %v3724_v5 = vunpack.c.l.bf16 %v4111_v50  ;;  %v3725_v13 = vunpack.c.h.bf16 %v4111_v50 }
  0x6b   : >> { %4314 = vrsqrt.f32 %v4789_v45  ;;  %v624_v10 = vmul.f32 %v3717_v56, %v4697_v1  ;;  %v632_v11 = vmul.f32 %v3720_v58, %v4700_v2  ;;  %v3728_v14 = vunpack.c.l.bf16 %v4112_v55  ;;  %v359_v58 = vld [vmem:[%s4848_s20] sm:$0xff] }
  0x6c   : >> { %v603_v15 = vadd.f32 %v601_v52, %v592_v47  ;;  %v612_v16 = vmul.f32 %v3712_v49, %v4711_v6  ;;  %v633_v17 = vmul.f32 %v3721_v3, %v4704_v4  ;;  %v3732_v18 = vunpack.c.l.bf16 %v4113_v59 }
  0x6d   : >> { %v634_v19 = vadd.f32 %v632_v11, %v623_v57  ;;  %v643_v24 = vmul.f32 %v3724_v5, %v4711_v6  ;;  %v3729_v25 = vunpack.c.h.bf16 %v4112_v55  ;;  %v3733_v26 = vunpack.c.h.bf16 %v4113_v59 }
  0x6e   : >> { %4316 = vrsqrt.f32 %v4795_v51  ;;  %v604_v27 = vadd.f32 %v602_v53, %v593_v48  ;;  %v654_v28 = vmul.f32 %v3728_v14, %v4693_v0  ;;  %v663_v29 = vmul.f32 %v3732_v18, %v4700_v2  ;;  %v360_v14 = vld [vmem:[%s4848_s20 + $0x8] sm:$0xff] }
  0x6f   : >> { %4318 = vrsqrt.f32 %v4803_v60  ;;  %v613_v31 = vmul.f32 %v3713_v54, %v4717_v12  ;;  %v635_v32 = vadd.f32 %v633_v17, %v624_v10  ;;  %v644_v33 = vmul.f32 %v3725_v13, %v4717_v12 }
  0x70   : >> { %v4814_v30 = vpop.eup %4312  ;;  %v4822_v36 = vadd.f32 %v612_v16, %v603_v15  ;;  %v4824_v37 = vadd.f32 %v643_v24, %v634_v19  ;;  %v655_v38 = vmul.f32 %v3729_v25, %v4697_v1  ;;  %v664_v39 = vmul.f32 %v3733_v26, %v4704_v4  ;;  %v3269_v19 = vld [vmem:[%s4848_s20 + $0x20] sm:$0xff]  ;;  %v3270_v24 = vld [vmem:[%s4848_s20 + $0x28] sm:$0xff] }
  0x71   : >> { %v4820_v35 = vpop.eup %4314  ;;  %v665_v40 = vadd.f32 %v663_v29, %v654_v28  ;;  %v3736_v41 = vunpack.c.l.bf16 %v4114_v34  ;;  %v4828_v43 = vadd.f32 %v613_v31, %v604_v27  ;;  %v4830_v44 = vadd.f32 %v644_v33, %v635_v32  ;;  %v3272_v28 = vld [vmem:[%s4848_s20 + $0x40] sm:$0xff] }
  0x72   : >> { %v3737_v46 = vunpack.c.h.bf16 %v4114_v34  ;;  %v524_v48 = vmul.f32 %v4814_v30, %v4787_v42  ;;  %v554_v49 = vmul.f32 %v4820_v35, %v4789_v45  ;;  %v666_v53 = vadd.f32 %v664_v39, %v655_v38 }
  0x73   : >> { %v674_v50 = vmul.f32 %v3736_v41, %v4711_v6  ;;  %v678_v55 = vmul.f32 %v4822_v36, %v4822_v36  ;;  %v680_v56 = vmul.f32 %v4824_v37, %v4824_v37  ;;  %v679_v3 = vmul.f32 %v4828_v43, %v4828_v43 }
  0x74   : >> { %v4832_v47 = vpop.eup %4316  ;;  %v675_v54 = vmul.f32 %v3737_v46, %v4717_v12  ;;  %v681_v5 = vmul.f32 %v4830_v44, %v4830_v44  ;;  %v525_v10 = vmul.f32 %v4814_v30, %v524_v48  ;;  %v555_v11 = vmul.f32 %v4820_v35, %v554_v49 }
  0x75   : >> { %v4839_v52 = vpop.eup %4318  ;;  %v4850_v57 = vadd.f32 %v674_v50, %v665_v40  ;;  %v534_v59 = vmul.f32 %v4832_v47, %v4795_v51  ;;  %v682_v16 = vadd.f32 %v680_v56, %v678_v55  ;;  %v361_v18 = vsub.f32 100.0, %v359_v58 }
  0x76   : >> { %v564_v13 = vmul.f32 %v4839_v52, %v4803_v60  ;;  %v4864_v15 = vadd.f32 %v675_v54, %v666_v53  ;;  %v683_v26 = vadd.f32 %v681_v5, %v679_v3  ;;  %v362_v27 = vsub.f32 100.0, %v360_v14  ;;  %v3273_v53 = vld [vmem:[%s4848_s20 + $0x48] sm:$0xff] }
  0x77   : >> { %v684_v17 = vmul.f32 %v4850_v57, %v4850_v57  ;;  %v535_v25 = vmul.f32 %v4832_v47, %v534_v59  ;;  %v526_v29 = vmul.f32 0.5, %v525_v10  ;;  %v556_v31 = vmul.f32 0.5, %v555_v11  ;;  %v3275_v10 = vld [vmem:[%s4848_s20 + $0x60] sm:$0xff] }
  0x78   : >> { %v565_v32 = vmul.f32 %v4839_v52, %v564_v13  ;;  %v685_v33 = vmul.f32 %v4864_v15, %v4864_v15  ;;  %v4875_v38 = vmul.f32 0.01010101, %v361_v18  ;;  %v371_v39 = vsub.f32 100.0, %v3269_v19 }
  0x79   : >> { %v686_v34 = vadd.f32 %v684_v17, %v682_v16  ;;  %v372_v40 = vsub.f32 100.0, %v3270_v24  ;;  %v381_v41 = vsub.f32 100.0, %v3272_v28  ;;  %v536_v46 = vmul.f32 0.5, %v535_v25  ;;  %v3276_v24 = vld [vmem:[%s4848_s20 + $0x68] sm:$0xff] }
  0x7a   : >> { %v687_v48 = vadd.f32 %v685_v33, %v683_v26  ;;  %v4879_v50 = vmul.f32 0.01010101, %v362_v27  ;;  %v527_v54 = vsub.f32 1.5, %v526_v29  ;;  %v557_v55 = vsub.f32 1.5, %v556_v31 }
  0x7b   : >> { %v4877_v49 = vmax.f32 %v686_v34, 1e-12  ;;  %v566_v56 = vmul.f32 0.5, %v565_v32  ;;  %vm529_vm0 = vweird.f32 %v4787_v42  ;;  %vm530_vm1 = vweird.f32 %v4814_v30 }
  0x7c   : >> { %v4884_v58 = vmax.f32 %v687_v48, 1e-12  ;;  %v365_v59 = vmax.f32 %v4875_v38, 1e-10  ;;  %v4888_v3 = vmul.f32 0.01010101, %v371_v39  ;;  %vm559_vm2 = vweird.f32 %v4789_v45  ;;  %vm531_vm4 = vmor %vm529_vm0, %vm530_vm1 }
  0x7d   : >> { %4320 = vrsqrt.f32 %v4877_v49  ;;  %vm560_vm3 = vweird.f32 %v4820_v35  ;;  %v382_v5 = vsub.f32 100.0, %v3273_v53  ;;  %v537_v11 = vsub.f32 1.5, %v536_v46 }
  0x7e   : >> { %6834 = vst [vmem:[#allocation23_spill] sm:$0xff] %v4888_v3  ;;  %4322 = vrsqrt.f32 %v4884_v58  ;;  %v4894_v42 = vmul.f32 0.01010101, %v372_v40  ;;  %v528_v13 = vmul.f32 %v4814_v30, %v527_v54  ;;  %v558_v14 = vmul.f32 %v4820_v35, %v557_v55  ;;  %vm561_vm7 = vmor %vm559_vm2, %vm560_vm3 }
  0x7f   : >> { %v567_v16 = vsub.f32 1.5, %v566_v56  ;;  %v366_v17 = vmax.f32 %v4879_v50, 1e-10  ;;  %v4899_v18 = vmul.f32 0.01010101, %v381_v41  ;;  %vm539_vm5 = vweird.f32 %v4795_v51 }
  0x80   : >> { %6835 = vst [vmem:[#allocation24_spill] sm:$0xff] %v4894_v42  ;;  %vm540_vm6 = vweird.f32 %v4832_v47  ;;  %v375_v19 = vmax.f32 %v365_v59, %v4888_v3  ;;  %v391_v25 = vsub.f32 100.0, %v3275_v10  ;;  %vm569_vm8 = vweird.f32 %v4803_v60 }
  0x81   : >> { %6836 = vst [vmem:[#allocation25_spill] sm:$0xff] %v4899_v18  ;;  %vm570_vm9 = vweird.f32 %v4839_v52  ;;  %v538_v27 = vmul.f32 %v4832_v47, %v537_v11  ;;  %v532_v28 = vsel %vm531_vm4, %v4814_v30, %v528_v13  ;;  %vm4911_vm10 = vmor %vm539_vm5, %vm540_vm6  ;;  %v562_v45 = vsel %vm561_vm7, %v4820_v35, %v558_v14  ;;  %v3362_v13 = vld [vmem:[%s4848_s20 + $0x80] sm:$0xff] }
  0x82   : >> { %v568_v29 = vmul.f32 %v4839_v52, %v567_v16  ;;  %v376_v60 = vmax.f32 %v366_v17, %v4894_v42  ;;  %v4919_v33 = vmul.f32 0.01010101, %v382_v5  ;;  %v392_v34 = vsub.f32 100.0, %v3276_v24  ;;  %vm571_vm11 = vmor %vm569_vm8, %vm570_vm9  ;;  %v4141_v42 = vld [vmem:[%s4707_s9 + $0x320] sm:$0xff]  }
  0x83   : >> { %v4321_v26 = vpop.eup %4320  ;;  %v385_v39 = vmax.f32 %v375_v19, %v4899_v18  ;;  %v4922_v30 = vmul.f32 0.01010101, %v391_v25  ;;  %v4926_v35 = vmul.f32 %v532_v28, %v4743_v61  ;;  %v4929_v46 = vmul.f32 %v532_v28, %v4747_v63  ;;  %v3363_v19 = vld [vmem:[%s4848_s20 + $0x88] sm:$0xff] }
  0x84   : >> { %v691_v31 = vmul.f32 %v4321_v26, %v4877_v49  ;;  %v4323_v32 = vpop.eup %4322  ;;  %6839 = vst [vmem:[#allocation26_spill] sm:$0xff] %v4919_v33  ;;  %v4932_v48 = vmul.f32 %v562_v45, %v4743_v61  ;;  %v4935_v53 = vmul.f32 %v562_v45, %v4751_v8  ;;  %v542_v54 = vsel %vm4911_vm10, %v4832_v47, %v538_v27 }
  0x85   : >> { %6840 = vst [vmem:[#allocation27_spill] sm:$0xff] %v4922_v30  ;;  %v701_v41 = vmul.f32 %v4323_v32, %v4884_v58  ;;  %v572_v55 = vsel %vm571_vm11, %v4839_v52, %v568_v29  ;;  %vm696_vm12 = vweird.f32 %v4877_v49  ;;  %vm697_vm13 = vweird.f32 %v4321_v26  ;;  %v4985_v29 = vld [vmem:[%s4690_s23 + $0x48] sm:$0xff] }
  0x86   : >> { %v692_v40 = vmul.f32 %v4321_v26, %v691_v31  ;;  %v744_v63 = vmul.f32 %v4932_v48, %v4926_v35  ;;  %v746_v61 = vmul.f32 %v4935_v53, %v4929_v46  ;;  %vm706_vm14 = vweird.f32 %v4884_v58  ;;  %vm4965_vm0 = vmor %vm696_vm12, %vm697_vm13 }
  0x87   : >> { %v702_v59 = vmul.f32 %v4323_v32, %v701_v41  ;;  %vm707_vm15 = vweird.f32 %v4323_v32  ;;  %v574_v47 = vmul.f32 %v542_v54, %v4745_v62  ;;  %v576_v52 = vmul.f32 %v542_v54, %v4749_v7 }
  0x88   : >> { %v693_v56 = vmul.f32 0.5, %v692_v40  ;;  %v4950_v10 = vmul.f32 %v572_v55, %v4745_v62  ;;  %v4953_v11 = vmul.f32 %v572_v55, %v4753_v9  ;;  %v4957_v14 = vmul.f32 %v532_v28, %v4767_v20  ;;  %vm708_vm1 = vmor %vm706_vm14, %vm707_vm15  ;;  %v4978_v28 = vld [vmem:[%s4690_s23 + $0x40] sm:$0xff] }
  0x89   : >> { %v703_v5 = vmul.f32 0.5, %v702_v59  ;;  %v4960_v16 = vmul.f32 %v562_v45, %v4771_v22  ;;  %v386_v9 = vmax.f32 %v376_v60, %v4919_v33  ;;  %v4970_v17 = vmul.f32 0.01010101, %v392_v34 }
  0x8a   : >> { %v694_v8 = vsub.f32 1.5, %v693_v56  ;;  %v745_v20 = vmul.f32 %v4950_v10, %v574_v47  ;;  %v747_v22 = vmul.f32 %v4953_v11, %v576_v52  ;;  %v748_v25 = vadd.f32 %v746_v61, %v744_v63  ;;  %v5002_v63 = vld [vmem:[%s4690_s23 + $0x60] sm:$0xff] }
  0x8b   : >> { %v704_v62 = vsub.f32 1.5, %v703_v5  ;;  %6843 = vst [vmem:[#allocation28_spill] sm:$0xff] %v4970_v17  ;;  %v750_v49 = vmul.f32 %v4960_v16, %v4957_v14  ;;  %v3364_v27 = vmul.f32 10000.0, %v3362_v13  ;;  %v578_v51 = vmul.f32 %v542_v54, %v4769_v21  ;;  %v4124_v54 = vld [vmem:[%s4707_s9 + $0x1b0] sm:$0xff]  }
  0x8c   : >> { %v695_v58 = vmul.f32 %v4321_v26, %v694_v8  ;;  %v4982_v45 = vmul.f32 %v572_v55, %v4773_v23  ;;  %v4988_v31 = vmax.f32 %v385_v39, %v4922_v30  ;;  %v3365_v40 = vmul.f32 10000.0, %v3363_v19  ;;  %v4125_v55 = vld [vmem:[%s4707_s9 + $0x240] sm:$0xff]  }
  0x8d   : >> { %v705_v24 = vmul.f32 %v4323_v32, %v704_v62  ;;  %v4993_v41 = vmax.f32 %v386_v9, %v4970_v17  ;;  %v749_v56 = vadd.f32 %v747_v22, %v745_v20  ;;  %v963_v23 = vsub.f32 1.0, %v4978_v28 }
  0x8e   : >> { %6844 = vst [vmem:[#allocation29_spill] sm:$0xff] %v4988_v31  ;;  %v699_v60 = vsel %vm4965_vm0, %v4321_v26, %v695_v58  ;;  %v751_v21 = vmul.f32 %v4982_v45, %v578_v51  ;;  %v4999_v59 = vadd.f32 %v750_v49, %v748_v25  ;;  %v895_v39 = vmul.f32 1.442695, %v3364_v27  ;;  %v5013_v58 = vld [vmem:[%s4690_s23 + $0x68] sm:$0xff]  ;;  %v5027_v25 = vld [vmem:[%s4707_s9 + $0x1c0] sm:$0xff]  }
  0x8f   : >> { %v709_v34 = vsel %vm708_vm1, %v4323_v32, %v705_v24  ;;  %6845 = vst [vmem:[#allocation30_spill] sm:$0xff] %v4993_v41  ;;  %v964_v26 = vsub.f32 1.0, %v4985_v29  ;;  %v5006_v32 = vld [vmem:[%s4707_s9 + $0x2d0] sm:$0xff]   ;;  %v710_v61 = vmul.f32 %v699_v60, %v4822_v36  ;;  %v712_v5 = vmul.f32 %v699_v60, %v4824_v37 }
  0x90   : >> { %v711_v8 = vmul.f32 %v709_v34, %v4828_v43  ;;  %v713_v13 = vmul.f32 %v709_v34, %v4830_v44  ;;  %v897_v7 = vmul.f32 1.442695, %v3365_v40  ;;  %v3776_v62 = vunpack.c.l.bf16 %v4124_v54 }
  0x91   : >> { %v3777_v9 = vunpack.c.h.bf16 %v4124_v54  ;;  %v3780_v20 = vunpack.c.l.bf16 %v4125_v55  ;;  %v5015_v22 = vadd.f32 %v751_v21, %v749_v56  ;;  %v5018_v19 = vsub.f32 %v963_v23, %v5002_v63 }
  0x92   : >> { %v3781_v36 = vunpack.c.h.bf16 %v4125_v55  ;;  %v3784_v43 = vunpack.c.l.bf16 %v5006_v32  ;;  %v714_v37 = vmul.f32 %v699_v60, %v4850_v57  ;;  %v715_v44 = vmul.f32 %v709_v34, %v4864_v15  ;;  %v4115_v60 = vld [vmem:[%s4707_s9 + $0x60] sm:$0xff]   ;;  %v4116_v34 = vld [vmem:[%s4707_s9 + $0xf0] sm:$0xff]  }
  0x93   : >> { %4324 = vpow2.f32 %v895_v39  ;;  %v5024_v24 = vsub.f32 %v964_v26, %v5013_v58  ;;  %v716_v49 = vmul.f32 %v710_v61, %v4926_v35  ;;  %v717_v27 = vmul.f32 %v711_v8, %v574_v47  ;;  %v4118_v26 = vld [vmem:[%s4707_s9 + $0x70] sm:$0xff]  }
  0x94   : >> { %v718_v40 = vmul.f32 %v712_v5, %v4929_v46  ;;  %v719_v56 = vmul.f32 %v713_v13, %v576_v52  ;;  %4326 = vpow2.f32 %v897_v7  ;;  %v974_v21 = vmul.f32 %v3776_v62, %v4978_v28  ;;  %v5047_v7 = vld [vmem:[%s4707_s9 + $0x250] sm:$0xff]  }
  0x95   : >> { %v975_v57 = vmul.f32 %v3777_v9, %v4985_v29  ;;  %v983_v15 = vmul.f32 %v3780_v20, %v5002_v63  ;;  %v984_v23 = vmul.f32 %v3781_v36, %v5013_v58  ;;  %v3785_v35 = vunpack.c.h.bf16 %v5006_v32  ;;  %v4119_v36 = vld [vmem:[%s4707_s9 + $0x100] sm:$0xff]  }
  0x96   : >> { %v5039_v47 = vmul.f32 %v3784_v43, %v5018_v19  ;;  %v3788_v46 = vunpack.c.l.bf16 %v5027_v25  ;;  %v722_v52 = vmul.f32 %v714_v37, %v4957_v14  ;;  %v723_v54 = vmul.f32 %v715_v44, %v578_v51 }
  0x97   : >> { %v734_v55 = vmul.f32 %v710_v61, %v4932_v48  ;;  %v736_v39 = vmul.f32 %v712_v5, %v4935_v53  ;;  %v720_v62 = vadd.f32 %v718_v40, %v716_v49  ;;  %v721_v9 = vadd.f32 %v719_v56, %v717_v27  ;;  %v4117_v53 = vld [vmem:[%s4707_s9 + $0x180] sm:$0xff]  }
  0x98   : >> { %v735_v32 = vmul.f32 %v711_v8, %v4950_v10  ;;  %v737_v20 = vmul.f32 %v713_v13, %v4953_v11  ;;  %v3740_v17 = vunpack.c.l.bf16 %v4115_v60  ;;  %v3741_v14 = vunpack.c.h.bf16 %v4115_v60 }
  0x99   : >> { %v5052_v43 = vpop.eup %4324  ;;  %v3744_v51 = vunpack.c.l.bf16 %v4116_v34  ;;  %v3789_v48 = vunpack.c.h.bf16 %v5027_v25  ;;  %v3745_v61 = vunpack.c.h.bf16 %v4116_v34  ;;  %v3752_v5 = vunpack.c.l.bf16 %v4118_v26  ;;  %v4120_v25 = vld [vmem:[%s4707_s9 + $0x190] sm:$0xff]  }
  0x9a   : >> { %v3753_v30 = vunpack.c.h.bf16 %v4118_v26  ;;  %v5057_v27 = vpop.eup %4326  ;;  %v738_v10 = vadd.f32 %v736_v39, %v734_v55  ;;  %v740_v11 = vmul.f32 %v714_v37, %v4960_v16  ;;  %v3756_v8 = vunpack.c.l.bf16 %v4119_v36 }
  0x9b   : >> { %v3757_v13 = vunpack.c.h.bf16 %v4119_v36  ;;  %v724_v40 = vadd.f32 %v722_v52, %v720_v62  ;;  %v5060_v56 = vadd.f32 %v723_v54, %v721_v9  ;;  %v739_v60 = vadd.f32 %v737_v20, %v735_v32 }
  0x9c   : >> { %v741_v33 = vmul.f32 %v715_v44, %v4982_v45  ;;  %v783_v34 = vmul.f32 %v3740_v17, %v4693_v0  ;;  %v784_v26 = vmul.f32 %v3741_v14, %v4697_v1  ;;  %v792_v49 = vmul.f32 %v3744_v51, %v4700_v2 }
  0x9d   : >> { %v3748_v18 = vunpack.c.l.bf16 %v4117_v53  ;;  %v793_v55 = vmul.f32 %v3745_v61, %v4704_v4  ;;  %v3749_v39 = vunpack.c.h.bf16 %v4117_v53  ;;  %v814_v16 = vmul.f32 %v3752_v5, %v4693_v0 }
  0x9e   : >> { %v815_v37 = vmul.f32 %v3753_v30, %v4697_v1  ;;  %v823_v52 = vmul.f32 %v3756_v8, %v4700_v2  ;;  %v824_v54 = vmul.f32 %v3757_v13, %v4704_v4  ;;  %v3760_v45 = vunpack.c.l.bf16 %v4120_v25  ;;  %v4121_v8 = vld [vmem:[%s4707_s9 + $0x80] sm:$0xff]  }
  0x9f   : >> { %v3761_v44 = vunpack.c.h.bf16 %v4120_v25  ;;  %v742_v62 = vadd.f32 %v740_v11, %v738_v10  ;;  %v743_v17 = vadd.f32 %v741_v33, %v739_v60  ;;  %v754_v9 = vmul.f32 2.0, %v724_v40 }
  0xa0   : >> { %v755_v32 = vmul.f32 2.0, %v5060_v56  ;;  %v794_v20 = vadd.f32 %v792_v49, %v783_v34  ;;  %v803_v36 = vmul.f32 %v3748_v18, %v4711_v6  ;;  %v985_v14 = vadd.f32 %v983_v15, %v974_v21 }
  0xa1   : >> { %v5075_v51 = vmul.f32 %v3785_v35, %v5024_v24  ;;  %v795_v30 = vadd.f32 %v793_v55, %v784_v26  ;;  %v804_v61 = vmul.f32 %v3749_v39, %v4717_v12  ;;  %v5078_v53 = vadd.f32 %v984_v23, %v975_v57  ;;  %v4122_v35 = vld [vmem:[%s4707_s9 + $0x110] sm:$0xff]   ;;  %v4123_v55 = vld [vmem:[%s4707_s9 + $0x1a0] sm:$0xff]  }
  0xa2   : >> { %v1005_v5 = vmul.f32 %v3788_v46, %v4978_v28  ;;  %v825_v10 = vadd.f32 %v823_v52, %v814_v16  ;;  %v826_v33 = vadd.f32 %v824_v54, %v815_v37  ;;  %v834_v11 = vmul.f32 %v3760_v45, %v4711_v6  ;;  %v4129_v52 = vld [vmem:[%s4707_s9 + $0x2e0] sm:$0xff]  }
  0xa3   : >> { %v835_v49 = vmul.f32 %v3761_v44, %v4717_v12  ;;  %v726_v18 = vmax.f32 %v724_v40, 0.0  ;;  %v756_v21 = vmul.f32 %v754_v9, %v742_v62  ;;  %v757_v15 = vmul.f32 %v755_v32, %v743_v17 }
  0xa4   : >> { %v1006_v13 = vmul.f32 %v3789_v48, %v4985_v29  ;;  %v727_v57 = vmax.f32 %v5060_v56, 0.0  ;;  %v805_v23 = vadd.f32 %v803_v36, %v794_v20  ;;  %v5088_v46 = vadd.f32 %v5039_v47, %v985_v14 }
  0xa5   : >> { %v3793_v60 = vunpack.c.h.bf16 %v5047_v7  ;;  %vm728_vm2 = vcmp.gt.f32.partialorder %v724_v40, 0.0  ;;  %v806_v25 = vadd.f32 %v804_v61, %v795_v30  ;;  %v3764_v34 = vunpack.c.l.bf16 %v4121_v8 }
  0xa6   : >> { %v3765_v26 = vunpack.c.h.bf16 %v4121_v8  ;;  %v5092_v39 = vadd.f32 %v834_v11, %v825_v10  ;;  %v5094_v16 = vadd.f32 %v835_v49, %v826_v33  ;;  %v3768_v37 = vunpack.c.l.bf16 %v4122_v35 }
  0xa7   : >> { %v3769_v48 = vunpack.c.h.bf16 %v4122_v35  ;;  %vm729_vm3 = vcmp.gt.f32.partialorder %v5060_v56, 0.0  ;;  %v758_v47 = vsub.f32 %v756_v21, %v4999_v59  ;;  %v759_v54 = vsub.f32 %v757_v15, %v5015_v22  ;;  %v4130_v59 = vld [vmem:[%s4707_s9 + $0x1d0] sm:$0xff]  }
  0xa8   : >> { %6846 = vst [vmem:[#allocation31_spill] sm:$0xff] %v5092_v39  ;;  %v869_v45 = vmul.f32 0.3, %v726_v18  ;;  %v6772_v40 = vmov 0.0   ;;  %v3772_v62 = vunpack.c.l.bf16 %v4123_v55  ;;  %v870_v17 = vmul.f32 0.3, %v727_v57 }
  0xa9   : >> { %6847 = vst [vmem:[#allocation32_spill] sm:$0xff] %v5094_v16  ;;  %v3332_v44 = vsel %vm728_vm2, 1.0, %v6772_v40  ;;  %v6848_v9 = vunpack.c.l.bf16 %v5047_v7  ;;  %v845_v20 = vmul.f32 %v3764_v34, %v4693_v0  ;;  %v846_v36 = vmul.f32 %v3765_v26, %v4697_v1  ;;  %v4131_v57 = vld [vmem:[%s4707_s9 + $0x260] sm:$0xff]  }
  0xaa   : >> { %v1015_v14 = vmul.f32 %v3793_v60, %v5013_v58  ;;  %v3796_v30 = vunpack.c.l.bf16 %v4129_v52  ;;  %v854_v22 = vmul.f32 %v3768_v37, %v4700_v2  ;;  %v855_v61 = vmul.f32 %v3769_v48, %v4704_v4  ;;  %v4132_v60 = vld [vmem:[%s4707_s9 + $0x2f0] sm:$0xff]  }
  0xab   : >> { %v1014_v32 = vmul.f32 %v6848_v9, %v5002_v63  ;;  %v3773_v10 = vunpack.c.h.bf16 %v4123_v55  ;;  %v3797_v33 = vunpack.c.h.bf16 %v4129_v52  ;;  %v3333_v7 = vsel %vm729_vm3, 1.0, %v6772_v40  ;;  %v4140_v40 = vld [vmem:[%s4707_s9 + $0x290] sm:$0xff]  }
  0xac   : >> { %v760_v11 = vmax.f32 %v758_v47, 0.0  ;;  %v761_v0 = vmax.f32 %v759_v54, 0.0  ;;  %v5113_v49 = vadd.f32 0.5, %v869_v45  ;;  %v865_v1 = vmul.f32 %v3772_v62, %v4711_v6 }
  0xad   : >> { %v5116_v8 = vadd.f32 0.5, %v870_v17  ;;  %v1016_v18 = vadd.f32 %v1014_v32, %v1005_v5  ;;  %v3800_v2 = vunpack.c.l.bf16 %v4130_v59  ;;  %v1017_v21 = vadd.f32 %v1015_v14, %v1006_v13 }
  0xae   : >> { %6849 = vst [vmem:[#allocation33_spill] sm:$0xff] %v5113_v49  ;;  %v1025_v4 = vmul.f32 %v3796_v30, %v5018_v19  ;;  %v1026_v15 = vmul.f32 %v3797_v33, %v5024_v24  ;;  %v3801_v35 = vunpack.c.h.bf16 %v4130_v59  ;;  %v856_v56 = vadd.f32 %v854_v22, %v845_v20 }
  0xaf   : >> { %6850 = vst [vmem:[#allocation34_spill] sm:$0xff] %v5116_v8  ;;  %v857_v34 = vadd.f32 %v855_v61, %v846_v36  ;;  %v866_v26 = vmul.f32 %v3773_v10, %v4717_v12  ;;  %v5124_v55 = vadd.f32 1.0, %v5052_v43  ;;  %v762_v6 = vmul.f32 %v3332_v44, %v760_v11 }
  0xb0   : >> { %v763_v37 = vmul.f32 %v3333_v7, %v761_v0  ;;  %v5127_v5 = vmul.f32 %v5113_v49, %v805_v23  ;;  %v997_v13 = vadd.f32 %v5075_v51, %v5078_v53  ;;  %v1036_v48 = vmul.f32 %v3800_v2, %v4978_v28 }
  0xb1   : >> { %v3804_v52 = vunpack.c.l.bf16 %v4131_v57  ;;  %v3805_v47 = vunpack.c.h.bf16 %v4131_v57  ;;  %v3808_v54 = vunpack.c.l.bf16 %v4132_v60  ;;  %v5133_v45 = vmul.f32 %v5116_v8, %v806_v25 }
  0xb2   : >> { %6851 = vst [vmem:[#allocation35_spill] sm:$0xff] %v5127_v5  ;;  %v1027_v12 = vadd.f32 %v1025_v4, %v1016_v18  ;;  %v1028_v62 = vadd.f32 %v1026_v15, %v1017_v21  ;;  %v1037_v43 = vmul.f32 %v3801_v35, %v4985_v29  ;;  %v867_v44 = vadd.f32 %v865_v1, %v856_v56 }
  0xb3   : >> { %6852 = vst [vmem:[#allocation36_spill] sm:$0xff] %v5133_v45  ;;  %v868_v17 = vadd.f32 %v866_v26, %v857_v34  ;;  %v1045_v23 = vmul.f32 %v3804_v52, %v5002_v63  ;;  %v1046_v9 = vmul.f32 %v3805_v47, %v5013_v58  ;;  %v3809_v32 = vunpack.c.h.bf16 %v4132_v60  ;;  %v4133_v47 = vld [vmem:[%s4707_s9 + $0x1e0] sm:$0xff]  }
  0xb4   : >> { %v1056_v51 = vmul.f32 %v3808_v54, %v5018_v19  ;;  %v5140_v53 = vsub.f32 0.0, %v5088_v46  ;;  %v5142_v20 = vsub.f32 0.0, %v997_v13  ;;  %v764_v25 = vmul.f32 %v762_v6, %v762_v6  ;;  %v4134_v54 = vld [vmem:[%s4707_s9 + $0x270] sm:$0xff]  }
  0xb5   : >> { %v765_v36 = vmul.f32 %v763_v37, %v763_v37  ;;  %v5145_v14 = vadd.f32 1.0, %v5057_v27  ;;  %v1047_v30 = vadd.f32 %v1045_v23, %v1036_v48  ;;  %v1048_v59 = vadd.f32 %v1046_v9, %v1037_v43 }
  0xb6   : >> { %v1057_v22 = vmul.f32 %v3809_v32, %v5024_v24  ;;  %v5148_v61 = vsub.f32 1.0, %v1027_v12  ;;  %v5150_v10 = vsub.f32 1.0, %v1028_v62  ;;  %v5152_v7 = vsub.f32 0.0, %v1027_v12 }
  0xb7   : >> { %v1058_v33 = vadd.f32 %v1056_v51, %v1047_v30  ;;  %v5154_v46 = vsub.f32 0.0, %v1028_v62  ;;  %v1070_v11 = vmul.f32 %v5140_v53, %v5140_v53  ;;  %v1071_v27 = vmul.f32 %v5142_v20, %v5142_v20 }
  0xb8   : >> { %v1059_v0 = vadd.f32 %v1057_v22, %v1048_v59  ;;  %v1072_v1 = vmul.f32 %v5148_v61, %v5148_v61  ;;  %v1073_v18 = vmul.f32 %v5150_v10, %v5150_v10  ;;  %v1102_v4 = vmul.f32 %v5152_v7, %v5152_v7 }
  0xb9   : >> { %v5164_v2 = vsub.f32 0.0, %v1058_v33  ;;  %v5166_v21 = vsub.f32 3.0, %v1058_v33  ;;  %v1103_v15 = vmul.f32 %v5154_v46, %v5154_v46  ;;  %v766_v13 = vmul.f32 %v764_v25, %v764_v25 }
  0xba   : >> { %v5172_v35 = vsub.f32 0.0, %v1059_v0  ;;  %v5174_v57 = vsub.f32 3.0, %v1059_v0  ;;  %v1074_v60 = vadd.f32 %v1072_v1, %v1070_v11  ;;  %v1075_v56 = vadd.f32 %v1073_v18, %v1071_v27  ;;  %v4136_v1 = vld [vmem:[%s4707_s9 + $0x1f0] sm:$0xff]   ;;  %v4137_v18 = vld [vmem:[%s4707_s9 + $0x280] sm:$0xff]  }
  0xbb   : >> { %v1076_v34 = vmul.f32 %v5164_v2, %v5164_v2  ;;  %v1104_v26 = vadd.f32 %v1102_v4, %v1070_v11  ;;  %v1105_v6 = vadd.f32 %v1103_v15, %v1071_v27  ;;  %v1106_v37 = vmul.f32 %v5166_v21, %v5166_v21 }
  0xbc   : >> { %4328 = vrcp.f32 %v5124_v55  ;;  %v1077_v48 = vmul.f32 %v5172_v35, %v5172_v35  ;;  %v1107_v52 = vmul.f32 %v5174_v57, %v5174_v57  ;;  %v5188_v12 = vmul.f32 %v5113_v49, %v867_v44 }
  0xbd   : >> { %v5191_v62 = vmul.f32 %v5116_v8, %v868_v17  ;;  %v1078_v43 = vadd.f32 %v1076_v34, %v1074_v60  ;;  %v1108_v23 = vadd.f32 %v1106_v37, %v1104_v26  ;;  %v767_v9 = vmul.f32 %v765_v36, %v765_v36 }
  0xbe   : >> { %v1079_v51 = vadd.f32 %v1077_v48, %v1075_v56  ;;  %v1109_v25 = vadd.f32 %v1107_v52, %v1105_v6  ;;  %v3812_v22 = vunpack.c.l.bf16 %v4133_v47  ;;  %v3816_v33 = vunpack.c.l.bf16 %v4134_v54  ;;  %v4135_v6 = vld [vmem:[%s4707_s9 + $0x300] sm:$0xff]  }
  0xbf   : >> { %6853 = vst [vmem:[#allocation37_spill] sm:$0xff] %v5191_v62  ;;  %v5194_v30 = vmax.f32 %v1078_v43, 1e-12  ;;  %v5196_v59 = vmax.f32 %v1108_v23, 1e-12  ;;  %v768_v44 = vmul.f32 %v766_v13, %v766_v13  ;;  %4330 = vrcp.f32 %v5145_v14  ;;  %v4139_v52 = vld [vmem:[%s4707_s9 + $0x200] sm:$0xff]  }
  0xc0   : >> { %v5199_v17 = vmax.f32 %v1079_v51, 1e-12  ;;  %v5201_v11 = vmax.f32 %v1109_v25, 1e-12  ;;  %v931_v36 = vsub.f32 %v4875_v38, %v4988_v31  ;;  %v3813_v0 = vunpack.c.h.bf16 %v4133_v47  ;;  %v4138_v23 = vld [vmem:[%s4707_s9 + $0x310] sm:$0xff]  }
  0xc1   : >> { %4332 = vrsqrt.f32 %v5194_v30  ;;  %v3817_v27 = vunpack.c.h.bf16 %v4134_v54  ;;  %v932_v56 = vsub.f32 %v4879_v50, %v4993_v41  ;;  %v769_v38 = vmul.f32 %v767_v9, %v767_v9 }
  0xc2   : >> { %v5208_v4 = vpop.eup %4328  ;;  %4334 = vrsqrt.f32 %v5199_v17  ;;  %v1151_v34 = vmul.f32 %v3812_v22, %v4978_v28  ;;  %v1160_v26 = vmul.f32 %v3816_v33, %v5002_v63  ;;  %v3824_v13 = vunpack.c.l.bf16 %v4136_v1 }
  0xc3   : >> { %4336 = vrsqrt.f32 %v5196_v59  ;;  %v3828_v48 = vunpack.c.l.bf16 %v4137_v18  ;;  %v770_v50 = vmul.f32 %v768_v44, %v768_v44  ;;  %v933_v47 = vmul.f32 10000.0, %v931_v36 }
  0xc4   : >> { %4338 = vrsqrt.f32 %v5201_v11  ;;  %v1152_v54 = vmul.f32 %v3813_v0, %v4985_v29  ;;  %v1161_v43 = vmul.f32 %v3817_v27, %v5013_v58  ;;  %v5227_v51 = vmul.f32 10000.0, %v932_v56 }
  0xc5   : >> { %v5225_v9 = vpop.eup %4330  ;;  %v3820_v25 = vunpack.c.l.bf16 %v4135_v6  ;;  %v3821_v22 = vunpack.c.h.bf16 %v4135_v6  ;;  %v3825_v33 = vunpack.c.h.bf16 %v4136_v1  ;;  %v5232_v60 = vmul.f32 %v769_v38, %v769_v38 }
  0xc6   : >> { %v1162_v15 = vadd.f32 %v1160_v26, %v1151_v34  ;;  %v3829_v44 = vunpack.c.h.bf16 %v4137_v18  ;;  %v3836_v36 = vunpack.c.l.bf16 %v4139_v52  ;;  %v1182_v27 = vmul.f32 %v3824_v13, %v4978_v28 }
  0xc7   : >> { %v5230_v37 = vpop.eup %4332  ;;  %v1191_v32 = vmul.f32 %v3828_v48, %v5002_v63  ;;  %v3832_v56 = vunpack.c.l.bf16 %v4138_v23  ;;  %v3837_v45 = vunpack.c.h.bf16 %v4139_v52  ;;  %v1163_v34 = vadd.f32 %v1161_v43, %v1152_v54 }
  0xc8   : >> { %v5234_v0 = vpop.eup %4334  ;;  %v1083_v1 = vmul.f32 %v5230_v37, %v5194_v30  ;;  %v3840_v18 = vunpack.c.l.bf16 %v4140_v40  ;;  %v1171_v13 = vmul.f32 %v3820_v25, %v5018_v19  ;;  %v1172_v48 = vmul.f32 %v3821_v22, %v5024_v24 }
  0xc9   : >> { %v5238_v5 = vpop.eup %4336  ;;  %v1093_v38 = vmul.f32 %v5234_v0, %v5199_v17  ;;  %v1183_v52 = vmul.f32 %v3825_v33, %v4985_v29  ;;  %v1192_v3 = vmul.f32 %v3829_v44, %v5013_v58  ;;  %v3833_v31 = vunpack.c.h.bf16 %v4138_v23 }
  0xca   : >> { %v5244_v26 = vpop.eup %4338  ;;  %v1113_v6 = vmul.f32 %v5238_v5, %v5196_v59  ;;  %v1213_v54 = vmul.f32 %v3836_v36, %v4978_v28  ;;  %v1193_v43 = vadd.f32 %v1191_v32, %v1182_v27  ;;  %v1202_v62 = vmul.f32 %v3832_v56, %v5018_v19 }
  0xcb   : >> { %v1123_v41 = vmul.f32 %v5244_v26, %v5201_v11  ;;  %v1214_v8 = vmul.f32 %v3837_v45, %v4985_v29  ;;  %v3841_v16 = vunpack.c.h.bf16 %v4140_v40  ;;  %v1084_v25 = vmul.f32 %v5230_v37, %v1083_v1 }
  0xcc   : >> { %v1094_v22 = vmul.f32 %v5234_v0, %v1093_v38  ;;  %v1222_v33 = vmul.f32 %v3840_v18, %v5002_v63  ;;  %v3844_v49 = vunpack.c.l.bf16 %v4141_v42  ;;  %v1114_v39 = vmul.f32 %v5238_v5, %v1113_v6 }
  0xcd   : >> { %v1124_v44 = vmul.f32 %v5244_v26, %v1123_v41  ;;  %v1223_v23 = vmul.f32 %v3841_v16, %v5013_v58  ;;  %v3845_v28 = vunpack.c.h.bf16 %v4141_v42  ;;  %v1194_v32 = vadd.f32 %v1192_v3, %v1183_v52 }
  0xce   : >> { %v1203_v36 = vmul.f32 %v3833_v31, %v5024_v24  ;;  %v1224_v27 = vadd.f32 %v1222_v33, %v1213_v54  ;;  %v1233_v29 = vmul.f32 %v3844_v49, %v5018_v19  ;;  %v902_v40 = vmul.f32 %v5208_v4, %v5124_v55 }
  0xcf   : >> { %v917_v45 = vmul.f32 %v5225_v9, %v5145_v14  ;;  %v1225_v56 = vadd.f32 %v1223_v23, %v1214_v8  ;;  %v1234_v1 = vmul.f32 %v3845_v28, %v5024_v24  ;;  %v772_v38 = vmul.f32 %v770_v50, %v770_v50 }
  0xd0   : >> { %v1085_v41 = vmul.f32 0.5, %v1084_v25  ;;  %v5271_v18 = vadd.f32 %v1171_v13, %v1162_v15  ;;  %v5273_v42 = vadd.f32 %v1172_v48, %v1163_v34  ;;  %vm906_vm4 = vweird.f32 %v5124_v55 }
  0xd1   : >> { %v935_v3 = vmul.f32 1.442695, %v933_v47  ;;  %v1095_v31 = vmul.f32 0.5, %v1094_v22  ;;  %v1115_v58 = vmul.f32 0.5, %v1114_v39  ;;  %v1125_v16 = vmul.f32 0.5, %v1124_v44 }
  0xd2   : >> { %v5276_v49 = vadd.f32 %v1202_v62, %v1193_v43  ;;  %v5278_v6 = vadd.f32 %v1203_v36, %v1194_v32  ;;  %v5280_v52 = vadd.f32 %v1233_v29, %v1224_v27  ;;  %v5282_v8 = vadd.f32 %v1234_v1, %v1225_v56  ;;  %v3457_v32 = vld [vmem:[%s4848_s20 + $0xa8] sm:$0xff] }
  0xd3   : >> { %v903_v50 = vsub.f32 1.0, %v902_v40  ;;  %v918_v54 = vsub.f32 1.0, %v917_v45  ;;  %vm1088_vm5 = vweird.f32 %v5194_v30  ;;  %vm1098_vm6 = vweird.f32 %v5199_v17 }
  0xd4   : >> { %vm921_vm7 = vweird.f32 %v5145_v14  ;;  %v1086_v15 = vsub.f32 1.5, %v1085_v41  ;;  %vm1089_vm8 = vweird.f32 %v5230_v37  ;;  %v1237_v39 = vmul.f32 %v5271_v18, %v5271_v18 }
  0xd5   : >> { %v1238_v62 = vmul.f32 %v5273_v42, %v5273_v42  ;;  %v1096_v47 = vsub.f32 1.5, %v1095_v31  ;;  %vm1099_vm9 = vweird.f32 %v5234_v0  ;;  %v1116_v34 = vsub.f32 1.5, %v1115_v58  ;;  %vm5316_vm14 = vmor %vm1088_vm5, %vm1089_vm8 }
  0xd6   : >> { %v1126_v13 = vsub.f32 1.5, %v1125_v16  ;;  %v1239_v48 = vmul.f32 %v5276_v49, %v5276_v49  ;;  %v1240_v43 = vmul.f32 %v5278_v6, %v5278_v6  ;;  %v1243_v25 = vmul.f32 %v5280_v52, %v5280_v52  ;;  %vm5330_vm1 = vmor %vm1098_vm6, %vm1099_vm9 }
  0xd7   : >> { %v1244_v22 = vmul.f32 %v5282_v8, %v5282_v8  ;;  %v904_v33 = vmul.f32 %v5208_v4, %v903_v50  ;;  %v6854_v44 = vand.u32 2147483647, %v5124_v55  ;;  %vm1118_vm11 = vweird.f32 %v5196_v59 }
  0xd8   : >> { %vm1119_vm12 = vweird.f32 %v5238_v5  ;;  %vm1128_vm13 = vweird.f32 %v5201_v11  ;;  %v1087_v28 = vmul.f32 %v5230_v37, %v1086_v15  ;;  %vm1129_vm15 = vweird.f32 %v5244_v26 }
  0xd9   : >> { %vm5304_vm10 = vcmp.eq.f32.partialorder %v6854_v44, 8.507059e+37  ;;  %v1241_v36 = vadd.f32 %v1239_v48, %v1237_v39  ;;  %v1242_v27 = vadd.f32 %v1240_v43, %v1238_v62  ;;  %v773_v59 = vmul.f32 %v5232_v60, %v5232_v60  ;;  %vm5335_vm2 = vmor %vm1118_vm11, %vm1119_vm12 }
  0xda   : >> { %vm907_vm0 = vweird.f32 %v5208_v4  ;;  %v919_v29 = vmul.f32 %v5225_v9, %v918_v54  ;;  %v1097_v40 = vmul.f32 %v5234_v0, %v1096_v47  ;;  %v1117_v45 = vmul.f32 %v5238_v5, %v1116_v34  ;;  %vm1130_vm5 = vmor %vm1128_vm13, %vm1129_vm15  ;;  %v3456_v47 = vld [vmem:[%s4848_s20 + $0xa0] sm:$0xff] }
  0xdb   : >> { %v1127_v60 = vmul.f32 %v5244_v26, %v1126_v13  ;;  %v1245_v1 = vadd.f32 %v1243_v25, %v1241_v36  ;;  %v1246_v41 = vadd.f32 %v1244_v22, %v1242_v27  ;;  %v774_v31 = vmul.f32 %v772_v38, %v772_v38  ;;  %vm5350_vm6 = vmor %vm906_vm4, %vm907_vm0 }
  0xdc   : >> { %v905_v58 = vadd.f32 %v5208_v4, %v904_v33  ;;  %v6863_v17 = vand.u32 2147483648, %v5124_v55  ;;  %vm922_vm3 = vweird.f32 %v5225_v9  ;;  %4340 = vpow2.f32 %v935_v3 }
  0xdd   : >> { %v1091_v38 = vsel %vm5316_vm14, %v5230_v37, %v1087_v28  ;;  %v5357_v54 = vmax.f32 %v1245_v1, 1e-12  ;;  %v5359_v15 = vmax.f32 %v1246_v41, 1e-12  ;;  %v775_v39 = vmul.f32 %v773_v59, %v773_v59  ;;  %vm5387_vm4 = vmor %vm921_vm7, %vm922_vm3 }
  0xde   : >> { %v913_v16 = vor.u32 1.1754944e-38, %v6863_v17  ;;  %v6866_v62 = vand.u32 2147483647, %v5145_v14  ;;  %v937_v55 = vmul.f32 1.442695, %v5227_v51  ;;  %v1101_v3 = vsel %vm5330_vm1, %v5234_v0, %v1097_v40  ;;  %v5460_v17 = vld [vmem:[%s4690_s23 + $0x80] sm:$0xff] }
  0xdf   : >> { %v920_v37 = vadd.f32 %v5225_v9, %v919_v29  ;;  %v1121_v34 = vsel %vm5335_vm2, %v5238_v5, %v1117_v45  ;;  %v1131_v13 = vsel %vm1130_vm5, %v5244_v26, %v1127_v60  ;;  %4342 = vrsqrt.f32 %v5357_v54  ;;  %v6874_v0 = vld [vmem:[#allocation32_spill] sm:$0xff] }
  0xe0   : >> { %vm5363_vm8 = vcmp.eq.f32.partialorder %v6866_v62, 8.507059e+37  ;;  %v5378_v48 = vmul.f32 0.2, %v774_v31  ;;  %v909_v51 = vsel %vm5350_vm6, %v5208_v4, %v905_v58  ;;  %v5392_v5 = vmul.f32 %v1091_v38, %v5140_v53 }
  0xe1   : >> { %4344 = vrsqrt.f32 %v5359_v15  ;;  %v5396_v26 = vmul.f32 %v1101_v3, %v5142_v20  ;;  %v5399_v43 = vmul.f32 %v1091_v38, %v5148_v61  ;;  %v5402_v4 = vmul.f32 %v1101_v3, %v5150_v10 }
  0xe2   : >> { %v3458_v25 = vmul.f32 10000.0, %v3456_v47  ;;  %v5405_v22 = vmul.f32 %v1121_v34, %v5140_v53  ;;  %v5408_v33 = vmul.f32 %v1131_v13, %v5142_v20  ;;  %v5411_v44 = vmul.f32 %v1121_v34, %v5152_v7  ;;  %v4341_v36 = vpop.eup %4340 }
  0xe3   : >> { %v5414_v28 = vmul.f32 %v1131_v13, %v5154_v46  ;;  %v5419_v61 = vsel %vm5304_vm10, %v913_v16, %v909_v51  ;;  %v924_v53 = vsel %vm5387_vm4, %v5225_v9, %v920_v37  ;;  %v6871_v10 = vand.u32 2147483648, %v5145_v14  ;;  %v4151_v37 = vld [vmem:[%s4707_s9 + $0x360] sm:$0xff]  }
  0xe4   : >> { %4346 = vpow2.f32 %v937_v55  ;;  %v1303_v7 = vmul.f32 %v5405_v22, %v5392_v5  ;;  %v1304_v46 = vmul.f32 %v5408_v33, %v5396_v26  ;;  %v1305_v27 = vmul.f32 %v5411_v44, %v5399_v43 }
  0xe5   : >> { %v928_v20 = vor.u32 1.1754944e-38, %v6871_v10  ;;  %v1306_v23 = vmul.f32 %v5414_v28, %v5402_v4  ;;  %v4343_v59 = vpop.eup %4342  ;;  %v5434_v29 = vmul.f32 0.2, %v775_v39  ;;  %v885_v14 = vadd.f32 %v5188_v12, %v5378_v48 }
  0xe6   : >> { %v3459_v9 = vmul.f32 10000.0, %v3457_v32  ;;  %v1454_v40 = vmul.f32 1.442695, %v3458_v25  ;;  %v5439_v45 = vmul.f32 %v4341_v36, %v5419_v61  ;;  %v5442_v56 = vmul.f32 %v1091_v38, %v5164_v2  ;;  %v5465_v38 = vld [vmem:[%s4690_s23 + $0x88] sm:$0xff]  ;;  %v6875_v25 = vld [vmem:[#allocation34_spill] sm:$0xff]  ;;  %v6876_v36 = vld [vmem:[#allocation37_spill] sm:$0xff] }
  0xe7   : >> { %v4345_v30 = vpop.eup %4344  ;;  %v5445_v60 = vmul.f32 %v1121_v34, %v5166_v21  ;;  %v1250_v1 = vmul.f32 %v4343_v59, %v5357_v54  ;;  %v5450_v41 = vsel %vm5363_vm8, %v928_v20, %v924_v53  ;;  %v5453_v12 = vmul.f32 %v1101_v3, %v5172_v35  ;;  %v6872_v34 = vld [vmem:[#allocation31_spill] sm:$0xff] }
  0xe8   : >> { %v5456_v31 = vmul.f32 %v1131_v13, %v5174_v57  ;;  %v1260_v58 = vmul.f32 %v4345_v30, %v5359_v15  ;;  %v1307_v16 = vadd.f32 %v1305_v27, %v1303_v7  ;;  %v1308_v21 = vadd.f32 %v1306_v23, %v1304_v46  ;;  %v6873_v13 = vld [vmem:[#allocation33_spill] sm:$0xff]  ;;  %v5487_v20 = vld [vmem:[%s4690_s23 + $0xa0] sm:$0xff]  ;;  %v5490_v7 = vld [vmem:[%s4690_s23 + $0xa8] sm:$0xff] }
  0xe9   : >> { %v1251_v2 = vmul.f32 %v4343_v59, %v1250_v1  ;;  %v1309_v50 = vmul.f32 %v5445_v60, %v5442_v56  ;;  %4348 = vpow2.f32 %v1454_v40  ;;  %v1456_v57 = vmul.f32 1.442695, %v3459_v9  ;;  %v4152_v40 = vld [vmem:[%s4707_s9 + $0x3f0] sm:$0xff]   ;;  %v5505_v1 = vld [vmem:[%s4707_s9 + $0x480] sm:$0xff]  }
  0xea   : >> { %v4347_v39 = vpop.eup %4346  ;;  %v1261_v62 = vmul.f32 %v4345_v30, %v1260_v58  ;;  %v1310_v35 = vmul.f32 %v5456_v31, %v5453_v12  ;;  %vm1255_vm7 = vweird.f32 %v5357_v54  ;;  %vm1256_vm9 = vweird.f32 %v4343_v59 }
  0xeb   : >> { %v1252_v11 = vmul.f32 0.5, %v1251_v2  ;;  %v1524_v55 = vsub.f32 1.0, %v5460_v17  ;;  %vm1265_vm10 = vweird.f32 %v5359_v15  ;;  %vm1266_vm11 = vweird.f32 %v4345_v30  ;;  %vm1257_vm12 = vmor %vm1255_vm7, %vm1256_vm9 }
  0xec   : >> { %v1262_v3 = vmul.f32 0.5, %v1261_v62  ;;  %v1525_v47 = vsub.f32 1.0, %v5465_v38  ;;  %v5476_v51 = vmul.f32 %v6873_v13, %v6872_v34  ;;  %v5480_v32 = vmul.f32 %v6875_v25, %v6874_v0  ;;  %vm1267_vm13 = vmor %vm1265_vm10, %vm1266_vm11 }
  0xed   : >> { %v5484_v53 = vadd.f32 %v6876_v36, %v5434_v29  ;;  %v1253_v10 = vsub.f32 1.5, %v1252_v11  ;;  %v5493_v46 = vmul.f32 %v4347_v39, %v5450_v41  ;;  %v5496_v27 = vmul.f32 %v5439_v45, %v885_v14 }
  0xee   : >> { %v1263_v23 = vsub.f32 1.5, %v1262_v3  ;;  %v5501_v9 = vadd.f32 %v1309_v50, %v1307_v16  ;;  %v5510_v2 = vadd.f32 %v1310_v35, %v1308_v21  ;;  %4350 = vpow2.f32 %v1456_v57 }
  0xef   : >> { %v1254_v58 = vmul.f32 %v4343_v59, %v1253_v10  ;;  %v3884_v14 = vunpack.c.l.bf16 %v4151_v37  ;;  %v4349_v39 = vpop.eup %4348  ;;  %v5513_v54 = vsub.f32 %v1524_v55, %v5487_v20  ;;  %v5516_v16 = vsub.f32 %v1525_v47, %v5490_v7 }
  0xf0   : >> { %v1264_v62 = vmul.f32 %v4345_v30, %v1263_v23  ;;  %v3885_v50 = vunpack.c.h.bf16 %v4151_v37  ;;  %v3888_v3 = vunpack.c.l.bf16 %v4152_v40  ;;  %v3889_v34 = vunpack.c.h.bf16 %v4152_v40  ;;  %v6877_v40 = vld [vmem:[#allocation29_spill] sm:$0xff] }
  0xf1   : >> { %v1258_v11 = vsel %vm1257_vm12, %v4343_v59, %v1254_v58  ;;  %v3892_v13 = vunpack.c.l.bf16 %v5505_v1  ;;  %v5525_v25 = vadd.f32 1.0, %v4349_v39  ;;  %v6880_v39 = vld [vmem:[#allocation24_spill] sm:$0xff] }
  0xf2   : >> { %v1268_v15 = vsel %vm1267_vm13, %v4345_v30, %v1264_v62  ;;  %v1269_v21 = vmul.f32 %v1258_v11, %v5271_v18  ;;  %v1271_v35 = vmul.f32 %v1258_v11, %v5276_v49  ;;  %v1273_v57 = vmul.f32 %v1258_v11, %v5280_v52 }
  0xf3   : >> { %v1270_v0 = vmul.f32 %v1268_v15, %v5273_v42  ;;  %v1272_v55 = vmul.f32 %v1268_v15, %v5278_v6  ;;  %v1274_v47 = vmul.f32 %v1268_v15, %v5282_v8  ;;  %4352 = vrcp.f32 %v5525_v25 }
  0xf4   : >> { %v1275_v59 = vmul.f32 %v1269_v21, %v5392_v5  ;;  %v1277_v37 = vmul.f32 %v1271_v35, %v5399_v43  ;;  %v1281_v30 = vmul.f32 %v1273_v57, %v5442_v56  ;;  %v1293_v18 = vmul.f32 %v1269_v21, %v5405_v22  ;;  %v4351_v49 = vpop.eup %4350  ;;  %v4148_v56 = vld [vmem:[%s4707_s9 + $0x230] sm:$0xff]  }
  0xf5   : >> { %v1276_v52 = vmul.f32 %v1270_v0, %v5396_v26  ;;  %v1278_v42 = vmul.f32 %v1272_v55, %v5402_v4  ;;  %v1282_v6 = vmul.f32 %v1274_v47, %v5453_v12  ;;  %v1294_v8 = vmul.f32 %v1270_v0, %v5408_v33  ;;  %v6878_v26 = vld [vmem:[#allocation23_spill] sm:$0xff]  ;;  %v6879_v4 = vld [vmem:[#allocation30_spill] sm:$0xff] }
  0xf6   : >> { %v1279_v36 = vadd.f32 %v1277_v37, %v1275_v59  ;;  %v1295_v10 = vmul.f32 %v1271_v35, %v5411_v44  ;;  %v1296_v5 = vmul.f32 %v1272_v55, %v5414_v28  ;;  %v1299_v43 = vmul.f32 %v1273_v57, %v5445_v60  ;;  %v4149_v57 = vld [vmem:[%s4707_s9 + $0x2c0] sm:$0xff]   ;;  %v4150_v37 = vld [vmem:[%s4707_s9 + $0x350] sm:$0xff]  }
  0xf7   : >> { %v1280_v23 = vadd.f32 %v1278_v42, %v1276_v52  ;;  %v1300_v22 = vmul.f32 %v1274_v47, %v5456_v31  ;;  %v1490_v58 = vsub.f32 %v6878_v26, %v6877_v40  ;;  %v1491_v12 = vsub.f32 %v6880_v39, %v6879_v4 }
  0xf8   : >> { %v1283_v62 = vadd.f32 %v1281_v30, %v1279_v36  ;;  %v1297_v33 = vadd.f32 %v1295_v10, %v1293_v18  ;;  %v1298_v11 = vadd.f32 %v1296_v5, %v1294_v8  ;;  %v5544_v44 = vadd.f32 1.0, %v4351_v49 }
  0xf9   : >> { %v1284_v28 = vadd.f32 %v1282_v6, %v1280_v23  ;;  %v5548_v60 = vmul.f32 %v3884_v14, %v5460_v17  ;;  %v5551_v31 = vmul.f32 %v3885_v50, %v5465_v38  ;;  %v3872_v35 = vunpack.c.l.bf16 %v4148_v56  ;;  %v5567_v6 = vld [vmem:[%s4707_s9 + $0x370] sm:$0xff]   ;;  %v5573_v36 = vpop.eup %4352 }
  0xfa   : >> { %v1301_v15 = vadd.f32 %v1299_v43, %v1297_v33  ;;  %v1302_v21 = vadd.f32 %v1300_v22, %v1298_v11  ;;  %v1313_v55 = vmul.f32 2.0, %v1283_v62  ;;  %v5556_v47 = vmul.f32 %v3888_v3, %v5487_v20 }
  0xfb   : >> { %v5559_v59 = vmul.f32 %v3889_v34, %v5490_v7  ;;  %v5562_v14 = vmul.f32 %v3892_v13, %v5513_v54  ;;  %v1314_v50 = vmul.f32 2.0, %v1284_v28  ;;  %4354 = vrcp.f32 %v5544_v44  ;;  %v5570_v34 = vld [vmem:[%s4690_s23 + $0x40] sm:$0xff] }
  0xfc   : >> { %v1492_v30 = vmul.f32 10000.0, %v1490_v58  ;;  %v1493_v18 = vmul.f32 10000.0, %v1491_v12  ;;  %v1285_v49 = vmax.f32 %v1283_v62, 0.0  ;;  %vm1287_vm14 = vcmp.gt.f32.partialorder %v1283_v62, 0.0 }
  0xfd   : >> { %v1315_v52 = vmul.f32 %v1313_v55, %v1301_v15  ;;  %v3876_v42 = vunpack.c.l.bf16 %v4149_v57  ;;  %vm1288_vm15 = vcmp.gt.f32.partialorder %v1284_v28, 0.0  ;;  %v1316_v3 = vmul.f32 %v1314_v50, %v1302_v21  ;;  %v5585_v21 = vld [vmem:[%s4690_s23 + $0x48] sm:$0xff] }
  0xfe   : >> { %v3873_v8 = vunpack.c.h.bf16 %v4148_v56  ;;  %v1404_v13 = vmul.f32 %v5570_v34, %v3872_v35  ;;  %v3877_v5 = vunpack.c.h.bf16 %v4149_v57  ;;  %v3880_v23 = vunpack.c.l.bf16 %v4150_v37  ;;  %v5591_v55 = vld [vmem:[%s4690_s23 + $0x68] sm:$0xff] }
  0xff   : >> { %v1317_v10 = vsub.f32 %v1315_v52, %v5501_v9  ;;  %v1413_v43 = vmul.f32 %v3876_v42, %v5002_v63  ;;  %v6881_v22 = vmov 0.0   ;;  %v1318_v58 = vsub.f32 %v1316_v3, %v5510_v2 }
 0x100   : >> { %v3426_v26 = vsel %vm1287_vm14, 1.0, %v6881_v22  ;;  %v1471_v56 = vand.u32 2147483648, %v5525_v25  ;;  %v3896_v39 = vunpack.c.l.bf16 %v5567_v6  ;;  %v1286_v12 = vmax.f32 %v1284_v28, 0.0 }
 0x101   : >> { %v3427_v62 = vsel %vm1288_vm15, 1.0, %v6881_v22  ;;  %v1319_v33 = vmax.f32 %v1317_v10, 0.0  ;;  %v3881_v11 = vunpack.c.h.bf16 %v4150_v37  ;;  %v5582_v15 = vpop.eup %4354  ;;  %v1320_v9 = vmax.f32 %v1318_v58, 0.0  ;;  %v4167_v22 = vld [vmem:[%s4707_s9 + $0x440] sm:$0xff]  }
 0x102   : >> { %v1405_v63 = vmul.f32 %v5585_v21, %v3873_v8  ;;  %v1428_v35 = vmul.f32 0.3, %v1285_v49  ;;  %v1461_v2 = vmul.f32 %v5573_v36, %v5525_v25  ;;  %v1414_v28 = vmul.f32 %v5591_v55, %v3877_v5 }
 0x103   : >> { %v1321_v57 = vmul.f32 %v3426_v26, %v1319_v33  ;;  %v1415_v50 = vadd.f32 %v1413_v43, %v1404_v13  ;;  %v1424_v52 = vmul.f32 %v3880_v23, %v5018_v19  ;;  %v1322_v37 = vmul.f32 %v3427_v62, %v1320_v9 }
 0x104   : >> { %v1462_v42 = vsub.f32 1.0, %v1461_v2  ;;  %vm1465_vm0 = vweird.f32 %v5525_v25  ;;  %v1469_v3 = vand.u32 2147483647, %v5525_v25  ;;  %v1425_v49 = vmul.f32 %v3881_v11, %v5024_v24  ;;  %v4155_v25 = vld [vmem:[%s4707_s9 + $0x400] sm:$0xff]  }
 0x105   : >> { %v1323_v10 = vmul.f32 %v1321_v57, %v1321_v57  ;;  %v1429_v8 = vmul.f32 0.3, %v1286_v12  ;;  %v1494_v58 = vmul.f32 1.442695, %v1492_v30  ;;  %v1324_v0 = vmul.f32 %v1322_v37, %v1322_v37 }
 0x106   : >> { %v5598_v26 = vadd.f32 0.5, %v1428_v35  ;;  %v1463_v33 = vmul.f32 %v5573_v36, %v1462_v42  ;;  %vm1466_vm1 = vweird.f32 %v5573_v36  ;;  %v1416_v5 = vadd.f32 %v1414_v28, %v1405_v63 }
 0x107   : >> { %v1325_v13 = vmul.f32 %v1323_v10, %v1323_v10  ;;  %v1426_v43 = vadd.f32 %v1424_v52, %v1415_v50  ;;  %v1476_v23 = vmul.f32 %v5582_v15, %v5544_v44  ;;  %v1326_v62 = vmul.f32 %v1324_v0, %v1324_v0  ;;  %vm5609_vm5 = vmor %vm1465_vm0, %vm1466_vm1 }
 0x108   : >> { %v1464_v9 = vadd.f32 %v5573_v36, %v1463_v33  ;;  %vm1480_vm2 = vweird.f32 %v5544_v44  ;;  %vm1481_vm3 = vweird.f32 %v5582_v15  ;;  %v1486_v63 = vand.u32 2147483648, %v5544_v44 }
 0x109   : >> { %v1327_v30 = vmul.f32 %v1325_v13, %v1325_v13  ;;  %v1477_v11 = vsub.f32 1.0, %v1476_v23  ;;  %v1496_v35 = vmul.f32 1.442695, %v1493_v18  ;;  %v1328_v2 = vmul.f32 %v1326_v62, %v1326_v62  ;;  %vm5630_vm8 = vmor %vm1480_vm2, %vm1481_vm3 }
 0x10a   : >> { %v5614_v0 = vadd.f32 0.5, %v1429_v8  ;;  %v1484_v57 = vand.u32 2147483647, %v5544_v44  ;;  %4356 = vpow2.f32 %v1494_v58  ;;  %v1427_v50 = vadd.f32 %v1425_v49, %v1416_v5 }
 0x10b   : >> { %v1329_v28 = vmul.f32 %v1327_v30, %v1327_v30  ;;  %v1478_v52 = vmul.f32 %v5582_v15, %v1477_v11  ;;  %4358 = vpow2.f32 %v1496_v35  ;;  %v1330_v37 = vmul.f32 %v1328_v2, %v1328_v2 }
 0x10c   : >> { %v1468_v42 = vsel %vm5609_vm5, %v5573_v36, %v1464_v9  ;;  %vm5622_vm6 = vcmp.eq.f32.partialorder %v1469_v3, 8.507059e+37  ;;  %v1472_v10 = vor.u32 1.1754944e-38, %v1471_v56  ;;  %v1487_v33 = vor.u32 1.1754944e-38, %v1486_v63  ;;  %v4156_v9 = vld [vmem:[%s4707_s9 + $0x490] sm:$0xff]  }
 0x10d   : >> { %v1331_v8 = vmul.f32 %v1329_v28, %v1329_v28  ;;  %v1479_v58 = vadd.f32 %v5582_v15, %v1478_v52  ;;  %v3897_v36 = vunpack.c.h.bf16 %v5567_v6  ;;  %v1332_v13 = vmul.f32 %v1330_v37, %v1330_v37 }
 0x10e   : >> { %vm1485_vm4 = vcmp.eq.f32.partialorder %v1484_v57, 8.507059e+37  ;;  %v3900_v3 = vunpack.c.l.bf16 %v4155_v25  ;;  %v3901_v5 = vunpack.c.h.bf16 %v4155_v25  ;;  %v1442_v56 = vmul.f32 %v5598_v26, %v1426_v43 }
 0x10f   : >> { %v1333_v23 = vmul.f32 %v1331_v8, %v1331_v8  ;;  %v1443_v62 = vmul.f32 %v5614_v0, %v1427_v50  ;;  %v1483_v44 = vsel %vm5630_vm8, %v5582_v15, %v1479_v58  ;;  %v1334_v12 = vmul.f32 %v1332_v13, %v1332_v13  ;;  %v6894_v8 = vld [vmem:[#allocation35_spill] sm:$0xff] }
 0x110   : >> { %v4357_v30 = vpop.eup %4356  ;;  %v5644_v11 = vsel %vm5622_vm6, %v1472_v10, %v1468_v42  ;;  %v1566_v63 = vmul.f32 %v3896_v39, %v5460_v17  ;;  %v1575_v35 = vmul.f32 %v3900_v3, %v5487_v20  ;;  %v5652_v57 = vsel %vm1485_vm4, %v1487_v33, %v1483_v44 }
 0x111   : >> { %v4359_v43 = vpop.eup %4358  ;;  %v5650_v2 = vmul.f32 0.2, %v1333_v23  ;;  %6889 = vst [vmem:[#allocation33_spill] sm:$0xff] %v5652_v57  ;;  %v1567_v15 = vmul.f32 %v3897_v36, %v5465_v38  ;;  %v1576_v28 = vmul.f32 %v3901_v5, %v5490_v7  ;;  %v5656_v50 = vmul.f32 0.2, %v1334_v12  ;;  %v6895_v36 = vld [vmem:[#allocation36_spill] sm:$0xff] }
 0x112   : >> { %v1546_v52 = vadd.f32 %v5556_v47, %v5548_v60  ;;  %v6891_v6 = vunpack.c.h.bf16 %v5505_v1  ;;  %v3904_v25 = vunpack.c.l.bf16 %v4156_v9  ;;  %v5665_v42 = vmul.f32 %v4357_v30, %v5644_v11  ;;  %v4159_v30 = vld [vmem:[%s4707_s9 + $0x4a0] sm:$0xff]  }
 0x113   : >> { %6888 = vst [vmem:[#allocation31_spill] sm:$0xff] %v5650_v2  ;;  %v1444_v37 = vadd.f32 %v1442_v56, %v5650_v2  ;;  %v1547_v18 = vadd.f32 %v5559_v59, %v5551_v31  ;;  %v3905_v10 = vunpack.c.h.bf16 %v4156_v9  ;;  %v952_v49 = vmul.f32 %v5493_v46, %v5484_v53  ;;  %v5684_v31 = vld [vmem:[%s4707_s9 + $0x210] sm:$0xff]   ;;  %v4157_v56 = vld [vmem:[%s4707_s9 + $0x380] sm:$0xff]  }
 0x114   : >> { %6890 = vst [vmem:[#allocation32_spill] sm:$0xff] %v5656_v50  ;;  %v1556_v39 = vmul.f32 %v6891_v6, %v5516_v16  ;;  %v1445_v60 = vadd.f32 %v1443_v62, %v5656_v50  ;;  %v5673_v1 = vmul.f32 %v4359_v43, %v5652_v57  ;;  %v1577_v47 = vadd.f32 %v1575_v35, %v1566_v63  ;;  %v4158_v62 = vld [vmem:[%s4707_s9 + $0x410] sm:$0xff]  }
 0x115   : >> { %6892 = vst [vmem:[#allocation34_spill] sm:$0xff] %v5665_v42  ;;  %v5677_v58 = vadd.f32 %v5378_v48, %v6894_v8  ;;  %v5681_v33 = vadd.f32 %v5476_v51, %v5378_v48  ;;  %v1510_v59 = vmul.f32 %v5665_v42, %v1444_v37  ;;  %v1578_v53 = vadd.f32 %v1576_v28, %v1567_v15  ;;  %v4143_v8 = vld [vmem:[%s4707_s9 + $0x2a0] sm:$0xff]  }
 0x116   : >> { %6893 = vst [vmem:[#allocation37_spill] sm:$0xff] %v5673_v1  ;;  %v5689_v13 = vadd.f32 %v5434_v29, %v6895_v36  ;;  %v1511_v3 = vmul.f32 %v5673_v1, %v1445_v60  ;;  %v1557_v5 = vadd.f32 %v5562_v14, %v1546_v52  ;;  %v1586_v23 = vmul.f32 %v3904_v25, %v5513_v54 }
 0x117   : >> { %v5698_v48 = vadd.f32 %v5480_v32, %v5434_v29  ;;  %v5701_v51 = vadd.f32 %v1510_v59, %v5496_v27  ;;  %v1558_v44 = vadd.f32 %v1556_v39, %v1547_v18  ;;  %v1587_v9 = vmul.f32 %v3905_v10, %v5516_v16 }
 0x118   : >> { %v3848_v12 = vunpack.c.l.bf16 %v5684_v31  ;;  %v3849_v63 = vunpack.c.h.bf16 %v5684_v31  ;;  %v5707_v14 = vadd.f32 %v1511_v3, %v952_v49  ;;  %v1588_v35 = vadd.f32 %v1586_v23, %v1577_v47  ;;  %v5723_v31 = vld [vmem:[%s4707_s9 + $0x220] sm:$0xff]  }
 0x119   : >> { %6896 = vst [vmem:[#allocation23_spill] sm:$0xff] %v5701_v51  ;;  %v1589_v43 = vadd.f32 %v1587_v9, %v1578_v53  ;;  %v3908_v15 = vunpack.c.l.bf16 %v4157_v56  ;;  %v3909_v29 = vunpack.c.h.bf16 %v4157_v56  ;;  %v3912_v32 = vunpack.c.l.bf16 %v4158_v62 }
 0x11a   : >> { %6897 = vst [vmem:[#allocation24_spill] sm:$0xff] %v5707_v14  ;;  %v3913_v28 = vunpack.c.h.bf16 %v4158_v62  ;;  %v3916_v27 = vunpack.c.l.bf16 %v4159_v30  ;;  %v3917_v52 = vunpack.c.h.bf16 %v4159_v30  ;;  %v5709_v6 = vsub.f32 0.0, %v1557_v5 }
 0x11b   : >> { %v1597_v39 = vmul.f32 %v3908_v15, %v5460_v17  ;;  %v1598_v25 = vmul.f32 %v3909_v29, %v5465_v38  ;;  %v1606_v37 = vmul.f32 %v3912_v32, %v5487_v20  ;;  %v5714_v18 = vsub.f32 0.0, %v1558_v44 }
 0x11c   : >> { %v1607_v10 = vmul.f32 %v3913_v28, %v5490_v7  ;;  %v1617_v49 = vmul.f32 %v3916_v27, %v5513_v54  ;;  %v1618_v60 = vmul.f32 %v3917_v52, %v5516_v16  ;;  %v5719_v47 = vsub.f32 1.0, %v1588_v35 }
 0x11d   : >> { %6898 = vst [vmem:[#allocation35_spill] sm:$0xff] %v5714_v18  ;;  %v1608_v59 = vadd.f32 %v1606_v37, %v1597_v39  ;;  %v5725_v53 = vsub.f32 1.0, %v1589_v43  ;;  %v5727_v36 = vsub.f32 0.0, %v1588_v35  ;;  %v5729_v3 = vsub.f32 0.0, %v1589_v43 }
 0x11e   : >> { %6899 = vst [vmem:[#allocation36_spill] sm:$0xff] %v5719_v47  ;;  %v1609_v5 = vadd.f32 %v1607_v10, %v1598_v25  ;;  %v1631_v23 = vmul.f32 %v5709_v6, %v5709_v6  ;;  %v1632_v56 = vmul.f32 %v5714_v18, %v5714_v18  ;;  %v1633_v62 = vmul.f32 %v5719_v47, %v5719_v47 }
 0x11f   : >> { %6900 = vst [vmem:[#allocation38_spill] sm:$0xff] %v5725_v53  ;;  %v1619_v44 = vadd.f32 %v1617_v49, %v1608_v59  ;;  %v1634_v9 = vmul.f32 %v5725_v53, %v5725_v53  ;;  %v1663_v30 = vmul.f32 %v5727_v36, %v5727_v36  ;;  %v1664_v35 = vmul.f32 %v5729_v3, %v5729_v3  ;;  %v4160_v59 = vld [vmem:[%s4707_s9 + $0x390] sm:$0xff]  }
 0x120   : >> { %6901 = vst [vmem:[#allocation39_spill] sm:$0xff] %v5727_v36  ;;  %v3852_v43 = vunpack.c.l.bf16 %v4143_v8  ;;  %v3853_v15 = vunpack.c.h.bf16 %v4143_v8  ;;  %v1620_v32 = vadd.f32 %v1618_v60, %v1609_v5  ;;  %v1635_v52 = vadd.f32 %v1633_v62, %v1631_v23  ;;  %v4161_v62 = vld [vmem:[%s4707_s9 + $0x420] sm:$0xff]  }
 0x121   : >> { %6902 = vst [vmem:[#allocation40_spill] sm:$0xff] %v5729_v3  ;;  %v5744_v28 = vsub.f32 0.0, %v1619_v44  ;;  %v5746_v27 = vsub.f32 3.0, %v1619_v44  ;;  %v1665_v39 = vadd.f32 %v1663_v30, %v1631_v23  ;;  %v1636_v10 = vadd.f32 %v1634_v9, %v1632_v56  ;;  %v5764_v30 = vld [vmem:[%s4690_s23 + $0x60] sm:$0xff]  ;;  %v5768_v9 = vld [vmem:[%s4707_s9 + $0x330] sm:$0xff]  }
 0x122   : >> { %v5748_v25 = vsub.f32 0.0, %v1620_v32  ;;  %v5750_v37 = vsub.f32 3.0, %v1620_v32  ;;  %v1666_v49 = vadd.f32 %v1664_v35, %v1632_v56  ;;  %v1342_v8 = vmul.f32 %v5570_v34, %v3848_v12 }
 0x123   : >> { %6903 = vst [vmem:[#allocation41_spill] sm:$0xff] %v5744_v28  ;;  %v1637_v5 = vmul.f32 %v5744_v28, %v5744_v28  ;;  %v1667_v44 = vmul.f32 %v5746_v27, %v5746_v27  ;;  %v5761_v23 = vmul.f32 %v5585_v21, %v3849_v63  ;;  %v1351_v56 = vmul.f32 %v5764_v30, %v3852_v43  ;;  %v4163_v63 = vld [vmem:[%s4707_s9 + $0x3a0] sm:$0xff]  }
 0x124   : >> { %6904 = vst [vmem:[#allocation42_spill] sm:$0xff] %v5746_v27  ;;  %v1638_v12 = vmul.f32 %v5748_v25, %v5748_v25  ;;  %v1668_v35 = vmul.f32 %v5750_v37, %v5750_v37  ;;  %v3920_v29 = vunpack.c.l.bf16 %v4160_v59  ;;  %v3921_v14 = vunpack.c.h.bf16 %v4160_v59 }
 0x125   : >> { %6905 = vst [vmem:[#allocation43_spill] sm:$0xff] %v5748_v25  ;;  %v1639_v32 = vadd.f32 %v1637_v5, %v1635_v52  ;;  %v1669_v60 = vadd.f32 %v1667_v44, %v1665_v39  ;;  %v5776_v51 = vmul.f32 %v5591_v55, %v3853_v15  ;;  %v3924_v4 = vunpack.c.l.bf16 %v4161_v62  ;;  %v4162_v52 = vld [vmem:[%s4707_s9 + $0x4b0] sm:$0xff]  }
 0x126   : >> { %6906 = vst [vmem:[#allocation44_spill] sm:$0xff] %v5750_v37  ;;  %v1640_v1 = vadd.f32 %v1638_v12, %v1636_v10  ;;  %v1670_v43 = vadd.f32 %v1668_v35, %v1666_v49  ;;  %v3925_v15 = vunpack.c.h.bf16 %v4161_v62  ;;  %v3932_v5 = vunpack.c.l.bf16 %v4163_v63  ;;  %v4164_v10 = vld [vmem:[%s4707_s9 + $0x430] sm:$0xff]  }
 0x127   : >> { %v5780_v50 = vmax.f32 %v1639_v32, 1e-12  ;;  %v5782_v42 = vmax.f32 %v1669_v60, 1e-12  ;;  %v5790_v49 = vadd.f32 %v1351_v56, %v1342_v8  ;;  %v1712_v44 = vmul.f32 %v3920_v29, %v5460_v17  ;;  %v4165_v60 = vld [vmem:[%s4707_s9 + $0x4c0] sm:$0xff]  }
 0x128   : >> { %v5785_v39 = vmax.f32 %v1640_v1, 1e-12  ;;  %v5787_v59 = vmax.f32 %v1670_v43, 1e-12  ;;  %v1713_v12 = vmul.f32 %v3921_v14, %v5465_v38  ;;  %v1721_v1 = vmul.f32 %v3924_v4, %v5487_v20  ;;  %v4166_v43 = vld [vmem:[%s4707_s9 + $0x3b0] sm:$0xff]  }
 0x129   : >> { %4360 = vrsqrt.f32 %v5780_v50  ;;  %v3928_v35 = vunpack.c.l.bf16 %v4162_v52  ;;  %v3929_v32 = vunpack.c.h.bf16 %v4162_v52  ;;  %v3933_v62 = vunpack.c.h.bf16 %v4163_v63 }
 0x12a   : >> { %4362 = vrsqrt.f32 %v5785_v39  ;;  %v1743_v8 = vmul.f32 %v3932_v5, %v5460_v17  ;;  %v3936_v56 = vunpack.c.l.bf16 %v4164_v10  ;;  %v1722_v29 = vmul.f32 %v3925_v15, %v5490_v7 }
 0x12b   : >> { %4364 = vrsqrt.f32 %v5782_v42  ;;  %v3937_v14 = vunpack.c.h.bf16 %v4164_v10  ;;  %v3940_v40 = vunpack.c.l.bf16 %v4165_v60  ;;  %v1744_v2 = vmul.f32 %v3933_v62, %v5465_v38 }
 0x12c   : >> { %4366 = vrsqrt.f32 %v5787_v59  ;;  %v1752_v4 = vmul.f32 %v3936_v56, %v5487_v20  ;;  %v3941_v57 = vunpack.c.h.bf16 %v4165_v60  ;;  %v3944_v52 = vunpack.c.l.bf16 %v4166_v43 }
 0x12d   : >> { %v1723_v37 = vadd.f32 %v1721_v1, %v1712_v44  ;;  %v1732_v63 = vmul.f32 %v3928_v35, %v5513_v54  ;;  %v1753_v5 = vmul.f32 %v3937_v14, %v5490_v7  ;;  %v3948_v27 = vunpack.c.l.bf16 %v4167_v22  ;;  %v4146_v14 = vld [vmem:[%s4707_s9 + $0x2b0] sm:$0xff]  }
 0x12e   : >> { %v1754_v3 = vadd.f32 %v1752_v4, %v1743_v8  ;;  %v1763_v15 = vmul.f32 %v3940_v40, %v5513_v54  ;;  %v3945_v10 = vunpack.c.h.bf16 %v4166_v43  ;;  %v3949_v36 = vunpack.c.h.bf16 %v4167_v22  ;;  %v4168_v4 = vld [vmem:[%s4707_s9 + $0x4d0] sm:$0xff]  }
 0x12f   : >> { %v5808_v25 = vpop.eup %4360  ;;  %v1733_v44 = vmul.f32 %v3929_v32, %v5516_v16  ;;  %v1774_v1 = vmul.f32 %v3944_v52, %v5460_v17  ;;  %v1783_v35 = vmul.f32 %v3948_v27, %v5487_v20  ;;  %v1724_v40 = vadd.f32 %v1722_v29, %v1713_v12 }
 0x130   : >> { %v5811_v62 = vpop.eup %4362  ;;  %v1644_v60 = vmul.f32 %v5808_v25, %v5780_v50  ;;  %v1755_v43 = vadd.f32 %v1753_v5, %v1744_v2  ;;  %v1764_v22 = vmul.f32 %v3941_v57, %v5516_v16  ;;  %v6907_v32 = vunpack.c.l.bf16 %v5723_v31 }
 0x131   : >> { %v5818_v56 = vpop.eup %4364  ;;  %v1654_v8 = vmul.f32 %v5811_v62, %v5785_v39  ;;  %v6908_v20 = vunpack.c.h.bf16 %v5723_v31  ;;  %v5837_v12 = vadd.f32 %v1732_v63, %v1723_v37  ;;  %v5841_v57 = vadd.f32 %v1763_v15, %v1754_v3 }
 0x132   : >> { %v5825_v28 = vpop.eup %4366  ;;  %v1373_v17 = vmul.f32 %v5570_v34, %v6907_v32  ;;  %v1674_v52 = vmul.f32 %v5818_v56, %v5782_v42  ;;  %v1775_v29 = vmul.f32 %v3945_v10, %v5465_v38  ;;  %v1784_v5 = vmul.f32 %v3949_v36, %v5490_v7 }
 0x133   : >> { %v5833_v27 = vmul.f32 %v5585_v21, %v6908_v20  ;;  %v1684_v2 = vmul.f32 %v5825_v28, %v5787_v59  ;;  %v3864_v34 = vunpack.c.l.bf16 %v4146_v14  ;;  %v1645_v31 = vmul.f32 %v5808_v25, %v1644_v60  ;;  %v4147_v20 = vld [vmem:[%s4707_s9 + $0x340] sm:$0xff]  }
 0x134   : >> { %v1785_v32 = vadd.f32 %v1783_v35, %v1774_v1  ;;  %v3952_v21 = vunpack.c.l.bf16 %v4168_v4  ;;  %v1655_v53 = vmul.f32 %v5811_v62, %v1654_v8  ;;  %v5848_v47 = vadd.f32 %v1733_v44, %v1724_v40 }
 0x135   : >> { %v5850_v37 = vadd.f32 %v1764_v22, %v1755_v43  ;;  %v3953_v63 = vunpack.c.h.bf16 %v4168_v4  ;;  %v3865_v18 = vunpack.c.h.bf16 %v4146_v14  ;;  %v1675_v3 = vmul.f32 %v5818_v56, %v1674_v52 }
 0x136   : >> { %v1685_v38 = vmul.f32 %v5825_v28, %v1684_v2  ;;  %v1794_v7 = vmul.f32 %v3952_v21, %v5513_v54  ;;  %v1786_v36 = vadd.f32 %v1784_v5, %v1775_v29  ;;  %v1798_v10 = vmul.f32 %v5837_v12, %v5837_v12 }
 0x137   : >> { %v1795_v15 = vmul.f32 %v3953_v63, %v5516_v16  ;;  %v1800_v60 = vmul.f32 %v5841_v57, %v5841_v57  ;;  %v1382_v44 = vmul.f32 %v5764_v30, %v3864_v34  ;;  %v3868_v1 = vunpack.c.l.bf16 %v4147_v20 }
 0x138   : >> { %v1646_v35 = vmul.f32 0.5, %v1645_v31  ;;  %v5861_v14 = vadd.f32 %v1794_v7, %v1785_v32  ;;  %v1354_v8 = vadd.f32 %v5776_v51, %v5761_v23  ;;  %v1656_v40 = vmul.f32 0.5, %v1655_v53 }
 0x139   : >> { %v1799_v43 = vmul.f32 %v5848_v47, %v5848_v47  ;;  %v1801_v22 = vmul.f32 %v5850_v37, %v5850_v37  ;;  %v6909_v4 = vunpack.c.l.bf16 %v5768_v9  ;;  %v6910_v30 = vunpack.c.h.bf16 %v5768_v9 }
 0x13a   : >> { %v1676_v29 = vmul.f32 0.5, %v1675_v3  ;;  %v1686_v5 = vmul.f32 0.5, %v1685_v38  ;;  %v3869_v34 = vunpack.c.h.bf16 %v4147_v20  ;;  %v5875_v31 = vadd.f32 %v1795_v15, %v1786_v36 }
 0x13b   : >> { %v1362_v52 = vmul.f32 %v6909_v4, %v5018_v19  ;;  %v1363_v2 = vmul.f32 %v6910_v30, %v5024_v24  ;;  %v1802_v51 = vadd.f32 %v1800_v60, %v1798_v10  ;;  %v1804_v53 = vmul.f32 %v5861_v14, %v5861_v14  ;;  %v6921_v30 = vld [vmem:[#allocation35_spill] sm:$0xff] }
 0x13c   : >> { %v1383_v23 = vmul.f32 %v5591_v55, %v3865_v18  ;;  %v1384_v32 = vadd.f32 %v1382_v44, %v1373_v17  ;;  %v1393_v21 = vmul.f32 %v3868_v1, %v5018_v19  ;;  %v1647_v63 = vsub.f32 1.5, %v1646_v35 }
 0x13d   : >> { %vm1649_vm7 = vweird.f32 %v5780_v50  ;;  %vm1650_vm9 = vweird.f32 %v5808_v25  ;;  %v1657_v9 = vsub.f32 1.5, %v1656_v40  ;;  %v1803_v3 = vadd.f32 %v1801_v22, %v1799_v43 }
 0x13e   : >> { %vm1659_vm10 = vweird.f32 %v5785_v39  ;;  %vm1660_vm11 = vweird.f32 %v5811_v62  ;;  %v1677_v20 = vsub.f32 1.5, %v1676_v29  ;;  %v1687_v38 = vsub.f32 1.5, %v1686_v5  ;;  %vm5891_vm14 = vmor %vm1649_vm7, %vm1650_vm9  ;;  %v6922_v29 = vld [vmem:[#allocation36_spill] sm:$0xff] }
 0x13f   : >> { %vm1679_vm12 = vweird.f32 %v5782_v42  ;;  %vm1680_vm13 = vweird.f32 %v5818_v56  ;;  %v1805_v19 = vmul.f32 %v5875_v31, %v5875_v31  ;;  %v1806_v55 = vadd.f32 %v1804_v53, %v1802_v51  ;;  %vm5901_vm1 = vmor %vm1659_vm10, %vm1660_vm11 }
 0x140   : >> { %v955_v50 = vsub.f32 1.0, %v5419_v61  ;;  %v1648_v18 = vmul.f32 %v5808_v25, %v1647_v63  ;;  %vm1689_vm15 = vweird.f32 %v5787_v59  ;;  %vm1690_vm0 = vweird.f32 %v5825_v28  ;;  %vm5914_vm2 = vmor %vm1679_vm12, %vm1680_vm13 }
 0x141   : >> { %v1364_v7 = vadd.f32 %v1362_v52, %v5790_v49  ;;  %v1658_v36 = vmul.f32 %v5811_v62, %v1657_v9  ;;  %v1807_v61 = vadd.f32 %v1805_v19, %v1803_v3  ;;  %v5905_v10 = vmax.f32 %v1806_v55, 1e-12  ;;  %vm1691_vm3 = vmor %vm1689_vm15, %vm1690_vm0  ;;  %v6927_v9 = vld [vmem:[#allocation43_spill] sm:$0xff]  ;;  %v6929_v19 = vld [vmem:[#allocation44_spill] sm:$0xff] }
 0x142   : >> { %v1385_v60 = vadd.f32 %v1383_v23, %v5833_v27  ;;  %v1394_v44 = vmul.f32 %v3869_v34, %v5024_v24  ;;  %v1678_v59 = vmul.f32 %v5818_v56, %v1677_v20  ;;  %v1688_v39 = vmul.f32 %v5825_v28, %v1687_v38  ;;  %v6923_v34 = vld [vmem:[#allocation38_spill] sm:$0xff]  ;;  %v6925_v23 = vld [vmem:[#allocation39_spill] sm:$0xff] }
 0x143   : >> { %v1365_v1 = vadd.f32 %v1363_v2, %v1354_v8  ;;  %v1395_v35 = vadd.f32 %v1393_v21, %v1384_v32  ;;  %v5919_v40 = vmax.f32 %v1807_v61, 1e-12  ;;  %4368 = vrsqrt.f32 %v5905_v10  ;;  %v6926_v21 = vld [vmem:[#allocation40_spill] sm:$0xff]  ;;  %v6928_v20 = vld [vmem:[#allocation42_spill] sm:$0xff] }
 0x144   : >> { %v5924_v24 = vmul.f32 %v5439_v45, %v5677_v58  ;;  %v5928_v42 = vmul.f32 %v5439_v45, %v5681_v33  ;;  %v956_v27 = vsub.f32 1.0, %v5450_v41  ;;  %v1652_v8 = vsel %vm5891_vm14, %v5808_v25, %v1648_v18  ;;  %v3550_v18 = vld [vmem:[%s4848_s20 + $0xc0] sm:$0xff] }
 0x145   : >> { %v5936_v43 = vmul.f32 %v5493_v46, %v5689_v13  ;;  %v5940_v22 = vmul.f32 %v5493_v46, %v5698_v48  ;;  %v1662_v58 = vsel %vm5901_vm1, %v5811_v62, %v1658_v36  ;;  %4370 = vrsqrt.f32 %v5919_v40 }
 0x146   : >> { %6917 = vst [vmem:[#allocation45_spill] sm:$0xff] %v5924_v24  ;;  %v1396_v33 = vadd.f32 %v1394_v44, %v1385_v60  ;;  %v1432_v41 = vmul.f32 %v5598_v26, %v1364_v7  ;;  %v1682_v25 = vsel %vm5914_vm2, %v5818_v56, %v1678_v59  ;;  %v1692_v13 = vsel %vm1691_vm3, %v5825_v28, %v1688_v39  ;;  %v6924_v28 = vld [vmem:[#allocation41_spill] sm:$0xff]  ;;  %v3551_v39 = vld [vmem:[%s4848_s20 + $0xc8] sm:$0xff] }
 0x147   : >> { %6918 = vst [vmem:[#allocation46_spill] sm:$0xff] %v5928_v42  ;;  %v1433_v4 = vmul.f32 %v5614_v0, %v1365_v1  ;;  %v1438_v48 = vmul.f32 %v5598_v26, %v1395_v35  ;;  %v1514_v52 = vsub.f32 1.0, %v5644_v11  ;;  %v5955_v62 = vmul.f32 %v1652_v8, %v5709_v6  ;;  %v6006_v1 = vld [vmem:[%s4690_s23 + $0xc0] sm:$0xff]  ;;  %v6931_v35 = vld [vmem:[#allocation33_spill] sm:$0xff] }
 0x148   : >> { %6919 = vst [vmem:[#allocation47_spill] sm:$0xff] %v5936_v43  ;;  %v5958_v2 = vmul.f32 %v1662_v58, %v6921_v30  ;;  %v5961_v5 = vmul.f32 %v1652_v8, %v6922_v29  ;;  %v5964_v56 = vmul.f32 %v1662_v58, %v6923_v34  ;;  %v5967_v51 = vmul.f32 %v1652_v8, %v6924_v28  ;;  %v4194_v42 = vld [vmem:[%s4707_s9 + $0x5f0] sm:$0xff]  }
 0x149   : >> { %6920 = vst [vmem:[#allocation48_spill] sm:$0xff] %v5940_v22  ;;  %v4369_v53 = vpop.eup %4368  ;;  %v5970_v26 = vmul.f32 %v1682_v25, %v5709_v6  ;;  %v5973_v11 = vmul.f32 %v1692_v13, %v6921_v30  ;;  %v5976_v32 = vmul.f32 %v1682_v25, %v6925_v23  ;;  %v5979_v63 = vmul.f32 %v1692_v13, %v6926_v21  ;;  %v6932_v21 = vld [vmem:[#allocation31_spill] sm:$0xff] }
 0x14a   : >> { %v5982_v3 = vmul.f32 %v1662_v58, %v6927_v9  ;;  %v5985_v38 = vmul.f32 %v1682_v25, %v6928_v20  ;;  %v5988_v6 = vmul.f32 %v1692_v13, %v6929_v19  ;;  %v1811_v55 = vmul.f32 %v4369_v53, %v5905_v10  ;;  %v6933_v19 = vld [vmem:[#allocation34_spill] sm:$0xff] }
 0x14b   : >> { %v4371_v17 = vpop.eup %4370  ;;  %v1864_v7 = vmul.f32 %v5970_v26, %v5955_v62  ;;  %v1865_v36 = vmul.f32 %v5973_v11, %v5958_v2  ;;  %v1866_v15 = vmul.f32 %v5976_v32, %v5961_v5  ;;  %v1867_v61 = vmul.f32 %v5979_v63, %v5964_v56 }
 0x14c   : >> { %v1439_v60 = vmul.f32 %v5614_v0, %v1396_v33  ;;  %v6001_v44 = vmul.f32 %v1514_v52, %v955_v50  ;;  %v1812_v59 = vmul.f32 %v4369_v53, %v1811_v55  ;;  %v1821_v49 = vmul.f32 %v4371_v17, %v5919_v40  ;;  %v6015_v50 = vld [vmem:[%s4690_s23 + $0xc8] sm:$0xff] }
 0x14d   : >> { %v1515_v8 = vsub.f32 1.0, %v6931_v35  ;;  %v1870_v58 = vmul.f32 %v5985_v38, %v5967_v51  ;;  %v1871_v25 = vmul.f32 %v5988_v6, %v5982_v3  ;;  %v3552_v13 = vmul.f32 10000.0, %v3550_v18  ;;  %v6032_v18 = vld [vmem:[%s4690_s23 + $0xe0] sm:$0xff] }
 0x14e   : >> { %6930 = vst [vmem:[#allocation35_spill] sm:$0xff] %v6001_v44  ;;  %v1813_v30 = vmul.f32 0.5, %v1812_v59  ;;  %vm1816_vm5 = vweird.f32 %v5905_v10  ;;  %vm1817_vm6 = vweird.f32 %v4369_v53  ;;  %v1822_v0 = vmul.f32 %v4371_v17, %v1821_v49  ;;  %v6038_v59 = vld [vmem:[%s4690_s23 + $0xe8] sm:$0xff]  ;;  %v4187_v44 = vld [vmem:[%s4707_s9 + $0x540] sm:$0xff]  }
 0x14f   : >> { %v1868_v33 = vadd.f32 %v1866_v15, %v1864_v7  ;;  %v1869_v52 = vadd.f32 %v1867_v61, %v1865_v36  ;;  %v3553_v29 = vmul.f32 10000.0, %v3551_v39  ;;  %v2086_v34 = vsub.f32 1.0, %v6006_v1  ;;  %vm1818_vm7 = vmor %vm1816_vm5, %vm1817_vm6 }
 0x150   : >> { %v1814_v28 = vsub.f32 1.5, %v1813_v30  ;;  %v1823_v23 = vmul.f32 0.5, %v1822_v0  ;;  %vm1826_vm8 = vweird.f32 %v5919_v40  ;;  %vm1827_vm4 = vweird.f32 %v4371_v17 }
 0x151   : >> { %v6020_v9 = vadd.f32 %v6932_v21, %v1432_v41  ;;  %v6023_v20 = vadd.f32 %v1438_v48, %v6932_v21  ;;  %v6027_v55 = vadd.f32 %v6933_v19, %v5439_v45  ;;  %v2087_v7 = vsub.f32 1.0, %v6015_v50  ;;  %v6936_v48 = vld [vmem:[#allocation32_spill] sm:$0xff]  ;;  %vm1828_vm9 = vmor %vm1826_vm8, %vm1827_vm4 }
 0x152   : >> { %v6035_v36 = vmul.f32 %v1515_v8, %v956_v27  ;;  %v1815_v15 = vmul.f32 %v4369_v53, %v1814_v28  ;;  %v1824_v41 = vsub.f32 1.5, %v1823_v23  ;;  %v2015_v61 = vmul.f32 1.442695, %v3552_v13  ;;  %v4178_v27 = vld [vmem:[%s4707_s9 + $0x510] sm:$0xff]   ;;  %v4179_v28 = vld [vmem:[%s4707_s9 + $0x5a0] sm:$0xff]  }
 0x153   : >> { %6934 = vst [vmem:[#allocation36_spill] sm:$0xff] %v6027_v55  ;;  %v6041_v49 = vadd.f32 %v6936_v48, %v1433_v4  ;;  %v6044_v45 = vadd.f32 %v1439_v60, %v6936_v48  ;;  %v6048_v10 = vadd.f32 %v1870_v58, %v1868_v33  ;;  %v6050_v39 = vadd.f32 %v1871_v25, %v1869_v52 }
 0x154   : >> { %6935 = vst [vmem:[#allocation38_spill] sm:$0xff] %v6035_v36  ;;  %v1819_v35 = vsel %vm1818_vm7, %v4369_v53, %v1815_v15  ;;  %v1825_v8 = vmul.f32 %v4371_v17, %v1824_v41  ;;  %v2017_v30 = vmul.f32 1.442695, %v3553_v29  ;;  %v6054_v13 = vsub.f32 %v2086_v34, %v6032_v18  ;;  %v4175_v15 = vld [vmem:[%s4707_s9 + $0x3e0] sm:$0xff]  }
 0x155   : >> { %v1830_v4 = vmul.f32 %v1819_v35, %v5837_v12  ;;  %v1832_v60 = vmul.f32 %v1819_v35, %v5841_v57  ;;  %v1834_v0 = vmul.f32 %v1819_v35, %v5861_v14  ;;  %v6060_v40 = vsub.f32 %v2087_v7, %v6038_v59 }
 0x156   : >> { %v1829_v58 = vsel %vm1828_vm9, %v4371_v17, %v1825_v8  ;;  %4372 = vpow2.f32 %v2015_v61  ;;  %v3992_v25 = vunpack.c.l.bf16 %v4178_v27  ;;  %v3993_v53 = vunpack.c.h.bf16 %v4178_v27  ;;  %v6081_v27 = vld [vmem:[%s4707_s9 + $0x520] sm:$0xff]  }
 0x157   : >> { %v1831_v33 = vmul.f32 %v1829_v58, %v5848_v47  ;;  %v1833_v52 = vmul.f32 %v1829_v58, %v5850_v37  ;;  %v1835_v29 = vmul.f32 %v1829_v58, %v5875_v31  ;;  %v1836_v12 = vmul.f32 %v1830_v4, %v5955_v62  ;;  %v4180_v62 = vld [vmem:[%s4707_s9 + $0x630] sm:$0xff]  }
 0x158   : >> { %v1838_v57 = vmul.f32 %v1832_v60, %v5961_v5  ;;  %v1842_v14 = vmul.f32 %v1834_v0, %v5967_v51  ;;  %v1854_v34 = vmul.f32 %v1830_v4, %v5970_v26  ;;  %v1856_v17 = vmul.f32 %v1832_v60, %v5976_v32  ;;  %v4176_v60 = vld [vmem:[%s4707_s9 + $0x470] sm:$0xff]  }
 0x159   : >> { %v1837_v23 = vmul.f32 %v1831_v33, %v5958_v2  ;;  %v1839_v47 = vmul.f32 %v1833_v52, %v5964_v56  ;;  %v1843_v37 = vmul.f32 %v1835_v29, %v5982_v3  ;;  %v1855_v31 = vmul.f32 %v1831_v33, %v5973_v11  ;;  %v4177_v33 = vld [vmem:[%s4707_s9 + $0x500] sm:$0xff]  }
 0x15a   : >> { %v1840_v21 = vadd.f32 %v1838_v57, %v1836_v12  ;;  %v1857_v5 = vmul.f32 %v1833_v52, %v5979_v63  ;;  %v1858_v7 = vadd.f32 %v1856_v17, %v1854_v34  ;;  %v1860_v51 = vmul.f32 %v1834_v0, %v5985_v38 }
 0x15b   : >> { %v1841_v26 = vadd.f32 %v1839_v47, %v1837_v23  ;;  %v1861_v32 = vmul.f32 %v1835_v29, %v5988_v6  ;;  %v3996_v2 = vunpack.c.l.bf16 %v4179_v28  ;;  %v3997_v41 = vunpack.c.h.bf16 %v4179_v28  ;;  %v6099_v23 = vld [vmem:[%s4690_s23 + $0x80] sm:$0xff] }
 0x15c   : >> { %v4373_v56 = vpop.eup %4372  ;;  %v1844_v3 = vadd.f32 %v1842_v14, %v1840_v21  ;;  %v1859_v61 = vadd.f32 %v1857_v5, %v1855_v31  ;;  %v1862_v11 = vadd.f32 %v1860_v51, %v1858_v7  ;;  %v4000_v48 = vunpack.c.l.bf16 %v4180_v62  ;;  %v6105_v7 = vld [vmem:[%s4690_s23 + $0xa0] sm:$0xff] }
 0x15d   : >> { %v1845_v35 = vadd.f32 %v1843_v37, %v1841_v26  ;;  %4374 = vpow2.f32 %v2017_v30  ;;  %v2097_v63 = vmul.f32 %v3992_v25, %v6006_v1  ;;  %v4001_v38 = vunpack.c.h.bf16 %v4180_v62 }
 0x15e   : >> { %v1863_v8 = vadd.f32 %v1861_v32, %v1859_v61  ;;  %v1874_v4 = vmul.f32 2.0, %v1844_v3  ;;  %v3980_v6 = vunpack.c.l.bf16 %v4175_v15  ;;  %v6086_v0 = vmul.f32 %v3993_v53, %v6015_v50 }
 0x15f   : >> { %v1875_v58 = vmul.f32 2.0, %v1845_v35  ;;  %v2106_v52 = vmul.f32 %v3996_v2, %v6032_v18  ;;  %v6091_v29 = vmul.f32 %v3997_v41, %v6038_v59  ;;  %v4004_v30 = vunpack.c.l.bf16 %v6081_v27  ;;  %v6114_v2 = vld [vmem:[%s4690_s23 + $0x88] sm:$0xff] }
 0x160   : >> { %vm1848_vm10 = vcmp.gt.f32.partialorder %v1844_v3, 0.0  ;;  %v1876_v25 = vmul.f32 %v1874_v4, %v1862_v11  ;;  %v3981_v12 = vunpack.c.h.bf16 %v4175_v15  ;;  %v6095_v57 = vmul.f32 %v4000_v48, %v6054_v13 }
 0x161   : >> { %vm1849_vm11 = vcmp.gt.f32.partialorder %v1845_v35, 0.0  ;;  %v1877_v53 = vmul.f32 %v1875_v58, %v1863_v8  ;;  %v3984_v14 = vunpack.c.l.bf16 %v4176_v60  ;;  %v3985_v34 = vunpack.c.h.bf16 %v4176_v60 }
 0x162   : >> { %v1846_v17 = vmax.f32 %v1844_v3, 0.0  ;;  %v1878_v28 = vsub.f32 %v1876_v25, %v6048_v10  ;;  %v1965_v47 = vmul.f32 %v6099_v23, %v3980_v6  ;;  %v3988_v37 = vunpack.c.l.bf16 %v4177_v33  ;;  %v6118_v3 = vld [vmem:[%s4707_s9 + $0x5b0] sm:$0xff]  }
 0x163   : >> { %v4375_v31 = vpop.eup %4374  ;;  %v6937_v62 = vmov 0.0   ;;  %v1879_v5 = vsub.f32 %v1877_v53, %v6050_v39  ;;  %v1974_v51 = vmul.f32 %v6105_v7, %v3984_v14  ;;  %v6109_v26 = vmul.f32 %v4001_v38, %v6060_v40  ;;  %v6121_v39 = vld [vmem:[%s4690_s23 + $0xa8] sm:$0xff] }
 0x164   : >> { %v3520_v21 = vsel %vm1848_vm10, 1.0, %v6937_v62  ;;  %v1847_v32 = vmax.f32 %v1845_v35, 0.0  ;;  %v3521_v10 = vsel %vm1849_vm11, 1.0, %v6937_v62  ;;  %v1880_v15 = vmax.f32 %v1878_v28, 0.0 }
 0x165   : >> { %v1966_v41 = vmul.f32 %v6114_v2, %v3981_v12  ;;  %v1881_v61 = vmax.f32 %v1879_v5, 0.0  ;;  %v1975_v11 = vmul.f32 %v6121_v39, %v3985_v34  ;;  %v3989_v48 = vunpack.c.h.bf16 %v4177_v33 }
 0x166   : >> { %v2019_v8 = vadd.f32 1.0, %v4373_v56  ;;  %v1882_v38 = vmul.f32 %v3520_v21, %v1880_v15  ;;  %v1976_v4 = vadd.f32 %v1974_v51, %v1965_v47  ;;  %v1985_v6 = vmul.f32 %v3988_v37, %v5513_v54  ;;  %v6939_v51 = vld [vmem:[#allocation29_spill] sm:$0xff] }
 0x167   : >> { %v1989_v35 = vmul.f32 0.3, %v1846_v17  ;;  %v1883_v60 = vmul.f32 %v3521_v10, %v1881_v61  ;;  %v6125_v58 = vadd.f32 %v2106_v52, %v2097_v63  ;;  %v4005_v25 = vunpack.c.h.bf16 %v6081_v27  ;;  %v6940_v10 = vld [vmem:[#allocation25_spill] sm:$0xff] }
 0x168   : >> { %v4008_v12 = vunpack.c.l.bf16 %v6118_v3  ;;  %v1884_v53 = vmul.f32 %v1882_v38, %v1882_v38  ;;  %v6129_v14 = vadd.f32 1.0, %v4375_v31  ;;  %4376 = vrcp.f32 %v2019_v8 }
 0x169   : >> { %v6132_v34 = vmul.f32 %v4004_v30, %v6006_v1  ;;  %v1885_v56 = vmul.f32 %v1883_v60, %v1883_v60  ;;  %v1977_v33 = vadd.f32 %v1975_v11, %v1966_v41  ;;  %v1986_v28 = vmul.f32 %v3989_v48, %v5516_v16  ;;  %v6942_v41 = vld [vmem:[#allocation26_spill] sm:$0xff] }
 0x16a   : >> { %v1990_v47 = vmul.f32 0.3, %v1847_v32  ;;  %v1886_v17 = vmul.f32 %v1884_v53, %v1884_v53  ;;  %v1987_v37 = vadd.f32 %v1985_v6, %v1976_v4  ;;  %v6135_v63 = vadd.f32 0.5, %v1989_v35  ;;  %v6941_v32 = vld [vmem:[#allocation30_spill] sm:$0xff] }
 0x16b   : >> { %4378 = vrcp.f32 %v6129_v14  ;;  %v1887_v27 = vmul.f32 %v1885_v56, %v1885_v56  ;;  %v6139_v52 = vmul.f32 %v4005_v25, %v6015_v50  ;;  %v4009_v31 = vunpack.c.h.bf16 %v6118_v3 }
 0x16c   : >> { %6938 = vst [vmem:[#allocation41_spill] sm:$0xff] %v6135_v63  ;;  %v2137_v30 = vmul.f32 %v4008_v12, %v6032_v18  ;;  %v1888_v21 = vmul.f32 %v1886_v17, %v1886_v17  ;;  %v2030_v5 = vand.u32 2147483647, %v2019_v8  ;;  %v2051_v15 = vsub.f32 %v6940_v10, %v6939_v51 }
 0x16d   : >> { %v2052_v61 = vsub.f32 %v6942_v41, %v6941_v32  ;;  %v1889_v11 = vmul.f32 %v1887_v27, %v1887_v27  ;;  %v1988_v48 = vadd.f32 %v1986_v28, %v1977_v33  ;;  %v6147_v38 = vadd.f32 0.5, %v1990_v47 }
 0x16e   : >> { %vm2026_vm12 = vweird.f32 %v2019_v8  ;;  %v4377_v4 = vpop.eup %4376  ;;  %v1890_v6 = vmul.f32 %v1888_v21, %v1888_v21  ;;  %v2003_v35 = vmul.f32 %v6135_v63, %v1987_v37  ;;  %v2053_v3 = vmul.f32 10000.0, %v2051_v15 }
 0x16f   : >> { %6943 = vst [vmem:[#allocation39_spill] sm:$0xff] %v6147_v38  ;;  %v2054_v60 = vmul.f32 10000.0, %v2052_v61  ;;  %v1891_v25 = vmul.f32 %v1889_v11, %v1889_v11  ;;  %v2022_v12 = vmul.f32 %v4377_v4, %v2019_v8  ;;  %v2032_v53 = vand.u32 2147483648, %v2019_v8  ;;  %v4183_v61 = vld [vmem:[%s4707_s9 + $0x640] sm:$0xff]  }
 0x170   : >> { %vm2041_vm13 = vweird.f32 %v6129_v14  ;;  %v1892_v17 = vmul.f32 %v1890_v6, %v1890_v6  ;;  %vm6151_vm14 = vcmp.eq.f32.partialorder %v2030_v5, 8.507059e+37  ;;  %v2055_v33 = vmul.f32 1.442695, %v2053_v3 }
 0x171   : >> { %v4379_v56 = vpop.eup %4378  ;;  %v2057_v28 = vmul.f32 1.442695, %v2054_v60  ;;  %v1893_v47 = vmul.f32 %v1891_v25, %v1891_v25  ;;  %v2023_v21 = vsub.f32 1.0, %v2022_v12  ;;  %vm2027_vm15 = vweird.f32 %v4377_v4 }
 0x172   : >> { %v2037_v37 = vmul.f32 %v4379_v56, %v6129_v14  ;;  %v1894_v10 = vmul.f32 %v1892_v17, %v1892_v17  ;;  %v2045_v15 = vand.u32 2147483647, %v6129_v14  ;;  %v2047_v41 = vand.u32 2147483648, %v6129_v14  ;;  %vm6162_vm0 = vmor %vm2026_vm12, %vm2027_vm15  ;;  %v4184_v17 = vld [vmem:[%s4707_s9 + $0x530] sm:$0xff]  }
 0x173   : >> { %4380 = vpow2.f32 %v2055_v33  ;;  %v1895_v11 = vmul.f32 %v1893_v47, %v1893_v47  ;;  %v2024_v5 = vmul.f32 %v4377_v4, %v2023_v21  ;;  %v2033_v25 = vor.u32 1.1754944e-38, %v2032_v53  ;;  %v4185_v53 = vld [vmem:[%s4707_s9 + $0x5c0] sm:$0xff]  }
 0x174   : >> { %v2038_v6 = vsub.f32 1.0, %v2037_v37  ;;  %4382 = vpow2.f32 %v2057_v28  ;;  %v6159_v3 = vmul.f32 0.2, %v1894_v10  ;;  %vm2042_vm1 = vweird.f32 %v4379_v56 }
 0x175   : >> { %v2138_v12 = vmul.f32 %v4009_v31, %v6038_v59  ;;  %v2025_v36 = vadd.f32 %v4377_v4, %v2024_v5  ;;  %v4012_v32 = vunpack.c.l.bf16 %v4183_v61  ;;  %v4013_v47 = vunpack.c.h.bf16 %v4183_v61  ;;  %vm6182_vm3 = vmor %vm2041_vm13, %vm2042_vm1 }
 0x176   : >> { %6946 = vst [vmem:[#allocation40_spill] sm:$0xff] %v6159_v3  ;;  %v2039_v33 = vmul.f32 %v4379_v56, %v2038_v6  ;;  %v6168_v21 = vmul.f32 0.2, %v1895_v11  ;;  %v2004_v28 = vmul.f32 %v6147_v38, %v1988_v48  ;;  %vm6171_vm2 = vcmp.eq.f32.partialorder %v2045_v15, 8.507059e+37 }
 0x177   : >> { %v2109_v8 = vadd.f32 %v6091_v29, %v6086_v0  ;;  %v2029_v31 = vsel %vm6162_vm0, %v4377_v4, %v2025_v36  ;;  %v2048_v61 = vor.u32 1.1754944e-38, %v2047_v41  ;;  %v4016_v48 = vunpack.c.l.bf16 %v4184_v17 }
 0x178   : >> { %6949 = vst [vmem:[#allocation43_spill] sm:$0xff] %v6168_v21  ;;  %v4017_v15 = vunpack.c.h.bf16 %v4184_v17  ;;  %v2005_v5 = vadd.f32 %v2003_v35, %v6159_v3  ;;  %v6189_v0 = vsel %vm6151_vm14, %v2033_v25, %v2029_v31  ;;  %v2040_v29 = vadd.f32 %v4379_v56, %v2039_v33  ;;  %v4186_v17 = vld [vmem:[%s4707_s9 + $0x650] sm:$0xff]  }
 0x179   : >> { %v4381_v11 = vpop.eup %4380  ;;  %6954 = vst [vmem:[#allocation42_spill] sm:$0xff] %v6189_v0  ;;  %v2139_v36 = vadd.f32 %v2137_v30, %v6132_v34  ;;  %v2140_v14 = vadd.f32 %v2138_v12, %v6139_v52  ;;  %v2148_v6 = vmul.f32 %v4012_v32, %v6054_v13  ;;  %v2149_v41 = vmul.f32 %v4013_v47, %v6060_v40  ;;  %v4169_v34 = vld [vmem:[%s4707_s9 + $0x3c0] sm:$0xff]  }
 0x17a   : >> { %v4383_v4 = vpop.eup %4382  ;;  %v4020_v60 = vunpack.c.l.bf16 %v4185_v53  ;;  %v2006_v51 = vadd.f32 %v2004_v28, %v6168_v21  ;;  %v2044_v35 = vsel %vm6182_vm3, %v4379_v56, %v2040_v29  ;;  %v6200_v27 = vmul.f32 %v4381_v11, %v6189_v0 }
 0x17b   : >> { %v4021_v25 = vunpack.c.h.bf16 %v4185_v53  ;;  %v6205_v52 = vsel %vm6171_vm2, %v2048_v61, %v2044_v35  ;;  %v2119_v30 = vadd.f32 %v6095_v57, %v6125_v58  ;;  %v2159_v32 = vmul.f32 %v4016_v48, %v6006_v1  ;;  %v4170_v53 = vld [vmem:[%s4707_s9 + $0x450] sm:$0xff]  }
 0x17c   : >> { %6955 = vst [vmem:[#allocation44_spill] sm:$0xff] %v6200_v27  ;;  %v2160_v12 = vmul.f32 %v4017_v15, %v6015_v50  ;;  %v6212_v33 = vmul.f32 %v4383_v4, %v6205_v52  ;;  %v2071_v56 = vmul.f32 %v6200_v27, %v2005_v5  ;;  %v2120_v47 = vadd.f32 %v6109_v26, %v2109_v8  ;;  %v6958_v57 = vld [vmem:[#allocation37_spill] sm:$0xff]  ;;  %v6960_v5 = vld [vmem:[#allocation23_spill] sm:$0xff] }
 0x17d   : >> { %6956 = vst [vmem:[#allocation33_spill] sm:$0xff] %v6205_v52  ;;  %v4024_v28 = vunpack.c.l.bf16 %v4186_v17  ;;  %v2150_v31 = vadd.f32 %v2148_v6, %v2139_v36  ;;  %v2168_v37 = vmul.f32 %v4020_v60, %v6032_v18  ;;  %v2169_v10 = vmul.f32 %v4021_v25, %v6038_v59  ;;  %v6962_v60 = vld [vmem:[#allocation24_spill] sm:$0xff]  ;;  %v4188_v27 = vld [vmem:[%s4707_s9 + $0x5d0] sm:$0xff]  }
 0x17e   : >> { %6957 = vst [vmem:[#allocation31_spill] sm:$0xff] %v6212_v33  ;;  %v4025_v61 = vunpack.c.h.bf16 %v4186_v17  ;;  %v6221_v58 = vadd.f32 %v6958_v57, %v5493_v46  ;;  %v3956_v48 = vunpack.c.l.bf16 %v4169_v34  ;;  %v2072_v15 = vmul.f32 %v6212_v33, %v2006_v51 }
 0x17f   : >> { %v2151_v11 = vadd.f32 %v2149_v41, %v2140_v14  ;;  %v3957_v29 = vunpack.c.h.bf16 %v4169_v34  ;;  %v6225_v4 = vadd.f32 %v2071_v56, %v6960_v5  ;;  %v2170_v26 = vadd.f32 %v2168_v37, %v2159_v32 }
 0x180   : >> { %6959 = vst [vmem:[#allocation34_spill] sm:$0xff] %v6221_v58  ;;  %v2171_v8 = vadd.f32 %v2169_v10, %v2160_v12  ;;  %v3960_v36 = vunpack.c.l.bf16 %v4170_v53  ;;  %v3961_v6 = vunpack.c.h.bf16 %v4170_v53  ;;  %v6228_v35 = vadd.f32 %v2072_v15, %v6962_v60 }
 0x181   : >> { %6961 = vst [vmem:[#allocation32_spill] sm:$0xff] %v6225_v4  ;;  %v2179_v17 = vmul.f32 %v4024_v28, %v6054_v13  ;;  %v2180_v46 = vmul.f32 %v4025_v61, %v6060_v40  ;;  %v6232_v25 = vsub.f32 0.0, %v2119_v30  ;;  %v6234_v51 = vsub.f32 0.0, %v2120_v47  ;;  %v4172_v28 = vld [vmem:[%s4707_s9 + $0x3d0] sm:$0xff]  }
 0x182   : >> { %6963 = vst [vmem:[#allocation25_spill] sm:$0xff] %v6228_v35  ;;  %v6236_v14 = vsub.f32 1.0, %v2150_v31  ;;  %v6238_v34 = vsub.f32 1.0, %v2151_v11  ;;  %v6240_v32 = vsub.f32 0.0, %v2150_v31  ;;  %v6242_v12 = vsub.f32 0.0, %v2151_v11 }
 0x183   : >> { %6964 = vst [vmem:[#allocation26_spill] sm:$0xff] %v6232_v25  ;;  %v2181_v41 = vadd.f32 %v2179_v17, %v2170_v26  ;;  %v2182_v56 = vadd.f32 %v2180_v46, %v2171_v8  ;;  %v2193_v53 = vmul.f32 %v6232_v25, %v6232_v25  ;;  %v2194_v30 = vmul.f32 %v6234_v51, %v6234_v51 }
 0x184   : >> { %6965 = vst [vmem:[#allocation37_spill] sm:$0xff] %v6234_v51  ;;  %v2195_v47 = vmul.f32 %v6236_v14, %v6236_v14  ;;  %v2196_v31 = vmul.f32 %v6238_v34, %v6238_v34  ;;  %v2225_v61 = vmul.f32 %v6240_v32, %v6240_v32  ;;  %v2226_v26 = vmul.f32 %v6242_v12, %v6242_v12 }
 0x185   : >> { %6966 = vst [vmem:[#allocation23_spill] sm:$0xff] %v6236_v14  ;;  %v6251_v37 = vsub.f32 0.0, %v2181_v41  ;;  %v6253_v10 = vsub.f32 3.0, %v2181_v41  ;;  %v6259_v15 = vsub.f32 0.0, %v2182_v56  ;;  %v6261_v11 = vsub.f32 3.0, %v2182_v56  ;;  %v4171_v41 = vld [vmem:[%s4707_s9 + $0x4e0] sm:$0xff]  }
 0x186   : >> { %6967 = vst [vmem:[#allocation24_spill] sm:$0xff] %v6238_v34  ;;  %v2197_v5 = vadd.f32 %v2195_v47, %v2193_v53  ;;  %v2198_v8 = vadd.f32 %v2196_v31, %v2194_v30  ;;  %v2227_v17 = vadd.f32 %v2225_v61, %v2193_v53  ;;  %v3968_v35 = vunpack.c.l.bf16 %v4172_v28 }
 0x187   : >> { %6968 = vst [vmem:[#allocation49_spill] sm:$0xff] %v6240_v32  ;;  %v2199_v60 = vmul.f32 %v6251_v37, %v6251_v37  ;;  %v2229_v46 = vmul.f32 %v6253_v10, %v6253_v10  ;;  %v2200_v56 = vmul.f32 %v6259_v15, %v6259_v15  ;;  %v2228_v4 = vadd.f32 %v2226_v26, %v2194_v30 }
 0x188   : >> { %6969 = vst [vmem:[#allocation50_spill] sm:$0xff] %v6242_v12  ;;  %v2230_v47 = vmul.f32 %v6261_v11, %v6261_v11  ;;  %v1903_v31 = vmul.f32 %v6099_v23, %v3956_v48  ;;  %v1912_v33 = vmul.f32 %v6105_v7, %v3960_v36  ;;  %v1904_v53 = vmul.f32 %v6114_v2, %v3957_v29  ;;  %v4195_v12 = vld [vmem:[%s4707_s9 + $0x680] sm:$0xff]  }
 0x189   : >> { %6970 = vst [vmem:[#allocation51_spill] sm:$0xff] %v6251_v37  ;;  %v2201_v58 = vadd.f32 %v2199_v60, %v2197_v5  ;;  %v2231_v52 = vadd.f32 %v2229_v46, %v2227_v17  ;;  %v1913_v61 = vmul.f32 %v6121_v39, %v3961_v6  ;;  %v2202_v21 = vadd.f32 %v2200_v56, %v2198_v8  ;;  %v4191_v5 = vld [vmem:[%s4707_s9 + $0x5e0] sm:$0xff]  }
 0x18a   : >> { %6971 = vst [vmem:[#allocation52_spill] sm:$0xff] %v6253_v10  ;;  %v2232_v62 = vadd.f32 %v2230_v47, %v2228_v4  ;;  %v3964_v30 = vunpack.c.l.bf16 %v4171_v41  ;;  %v3969_v26 = vunpack.c.h.bf16 %v4172_v28  ;;  %v6286_v48 = vmul.f32 %v6933_v19, %v6020_v9  ;;  %v6310_v17 = vld [vmem:[%s4707_s9 + $0x460] sm:$0xff]   ;;  %v4192_v47 = vld [vmem:[%s4707_s9 + $0x670] sm:$0xff]  }
 0x18b   : >> { %6972 = vst [vmem:[#allocation53_spill] sm:$0xff] %v6259_v15  ;;  %v6280_v55 = vmax.f32 %v2201_v58, 1e-12  ;;  %v3965_v36 = vunpack.c.h.bf16 %v4171_v41  ;;  %v6288_v29 = vmax.f32 %v2202_v21, 1e-12  ;;  %v6292_v4 = vadd.f32 %v1912_v33, %v1903_v31  ;;  %v4189_v46 = vld [vmem:[%s4707_s9 + $0x660] sm:$0xff]  }
 0x18c   : >> { %6973 = vst [vmem:[#allocation54_spill] sm:$0xff] %v6261_v11  ;;  %v6282_v11 = vmax.f32 %v2231_v52, 1e-12  ;;  %v6290_v6 = vmax.f32 %v2232_v62, 1e-12  ;;  %v4028_v58 = vunpack.c.l.bf16 %v4187_v44  ;;  %v4032_v28 = vunpack.c.l.bf16 %v4188_v27  ;;  %v4190_v52 = vld [vmem:[%s4707_s9 + $0x550] sm:$0xff]  }
 0x18d   : >> { %6974 = vst [vmem:[#allocation55_spill] sm:$0xff] %v6286_v48  ;;  %4384 = vrsqrt.f32 %v6280_v55  ;;  %v6297_v8 = vadd.f32 %v1913_v61, %v1904_v53  ;;  %v4029_v9 = vunpack.c.h.bf16 %v4187_v44  ;;  %v4033_v21 = vunpack.c.h.bf16 %v4188_v27  ;;  %v6318_v44 = vld [vmem:[%s4707_s9 + $0x4f0] sm:$0xff]   ;;  %v4193_v53 = vld [vmem:[%s4707_s9 + $0x560] sm:$0xff]  }
 0x18e   : >> { %4386 = vrsqrt.f32 %v6288_v29  ;;  %v6301_v62 = vmul.f32 %v3964_v30, %v5513_v54  ;;  %v6304_v33 = vmul.f32 %v6099_v23, %v3968_v35  ;;  %v6307_v60 = vmul.f32 %v6114_v2, %v3969_v26 }
 0x18f   : >> { %4388 = vrsqrt.f32 %v6282_v11  ;;  %v6315_v41 = vmul.f32 %v3965_v36, %v5516_v16  ;;  %v4040_v27 = vunpack.c.l.bf16 %v4190_v52  ;;  %v4044_v56 = vunpack.c.l.bf16 %v4191_v5 }
 0x190   : >> { %4390 = vrsqrt.f32 %v6290_v6  ;;  %v2274_v23 = vmul.f32 %v4028_v58, %v6006_v1  ;;  %v2283_v2 = vmul.f32 %v4032_v28, %v6032_v18  ;;  %v4041_v35 = vunpack.c.h.bf16 %v4190_v52 }
 0x191   : >> { %v4045_v31 = vunpack.c.h.bf16 %v4191_v5  ;;  %v3972_v61 = vunpack.c.l.bf16 %v6310_v17  ;;  %v2275_v30 = vmul.f32 %v4029_v9, %v6015_v50  ;;  %v2284_v26 = vmul.f32 %v4033_v21, %v6038_v59 }
 0x192   : >> { %v4036_v36 = vunpack.c.l.bf16 %v4189_v46  ;;  %v3973_v15 = vunpack.c.h.bf16 %v6310_v17  ;;  %v3976_v37 = vunpack.c.l.bf16 %v6318_v44  ;;  %v4037_v58 = vunpack.c.h.bf16 %v4189_v46 }
 0x193   : >> { %v6328_v10 = vpop.eup %4384  ;;  %v4048_v0 = vunpack.c.l.bf16 %v4192_v47  ;;  %v2305_v5 = vmul.f32 %v4040_v27, %v6006_v1  ;;  %v2314_v9 = vmul.f32 %v4044_v56, %v6032_v18  ;;  %v4052_v21 = vunpack.c.l.bf16 %v4193_v53 }
 0x194   : >> { %v6332_v28 = vpop.eup %4386  ;;  %v2206_v52 = vmul.f32 %v6328_v10, %v6280_v55  ;;  %v2285_v38 = vadd.f32 %v2283_v2, %v2274_v23  ;;  %v2306_v17 = vmul.f32 %v4041_v35, %v6015_v50  ;;  %v2315_v22 = vmul.f32 %v4045_v31, %v6038_v59 }
 0x195   : >> { %v6338_v3 = vpop.eup %4388  ;;  %v4049_v46 = vunpack.c.h.bf16 %v4192_v47  ;;  %v2216_v48 = vmul.f32 %v6332_v28, %v6288_v29  ;;  %v2286_v24 = vadd.f32 %v2284_v26, %v2275_v30  ;;  %v2294_v56 = vmul.f32 %v4036_v36, %v6054_v13 }
 0x196   : >> { %v6343_v43 = vpop.eup %4390  ;;  %v2236_v27 = vmul.f32 %v6338_v3, %v6282_v11  ;;  %v2295_v2 = vmul.f32 %v4037_v58, %v6060_v40  ;;  %v2325_v47 = vmul.f32 %v4048_v0, %v6054_v13  ;;  %v4053_v35 = vunpack.c.h.bf16 %v4193_v53 }
 0x197   : >> { %v2246_v23 = vmul.f32 %v6343_v43, %v6290_v6  ;;  %v2207_v31 = vmul.f32 %v6328_v10, %v2206_v52  ;;  %v2316_v32 = vadd.f32 %v2314_v9, %v2305_v5  ;;  %v2336_v34 = vmul.f32 %v4052_v21, %v6006_v1 }
 0x198   : >> { %v4056_v14 = vunpack.c.l.bf16 %v4194_v42  ;;  %v2317_v51 = vadd.f32 %v2315_v22, %v2306_v17  ;;  %v2326_v30 = vmul.f32 %v4049_v46, %v6060_v40  ;;  %v4057_v26 = vunpack.c.h.bf16 %v4194_v42 }
 0x199   : >> { %v4060_v36 = vunpack.c.l.bf16 %v4195_v12  ;;  %v2217_v25 = vmul.f32 %v6332_v28, %v2216_v48  ;;  %v2237_v63 = vmul.f32 %v6338_v3, %v2236_v27  ;;  %v2247_v58 = vmul.f32 %v6343_v43, %v2246_v23 }
 0x19a   : >> { %v2345_v0 = vmul.f32 %v4056_v14, %v6032_v18  ;;  %v2337_v53 = vmul.f32 %v4053_v35, %v6015_v50  ;;  %v2346_v52 = vmul.f32 %v4057_v26, %v6038_v59  ;;  %v4061_v5 = vunpack.c.h.bf16 %v4195_v12 }
 0x19b   : >> { %v2356_v9 = vmul.f32 %v4060_v36, %v6054_v13  ;;  %v1943_v22 = vmul.f32 %v6105_v7, %v3972_v61  ;;  %v3977_v42 = vunpack.c.h.bf16 %v6318_v44  ;;  %v2208_v21 = vmul.f32 0.5, %v2207_v31 }
 0x19c   : >> { %v2347_v17 = vadd.f32 %v2345_v0, %v2336_v34  ;;  %v1944_v48 = vmul.f32 %v6121_v39, %v3973_v15  ;;  %v1954_v46 = vmul.f32 %v3976_v37, %v5513_v54  ;;  %v6369_v27 = vadd.f32 %v2294_v56, %v2285_v38 }
 0x19d   : >> { %v6371_v14 = vadd.f32 %v2295_v2, %v2286_v24  ;;  %v2218_v23 = vmul.f32 0.5, %v2217_v25  ;;  %v2238_v35 = vmul.f32 0.5, %v2237_v63  ;;  %v2248_v26 = vmul.f32 0.5, %v2247_v58 }
 0x19e   : >> { %v6373_v12 = vadd.f32 %v2325_v47, %v2316_v32  ;;  %v6375_v36 = vadd.f32 %v2326_v30, %v2317_v51  ;;  %v2348_v7 = vadd.f32 %v2346_v52, %v2337_v53  ;;  %v2357_v44 = vmul.f32 %v4061_v5, %v6060_v40  ;;  %v3644_v32 = vld [vmem:[%s4848_s20 + $0xe0] sm:$0xff] }
 0x19f   : >> { %v6378_v34 = vadd.f32 %v2356_v9, %v2347_v17  ;;  %v1945_v39 = vadd.f32 %v1943_v22, %v6304_v33  ;;  %v2209_v54 = vsub.f32 1.5, %v2208_v21  ;;  %vm2211_vm5 = vweird.f32 %v6280_v55  ;;  %v3645_v9 = vld [vmem:[%s4848_s20 + $0xe8] sm:$0xff]  ;;  %v6993_v22 = vld [vmem:[#allocation39_spill] sm:$0xff] }
 0x1a0   : >> { %vm2241_vm6 = vweird.f32 %v6282_v11  ;;  %vm2212_vm8 = vweird.f32 %v6328_v10  ;;  %vm2221_vm4 = vweird.f32 %v6288_v29  ;;  %v2360_v24 = vmul.f32 %v6369_v27, %v6369_v27 }
 0x1a1   : >> { %v2361_v63 = vmul.f32 %v6371_v14, %v6371_v14  ;;  %v2219_v38 = vsub.f32 1.5, %v2218_v23  ;;  %vm2222_vm7 = vweird.f32 %v6332_v28  ;;  %v2239_v25 = vsub.f32 1.5, %v2238_v35  ;;  %vm6407_vm12 = vmor %vm2211_vm5, %vm2212_vm8 }
 0x1a2   : >> { %v2249_v51 = vsub.f32 1.5, %v2248_v26  ;;  %v6391_v37 = vadd.f32 %v2357_v44, %v2348_v7  ;;  %v2362_v15 = vmul.f32 %v6373_v12, %v6373_v12  ;;  %v2363_v33 = vmul.f32 %v6375_v36, %v6375_v36  ;;  %vm6420_vm13 = vmor %vm2221_vm4, %vm2222_vm7  ;;  %v6984_v44 = vld [vmem:[#allocation23_spill] sm:$0xff] }
 0x1a3   : >> { %v2366_v61 = vmul.f32 %v6378_v34, %v6378_v34  ;;  %v2210_v56 = vmul.f32 %v6328_v10, %v2209_v54  ;;  %vm2242_vm9 = vweird.f32 %v6338_v3  ;;  %vm2251_vm10 = vweird.f32 %v6290_v6 }
 0x1a4   : >> { %vm2252_vm11 = vweird.f32 %v6343_v43  ;;  %v2364_v47 = vadd.f32 %v2362_v15, %v2360_v24  ;;  %v2365_v31 = vadd.f32 %v2363_v33, %v2361_v63  ;;  %v2367_v30 = vmul.f32 %v6391_v37, %v6391_v37  ;;  %vm6428_vm14 = vmor %vm2241_vm6, %vm2242_vm9  ;;  %v6988_v15 = vld [vmem:[#allocation45_spill] sm:$0xff]  ;;  %v6989_v33 = vld [vmem:[#allocation55_spill] sm:$0xff] }
 0x1a5   : >> { %v3646_v58 = vmul.f32 10000.0, %v3644_v32  ;;  %v1946_v0 = vadd.f32 %v1944_v48, %v6307_v60  ;;  %v1955_v53 = vmul.f32 %v3977_v42, %v5516_v16  ;;  %v2220_v52 = vmul.f32 %v6332_v28, %v2219_v38  ;;  %vm2253_vm15 = vmor %vm2251_vm10, %vm2252_vm11  ;;  %v6986_v38 = vld [vmem:[#allocation49_spill] sm:$0xff] }
 0x1a6   : >> { %v2240_v5 = vmul.f32 %v6338_v3, %v2239_v25  ;;  %v2250_v16 = vmul.f32 %v6343_v43, %v2249_v51  ;;  %v2368_v60 = vadd.f32 %v2366_v61, %v2364_v47  ;;  %v2369_v42 = vadd.f32 %v2367_v30, %v2365_v31  ;;  %v6987_v51 = vld [vmem:[#allocation50_spill] sm:$0xff]  ;;  %v6992_v30 = vld [vmem:[#allocation48_spill] sm:$0xff] }
 0x1a7   : >> { %v2576_v21 = vmul.f32 1.442695, %v3646_v58  ;;  %v1503_v29 = vmul.f32 %v6958_v57, %v6041_v49  ;;  %v1506_v17 = vmul.f32 %v6933_v19, %v6023_v20  ;;  %v1925_v48 = vadd.f32 %v6301_v62, %v6292_v4  ;;  %v6991_v47 = vld [vmem:[#allocation46_spill] sm:$0xff] }
 0x1a8   : >> { %v1956_v23 = vadd.f32 %v1954_v46, %v1945_v39  ;;  %v2214_v11 = vsel %vm6407_vm12, %v6328_v10, %v2210_v56  ;;  %v6446_v35 = vmax.f32 %v2368_v60, 1e-12  ;;  %v6448_v26 = vmax.f32 %v2369_v42, 1e-12  ;;  %v6981_v46 = vld [vmem:[#allocation41_spill] sm:$0xff]  ;;  %v6990_v56 = vld [vmem:[#allocation47_spill] sm:$0xff] }
 0x1a9   : >> { %v3647_v49 = vmul.f32 10000.0, %v3645_v9  ;;  %v1507_v20 = vmul.f32 %v6958_v57, %v6044_v45  ;;  %v1926_v19 = vadd.f32 %v6315_v41, %v6297_v8  ;;  %v2224_v6 = vsel %vm6420_vm13, %v6332_v28, %v2220_v52  ;;  %v6982_v57 = vld [vmem:[#allocation26_spill] sm:$0xff]  ;;  %v6983_v41 = vld [vmem:[#allocation37_spill] sm:$0xff]  ;;  %v6994_v60 = vld [vmem:[#allocation40_spill] sm:$0xff] }
 0x1aa   : >> { %4392 = vpow2.f32 %v2576_v21  ;;  %v1957_v4 = vadd.f32 %v1955_v53, %v1946_v0  ;;  %v2244_v10 = vsel %vm6428_vm14, %v6338_v3, %v2240_v5  ;;  %v2254_v62 = vsel %vm2253_vm15, %v6343_v43, %v2250_v16  ;;  %v6985_v3 = vld [vmem:[#allocation24_spill] sm:$0xff] }
 0x1ab   : >> { %4394 = vrsqrt.f32 %v6446_v35  ;;  %v1993_v7 = vmul.f32 %v6981_v46, %v1925_v48  ;;  %v1999_v45 = vmul.f32 %v6981_v46, %v1956_v23  ;;  %v6465_v8 = vmul.f32 %v2214_v11, %v6982_v57  ;;  %v6995_v48 = vld [vmem:[#allocation42_spill] sm:$0xff]  ;;  %v6997_v46 = vld [vmem:[#allocation53_spill] sm:$0xff] }
 0x1ac   : >> { %4396 = vrsqrt.f32 %v6448_v26  ;;  %v6469_v28 = vmul.f32 %v2224_v6, %v6983_v41  ;;  %v6472_v39 = vmul.f32 %v2214_v11, %v6984_v44  ;;  %v6475_v54 = vmul.f32 %v2224_v6, %v6985_v3  ;;  %v6999_v44 = vld [vmem:[#allocation54_spill] sm:$0xff] }
 0x1ad   : >> { %v2578_v43 = vmul.f32 1.442695, %v3647_v49  ;;  %v6478_v24 = vmul.f32 %v2244_v10, %v6982_v57  ;;  %v6481_v63 = vmul.f32 %v2254_v62, %v6983_v41  ;;  %v6484_v25 = vmul.f32 %v2244_v10, %v6986_v38  ;;  %v6996_v49 = vld [vmem:[#allocation51_spill] sm:$0xff] }
 0x1ae   : >> { %v6487_v32 = vmul.f32 %v2254_v62, %v6987_v51  ;;  %v6491_v61 = vadd.f32 %v6989_v33, %v6988_v15  ;;  %v6494_v2 = vadd.f32 %v1503_v29, %v6990_v56  ;;  %v6497_v31 = vadd.f32 %v1506_v17, %v6991_v47 }
 0x1af   : >> { %v6500_v58 = vadd.f32 %v1507_v20, %v6992_v30  ;;  %v2426_v53 = vmul.f32 %v6478_v24, %v6465_v8  ;;  %v2427_v52 = vmul.f32 %v6481_v63, %v6469_v28  ;;  %v2428_v55 = vmul.f32 %v6484_v25, %v6472_v39 }
 0x1b0   : >> { %v4393_v0 = vpop.eup %4392  ;;  %v2429_v5 = vmul.f32 %v6487_v32, %v6475_v54  ;;  %v6511_v16 = vmul.f32 %v6993_v22, %v1926_v19  ;;  %v6514_v42 = vadd.f32 %v6994_v60, %v1993_v7  ;;  %v6517_v21 = vmul.f32 %v6993_v22, %v1957_v4  ;;  %v6998_v7 = vld [vmem:[#allocation52_spill] sm:$0xff] }
 0x1b1   : >> { %v4395_v9 = vpop.eup %4394  ;;  %4398 = vpow2.f32 %v2578_v43  ;;  %v6520_v17 = vadd.f32 %v1999_v45, %v6994_v60  ;;  %v2075_v23 = vsub.f32 1.0, %v6995_v48  ;;  %v2259_v20 = vmul.f32 %v2214_v11, %v6996_v49  ;;  %v7000_v43 = vld [vmem:[#allocation36_spill] sm:$0xff]  ;;  %v4196_v11 = vld [vmem:[%s4707_s9 + $0x570] sm:$0xff]  }
 0x1b2   : >> { %v4397_v29 = vpop.eup %4396  ;;  %v2373_v19 = vmul.f32 %v4395_v9, %v6446_v35  ;;  %v2260_v57 = vmul.f32 %v2224_v6, %v6997_v46  ;;  %v6527_v41 = vmul.f32 %v2244_v10, %v6998_v7  ;;  %v6530_v4 = vmul.f32 %v2254_v62, %v6999_v44  ;;  %v7001_v45 = vld [vmem:[#allocation44_spill] sm:$0xff]  ;;  %v4197_v10 = vld [vmem:[%s4707_s9 + $0x600] sm:$0xff]  }
 0x1b3   : >> { %v2383_v3 = vmul.f32 %v4397_v29, %v6448_v26  ;;  %v6535_v38 = vadd.f32 %v7001_v45, %v7000_v43  ;;  %v2430_v15 = vadd.f32 %v2428_v55, %v2426_v53  ;;  %v2431_v33 = vadd.f32 %v2429_v5, %v2427_v52  ;;  %v7002_v62 = vld [vmem:[#allocation35_spill] sm:$0xff] }
 0x1b4   : >> { %v2374_v51 = vmul.f32 %v4395_v9, %v2373_v19  ;;  %v2432_v47 = vmul.f32 %v6527_v41, %v2259_v20  ;;  %v2433_v6 = vmul.f32 %v6530_v4, %v2260_v57  ;;  %v6541_v30 = vadd.f32 1.0, %v4393_v0  ;;  %v4199_v0 = vld [vmem:[%s4707_s9 + $0x580] sm:$0xff]  }
 0x1b5   : >> { %v2384_v56 = vmul.f32 %v4397_v29, %v2383_v3  ;;  %v6544_v22 = vmul.f32 %v2075_v23, %v7002_v62  ;;  %vm2378_vm0 = vweird.f32 %v6446_v35  ;;  %vm2379_vm1 = vweird.f32 %v4395_v9 }
 0x1b6   : >> { %v2375_v60 = vmul.f32 0.5, %v2374_v51  ;;  %vm2388_vm2 = vweird.f32 %v6448_v26  ;;  %vm2389_vm3 = vweird.f32 %v4397_v29  ;;  %v4064_v52 = vunpack.c.l.bf16 %v4196_v11  ;;  %vm2380_vm5 = vmor %vm2378_vm0, %vm2379_vm1 }
 0x1b7   : >> { %v4399_v48 = vpop.eup %4398  ;;  %v2385_v53 = vmul.f32 0.5, %v2384_v56  ;;  %v4065_v5 = vunpack.c.h.bf16 %v4196_v11  ;;  %v4068_v49 = vunpack.c.l.bf16 %v4197_v10  ;;  %v4069_v19 = vunpack.c.h.bf16 %v4197_v10  ;;  %vm2390_vm6 = vmor %vm2388_vm2, %vm2389_vm3  ;;  %v4198_v11 = vld [vmem:[%s4707_s9 + $0x690] sm:$0xff]  }
 0x1b8   : >> { %v2376_v55 = vsub.f32 1.5, %v2375_v60  ;;  %v6549_v23 = vadd.f32 %v2432_v47, %v2430_v15  ;;  %v6551_v7 = vadd.f32 %v2433_v6, %v2431_v33  ;;  %4400 = vrcp.f32 %v6541_v30 }
 0x1b9   : >> { %v2386_v46 = vsub.f32 1.5, %v2385_v53  ;;  %v6554_v44 = vadd.f32 1.0, %v4399_v48  ;;  %v2591_v26 = vand.u32 2147483647, %v6541_v30  ;;  %v2593_v3 = vand.u32 2147483648, %v6541_v30 }
 0x1ba   : >> { %v2377_v35 = vmul.f32 %v4395_v9, %v2376_v55  ;;  %v2465_v51 = vmul.f32 %v4064_v52, %v6006_v1  ;;  %v4076_v56 = vunpack.c.l.bf16 %v4199_v0  ;;  %v4077_v10 = vunpack.c.h.bf16 %v4199_v0 }
 0x1bb   : >> { %v2387_v43 = vmul.f32 %v4397_v29, %v2386_v46  ;;  %v2466_v33 = vmul.f32 %v4065_v5, %v6015_v50  ;;  %v2474_v47 = vmul.f32 %v4068_v49, %v6032_v18  ;;  %v2475_v6 = vmul.f32 %v4069_v19, %v6038_v59  ;;  %v4200_v46 = vld [vmem:[%s4707_s9 + $0x610] sm:$0xff]  }
 0x1bc   : >> { %v2381_v15 = vsel %vm2380_vm5, %v4395_v9, %v2377_v35  ;;  %v4072_v52 = vunpack.c.l.bf16 %v4198_v11  ;;  %v6582_v19 = vor.u32 1.1754944e-38, %v2593_v3  ;;  %v4424_v35 = vld [vmem:[%s4690_s23 + $0xc0] sm:$0xff]  ;;  %vm2587_vm7 = vweird.f32 %v6541_v30 }
 0x1bd   : >> { %v2391_v62 = vsel %vm2390_vm6, %v4397_v29, %v2387_v43  ;;  %v2392_v60 = vmul.f32 %v2381_v15, %v6369_v27  ;;  %v2394_v48 = vmul.f32 %v2381_v15, %v6373_v12  ;;  %v2396_v53 = vmul.f32 %v2381_v15, %v6378_v34  ;;  %v4425_v43 = vld [vmem:[%s4690_s23 + $0xc8] sm:$0xff] }
 0x1be   : >> { %v2393_v55 = vmul.f32 %v2391_v62, %v6371_v14  ;;  %v2395_v1 = vmul.f32 %v2391_v62, %v6375_v36  ;;  %v2397_v9 = vmul.f32 %v2391_v62, %v6391_v37  ;;  %v6569_v50 = vpop.eup %4400  ;;  %v6584_v0 = vadd.f32 %v2474_v47, %v2465_v51 }
 0x1bf   : >> { %v2398_v18 = vmul.f32 %v2392_v60, %v6465_v8  ;;  %v2400_v59 = vmul.f32 %v2394_v48, %v6472_v39  ;;  %v2404_v29 = vmul.f32 %v2396_v53, %v2259_v20  ;;  %v2416_v27 = vmul.f32 %v2392_v60, %v6478_v24  ;;  %v4202_v20 = vld [vmem:[%s4707_s9 + $0x590] sm:$0xff]   ;;  %v4203_v60 = vld [vmem:[%s4707_s9 + $0x620] sm:$0xff]  }
 0x1c0   : >> { %v2399_v12 = vmul.f32 %v2393_v55, %v6469_v28  ;;  %v2401_v34 = vmul.f32 %v2395_v1, %v6475_v54  ;;  %v2405_v14 = vmul.f32 %v2397_v9, %v2260_v57  ;;  %v2417_v36 = vmul.f32 %v2393_v55, %v6481_v63 }
 0x1c1   : >> { %v2402_v37 = vadd.f32 %v2400_v59, %v2398_v18  ;;  %v2418_v5 = vmul.f32 %v2394_v48, %v6484_v25  ;;  %v2419_v8 = vmul.f32 %v2395_v1, %v6487_v32  ;;  %v2422_v39 = vmul.f32 %v2396_v53, %v6527_v41 }
 0x1c2   : >> { %v2403_v49 = vadd.f32 %v2401_v34, %v2399_v12  ;;  %v2423_v24 = vmul.f32 %v2397_v9, %v6530_v4  ;;  %v4073_v28 = vunpack.c.h.bf16 %v4198_v11  ;;  %v2496_v32 = vmul.f32 %v4424_v35, %v4076_v56  ;;  %v4204_v56 = vld [vmem:[%s4707_s9 + $0x6b0] sm:$0xff]   ;;  %v6604_v12 = vld [vmem:[%s4707_s9 + $0x6a0] sm:$0xff]  }
 0x1c3   : >> { %v2406_v54 = vadd.f32 %v2404_v29, %v2402_v37  ;;  %v2420_v57 = vadd.f32 %v2418_v5, %v2416_v27  ;;  %v2421_v63 = vadd.f32 %v2419_v8, %v2417_v36  ;;  %v6589_v41 = vmul.f32 %v4425_v43, %v4077_v10 }
 0x1c4   : >> { %v2407_v25 = vadd.f32 %v2405_v14, %v2403_v49  ;;  %v4088_v15 = vunpack.c.l.bf16 %v4202_v20  ;;  %v6591_v11 = vadd.f32 %v2475_v6, %v2466_v33  ;;  %v6594_v3 = vmul.f32 %v4072_v52, %v6054_v13  ;;  %v4426_v14 = vld [vmem:[%s4690_s23 + $0xe0] sm:$0xff]  ;;  %v4427_v49 = vld [vmem:[%s4690_s23 + $0xe8] sm:$0xff] }
 0x1c5   : >> { %v2424_v62 = vadd.f32 %v2422_v39, %v2420_v57  ;;  %v2425_v4 = vadd.f32 %v2423_v24, %v2421_v63  ;;  %v2436_v48 = vmul.f32 2.0, %v2406_v54  ;;  %v6598_v51 = vmul.f32 %v4073_v28, %v6060_v40 }
 0x1c6   : >> { %v4080_v47 = vunpack.c.l.bf16 %v4200_v46  ;;  %v4081_v53 = vunpack.c.h.bf16 %v4200_v46  ;;  %v2408_v55 = vmax.f32 %v2406_v54, 0.0  ;;  %vm2410_vm8 = vcmp.gt.f32.partialorder %v2406_v54, 0.0 }
 0x1c7   : >> { %vm2411_vm4 = vcmp.gt.f32.partialorder %v2407_v25, 0.0  ;;  %v2437_v10 = vmul.f32 2.0, %v2407_v25  ;;  %v2438_v33 = vmul.f32 %v2436_v48, %v2424_v62  ;;  %v4089_v6 = vunpack.c.h.bf16 %v4202_v20 }
 0x1c8   : >> { %v2527_v1 = vmul.f32 %v4424_v35, %v4088_v15  ;;  %v4092_v9 = vunpack.c.l.bf16 %v4203_v60  ;;  %v2409_v52 = vmax.f32 %v2407_v25, 0.0  ;;  %v4093_v59 = vunpack.c.h.bf16 %v4203_v60 }
 0x1c9   : >> { %v2439_v18 = vmul.f32 %v2437_v10, %v2425_v4  ;;  %v4096_v29 = vunpack.c.l.bf16 %v4204_v56  ;;  %v2440_v27 = vsub.f32 %v2438_v33, %v6549_v23  ;;  %v2528_v34 = vmul.f32 %v4425_v43, %v4089_v6 }
 0x1ca   : >> { %v2536_v36 = vmul.f32 %v4426_v14, %v4092_v9  ;;  %v4097_v37 = vunpack.c.h.bf16 %v4204_v56  ;;  %v7003_v5 = vmov 0.0   ;;  %v2537_v24 = vmul.f32 %v4427_v49, %v4093_v59 }
 0x1cb   : >> { %v3614_v8 = vsel %vm2410_vm8, 1.0, %v7003_v5  ;;  %v3615_v39 = vsel %vm2411_vm4, 1.0, %v7003_v5  ;;  %v2441_v20 = vsub.f32 %v2439_v18, %v6551_v7  ;;  %v2442_v28 = vmax.f32 %v2440_v27, 0.0 }
 0x1cc   : >> { %v2538_v57 = vadd.f32 %v2536_v36, %v2527_v1  ;;  %v2547_v23 = vmul.f32 %v4096_v29, %v6054_v13  ;;  %v2551_v63 = vmul.f32 0.3, %v2408_v55  ;;  %v2505_v35 = vmul.f32 %v4426_v14, %v4080_v47  ;;  %v7008_v36 = vld [vmem:[#allocation30_spill] sm:$0xff] }
 0x1cd   : >> { %v2443_v46 = vmax.f32 %v2441_v20, 0.0  ;;  %v4084_v43 = vunpack.c.l.bf16 %v6604_v12  ;;  %v2583_v54 = vmul.f32 %v6569_v50, %v6541_v30  ;;  %v2444_v15 = vmul.f32 %v3614_v8, %v2442_v28 }
 0x1ce   : >> { %v2539_v62 = vadd.f32 %v2537_v24, %v2528_v34  ;;  %v2548_v25 = vmul.f32 %v4097_v37, %v6060_v40  ;;  %v2552_v4 = vmul.f32 0.3, %v2409_v52  ;;  %v4085_v60 = vunpack.c.h.bf16 %v6604_v12  ;;  %v7009_v37 = vld [vmem:[#allocation28_spill] sm:$0xff] }
 0x1cf   : >> { %v2445_v7 = vmul.f32 %v3615_v39, %v2443_v46  ;;  %v2584_v48 = vsub.f32 1.0, %v2583_v54  ;;  %vm2588_vm9 = vweird.f32 %v6569_v50  ;;  %v2446_v56 = vmul.f32 %v2444_v15, %v2444_v15 }
 0x1d0   : >> { %v2506_v55 = vmul.f32 %v4427_v49, %v4081_v53  ;;  %v2549_v10 = vadd.f32 %v2547_v23, %v2538_v57  ;;  %v6620_v47 = vadd.f32 0.5, %v2551_v63  ;;  %v2507_v6 = vadd.f32 %v2505_v35, %v2496_v32  ;;  %vm6628_vm10 = vmor %vm2587_vm7, %vm2588_vm9  ;;  %v7007_v32 = vld [vmem:[#allocation27_spill] sm:$0xff] }
 0x1d1   : >> { %v2447_v33 = vmul.f32 %v2445_v7, %v2445_v7  ;;  %v2516_v1 = vmul.f32 %v4084_v43, %v6054_v13  ;;  %v2585_v9 = vmul.f32 %v6569_v50, %v2584_v48  ;;  %v2448_v18 = vmul.f32 %v2446_v56, %v2446_v56  ;;  %v7006_v13 = vld [vmem:[#allocation29_spill] sm:$0xff] }
 0x1d2   : >> { %v2550_v59 = vadd.f32 %v2548_v25, %v2539_v62  ;;  %v6624_v52 = vadd.f32 0.5, %v2552_v4  ;;  %4402 = vrcp.f32 %v6554_v44  ;;  %vm2592_vm11 = vcmp.eq.f32.partialorder %v2591_v26, 8.507059e+37 }
 0x1d3   : >> { %v2449_v53 = vmul.f32 %v2447_v33, %v2447_v33  ;;  %v2586_v27 = vadd.f32 %v6569_v50, %v2585_v9  ;;  %v2612_v12 = vsub.f32 %v7007_v32, %v7006_v13  ;;  %v2450_v34 = vmul.f32 %v2448_v18, %v2448_v18 }
 0x1d4   : >> { %v2565_v14 = vmul.f32 %v6620_v47, %v2549_v10  ;;  %v2613_v5 = vsub.f32 %v7009_v37, %v7008_v36  ;;  %v2640_v8 = vsub.f32 1e-10, %v7006_v13  ;;  %vm2602_vm12 = vweird.f32 %v6554_v44  ;;  %v7012_v37 = vld [vmem:[#allocation43_spill] sm:$0xff] }
 0x1d5   : >> { %v2451_v39 = vmul.f32 %v2449_v53, %v2449_v53  ;;  %v2590_v20 = vsel %vm6628_vm10, %v6569_v50, %v2586_v27  ;;  %v2614_v30 = vmul.f32 10000.0, %v2612_v12  ;;  %v2452_v26 = vmul.f32 %v2450_v34, %v2450_v34 }
 0x1d6   : >> { %v2595_v49 = vsel %vm2592_vm11, %v6582_v19, %v2590_v20  ;;  %v2615_v24 = vmul.f32 10000.0, %v2613_v5  ;;  %v2641_v28 = vsub.f32 1e-10, %v7008_v36  ;;  %v2642_v46 = vmul.f32 10000.0, %v2640_v8  ;;  %v7014_v8 = vld [vmem:[#allocation34_spill] sm:$0xff] }
 0x1d7   : >> { %v2453_v57 = vmul.f32 %v2451_v39, %v2451_v39  ;;  %v2616_v23 = vmul.f32 1.442695, %v2614_v30  ;;  %v2636_v63 = vsub.f32 1.0, %v2595_v49  ;;  %v2454_v43 = vmul.f32 %v2452_v26, %v2452_v26  ;;  %v7015_v39 = vld [vmem:[#allocation31_spill] sm:$0xff] }
 0x1d8   : >> { %v4403_v35 = vpop.eup %4402  ;;  %v2606_v54 = vand.u32 2147483647, %v6554_v44  ;;  %v2618_v15 = vmul.f32 1.442695, %v2615_v24  ;;  %v2643_v62 = vmul.f32 10000.0, %v2641_v28  ;;  %v2608_v4 = vand.u32 2147483648, %v6554_v44 }
 0x1d9   : >> { %v2455_v50 = vmul.f32 %v2453_v57, %v2453_v57  ;;  %v2598_v25 = vmul.f32 %v4403_v35, %v6554_v44  ;;  %4404 = vpow2.f32 %v2616_v23  ;;  %v2456_v19 = vmul.f32 %v2454_v43, %v2454_v43 }
 0x1da   : >> { %4406 = vpow2.f32 %v2618_v15  ;;  %v2638_v7 = vmul.f32 %v2636_v63, %v6544_v22  ;;  %v2644_v48 = vmul.f32 1.442695, %v2642_v46  ;;  %vm2603_vm13 = vweird.f32 %v4403_v35  ;;  %v7016_v63 = vld [vmem:[#allocation38_spill] sm:$0xff] }
 0x1db   : >> { %v2457_v56 = vmul.f32 %v2455_v50, %v2455_v50  ;;  %v2599_v10 = vsub.f32 1.0, %v2598_v25  ;;  %v2646_v33 = vmul.f32 1.442695, %v2643_v62  ;;  %v2508_v9 = vadd.f32 %v2506_v55, %v6589_v41  ;;  %vm6663_vm14 = vmor %vm2602_vm12, %vm2603_vm13 }
 0x1dc   : >> { %v2517_v18 = vmul.f32 %v4085_v60, %v6060_v40  ;;  %v2557_v29 = vmul.f32 0.2, %v2456_v19  ;;  %4408 = vpow2.f32 %v2644_v48  ;;  %v2566_v27 = vmul.f32 %v6624_v52, %v2550_v59 }
 0x1dd   : >> { %v2558_v53 = vmul.f32 0.2, %v2457_v56  ;;  %v2600_v13 = vmul.f32 %v4403_v35, %v2599_v10  ;;  %4410 = vpow2.f32 %v2646_v33  ;;  %v2487_v22 = vadd.f32 %v6594_v3, %v6584_v0  ;;  %v7013_v3 = vld [vmem:[#allocation33_spill] sm:$0xff] }
 0x1de   : >> { %v2518_v32 = vadd.f32 %v2516_v1, %v2507_v6  ;;  %v2609_v40 = vor.u32 1.1754944e-38, %v2608_v4  ;;  %v2701_v60 = vsub.f32 1.0, %v2638_v7  ;;  %v2488_v59 = vadd.f32 %v6598_v51, %v6591_v11  ;;  %v7017_v4 = vld [vmem:[#allocation32_spill] sm:$0xff]  ;;  %v7018_v56 = vld [vmem:[#allocation25_spill] sm:$0xff] }
 0x1df   : >> { %v4405_v55 = vpop.eup %4404  ;;  %v2567_v12 = vadd.f32 %v2565_v14, %v2557_v29  ;;  %v2601_v34 = vadd.f32 %v4403_v35, %v2600_v13  ;;  %vm2607_vm15 = vcmp.eq.f32.partialorder %v2606_v54, 8.507059e+37  ;;  %v1998_v0 = vadd.f32 %v7012_v37, %v6511_v16 }
 0x1e0   : >> { %v4407_v36 = vpop.eup %4406  ;;  %v2076_v6 = vsub.f32 1.0, %v7013_v3  ;;  %v2519_v44 = vadd.f32 %v2517_v18, %v2508_v9  ;;  %v2620_v1 = vmul.f32 %v4405_v55, %v2595_v49  ;;  %3655 = vst [vmem:[%s6657_s19 + $0x60] sm:$0xff] %v2701_v60  ;;  %v2002_v5 = vadd.f32 %v6517_v21, %v7012_v37 }
 0x1e1   : >> { %v2062_v20 = vadd.f32 %v7015_v39, %v7014_v8  ;;  %v2568_v30 = vadd.f32 %v2566_v27, %v2558_v53  ;;  %v2605_v11 = vsel %vm6663_vm14, %v4403_v35, %v2601_v34  ;;  %v2555_v14 = vmul.f32 %v6620_v47, %v2487_v22 }
 0x1e2   : >> { %v4409_v51 = vpop.eup %4408  ;;  %v2561_v16 = vmul.f32 %v6620_v47, %v2518_v32  ;;  %v2610_v26 = vsel %vm2607_vm15, %v2609_v40, %v2605_v11  ;;  %v2622_v24 = vadd.f32 %v2620_v1, %v6535_v38  ;;  %v2556_v28 = vmul.f32 %v6624_v52, %v2488_v59 }
 0x1e3   : >> { %v4411_v49 = vpop.eup %4410  ;;  %v2621_v57 = vmul.f32 %v4407_v36, %v2610_v26  ;;  %v2632_v21 = vmul.f32 %v2620_v1, %v2567_v12  ;;  %v6683_v23 = vmax.f32 %v4409_v51, 1e-10  ;;  %v2078_v46 = vmul.f32 %v2076_v6, %v7016_v63 }
 0x1e4   : >> { %v2562_v43 = vmul.f32 %v6624_v52, %v2519_v44  ;;  %v2637_v35 = vsub.f32 1.0, %v2610_v26  ;;  %v6687_v54 = vmax.f32 %v4411_v49, 1e-10  ;;  %v2063_v47 = vmul.f32 %v7001_v45, %v6514_v42 }
 0x1e5   : >> { %v2067_v38 = vmul.f32 %v7001_v45, %v6520_v17  ;;  %v2623_v15 = vadd.f32 %v2621_v57, %v2062_v20  ;;  %v2633_v62 = vmul.f32 %v2621_v57, %v2568_v30  ;;  %v2064_v50 = vmul.f32 %v7015_v39, %v1998_v0 }
 0x1e6   : >> { %v2559_v25 = vadd.f32 %v2557_v29, %v2555_v14  ;;  %v2634_v19 = vadd.f32 %v2632_v21, %v7017_v4  ;;  %v2650_v7 = vadd.f32 %v6683_v23, %v2622_v24  ;;  %v2560_v48 = vadd.f32 %v2558_v53, %v2556_v28 }
 0x1e7   : >> { %v2563_v52 = vadd.f32 %v2561_v16, %v2557_v29  ;;  %v2635_v10 = vadd.f32 %v2633_v62, %v7018_v56  ;;  %v2651_v33 = vadd.f32 %v6687_v54, %v2623_v15  ;;  %v2068_v42 = vmul.f32 %v7015_v39, %v2002_v5 }
 0x1e8   : >> { %v2564_v9 = vadd.f32 %v2562_v43, %v2558_v53  ;;  %v2639_v17 = vmul.f32 %v2637_v35, %v2078_v46  ;;  %4412 = vrcp.f32 %v2650_v7  ;;  %v2065_v45 = vadd.f32 %v2063_v47, %v6491_v61 }
 0x1e9   : >> { %4414 = vrcp.f32 %v2651_v33  ;;  %v2069_v18 = vadd.f32 %v2067_v38, %v6497_v31  ;;  %v2066_v27 = vadd.f32 %v2064_v50, %v6494_v2  ;;  %v2624_v13 = vmul.f32 %v2620_v1, %v2559_v25 }
 0x1ea   : >> { %v2625_v22 = vmul.f32 %v2621_v57, %v2560_v48  ;;  %v2628_v29 = vmul.f32 %v2620_v1, %v2563_v52  ;;  %v2070_v32 = vadd.f32 %v2068_v42, %v6500_v58  ;;  %v2629_v41 = vmul.f32 %v2621_v57, %v2564_v9 }
 0x1eb   : >> { %v2702_v40 = vsub.f32 1.0, %v2639_v17  ;;  %v2626_v53 = vadd.f32 %v2624_v13, %v2065_v45  ;;  %vm2657_vm0 = vweird.f32 %v2650_v7  ;;  %v2663_v61 = vand.u32 2147483648, %v2650_v7 }
 0x1ec   : >> { %v2627_v59 = vadd.f32 %v2625_v22, %v2066_v27  ;;  %v2630_v12 = vadd.f32 %v2628_v29, %v2069_v18  ;;  %v2631_v36 = vadd.f32 %v2629_v41, %v2070_v32  ;;  %v2661_v2 = vand.u32 2147483647, %v2650_v7 }
 0x1ed   : >> { %3656 = vst [vmem:[%s6657_s19 + $0x68] sm:$0xff] %v2702_v40  ;;  %v2677_v0 = vand.u32 2147483648, %v2651_v33  ;;  %vm2671_vm2 = vweird.f32 %v2651_v33  ;;  %v2675_v58 = vand.u32 2147483647, %v2651_v33  ;;  %v2664_v1 = vor.u32 1.1754944e-38, %v2663_v61 }
 0x1ee   : >> { %v4413_v60 = vpop.eup %4412  ;;  %v2680_v8 = vadd.f32 %v6683_v23, %v2626_v53  ;;  %vm2662_vm6 = vcmp.eq.f32.partialorder %v2661_v2, 8.507059e+37  ;;  %v2687_v30 = vadd.f32 %v6683_v23, %v2630_v12  ;;  %v2681_v51 = vadd.f32 %v6687_v54, %v2627_v59 }
 0x1ef   : >> { %v4415_v55 = vpop.eup %4414  ;;  %v2653_v34 = vmul.f32 %v4413_v60, %v2650_v7  ;;  %vm2658_vm1 = vweird.f32 %v4413_v60  ;;  %v2678_v20 = vor.u32 1.1754944e-38, %v2677_v0  ;;  %vm2676_vm4 = vcmp.eq.f32.partialorder %v2675_v58, 8.507059e+37 }
 0x1f0   : >> { %v2667_v31 = vmul.f32 %v4415_v55, %v2651_v33  ;;  %vm2672_vm3 = vweird.f32 %v4415_v55  ;;  %vm6704_vm5 = vmor %vm2657_vm0, %vm2658_vm1  ;;  %v2688_v14 = vadd.f32 %v6687_v54, %v2631_v36  ;;  %v2694_v26 = vadd.f32 %v6683_v23, %v2634_v19 }
 0x1f1   : >> { %v2654_v37 = vsub.f32 1.0, %v2653_v34  ;;  %vm2673_vm8 = vmor %vm2671_vm2, %vm2672_vm3  ;;  %v2695_v28 = vadd.f32 %v6687_v54, %v2635_v10 }
 0x1f2   : >> { %v2668_v3 = vsub.f32 1.0, %v2667_v31 }
 0x1f3   : >> { %v2655_v6 = vmul.f32 %v4413_v60, %v2654_v37 }
 0x1f4   : >> { %v2669_v5 = vmul.f32 %v4415_v55, %v2668_v3 }
 0x1f5   : >> { %v2656_v39 = vadd.f32 %v4413_v60, %v2655_v6 }
 0x1f6   : >> { %v2670_v11 = vadd.f32 %v4415_v55, %v2669_v5 }
 0x1f7   : >> { %v2660_v16 = vsel %vm6704_vm5, %v4413_v60, %v2656_v39 }
 0x1f8   : >> { %v2665_v24 = vsel %vm2662_vm6, %v2664_v1, %v2660_v16  ;;  %v2674_v49 = vsel %vm2673_vm8, %v4415_v55, %v2670_v11 }
 0x1f9   : >> { %v2679_v57 = vsel %vm2676_vm4, %v2678_v20, %v2674_v49  ;;  %v2682_v21 = vmul.f32 %v2680_v8, %v2665_v24  ;;  %v2689_v63 = vmul.f32 %v2687_v30, %v2665_v24  ;;  %v2696_v35 = vmul.f32 %v2694_v26, %v2665_v24 }
 0x1fa   : >> { %v2683_v46 = vmul.f32 %v2681_v51, %v2679_v57  ;;  %v2690_v43 = vmul.f32 %v2688_v14, %v2679_v57  ;;  %v2697_v47 = vmul.f32 %v2695_v28, %v2679_v57 }
 0x1fb   : >> { %2685 = vst [vmem:[%s6657_s19] sm:$0xff] %v2682_v21 }
 0x1fc   : >> { %2686 = vst [vmem:[%s6657_s19 + $0x8] sm:$0xff] %v2683_v46  ;;  %355 = sbr.rel (!%p353_p1) target bundleno = 77 (0x4d), region = 256 }
 0x1fd   : >> { %3649 = vst [vmem:[%s6657_s19 + $0x20] sm:$0xff] %v2689_v63 }
 0x1fe   : >> { %3650 = vst [vmem:[%s6657_s19 + $0x28] sm:$0xff] %v2690_v43 }
 0x1ff   : >> { %3652 = vst [vmem:[%s6657_s19 + $0x40] sm:$0xff] %v2696_v35 }
 0x200   : >> { %3653 = vst [vmem:[%s6657_s19 + $0x48] sm:$0xff] %v2697_v47 }
 0x201   : > { %s3665_s22 = sshll.u32 %s4546_s16, 5  ;;  %s2729_s5 = sshll.u32 %s4678_s8, 4  ;;  %s2730_s5 = int_to_ptr.vmem [resolvable:$true] %s2729_s5 }
 0x202   : > { %s2718_s6 = scalar_lea.hbm %s6766_s3, %s3665_s22  ;;  %s4498_s7 = smov 512  }
 0x203   : > { %s2731_s17 = sshll.u32 %s2718_s6, 4  ;;  %4234 = sst [smem:[#allocation16]] (%p4573_p9), %s4498_s7  ;;  %s2732_s17 = int_to_ptr.hbm [resolvable:$true] %s2731_s17 }
 0x204   : > { %s4499_s27 = smov 1024   ;;  %s4500_s30 = smov 4  }
 0x205   : > { %4235 = sst [smem:[#allocation16 + $0x1]] (%p4573_p9), %s4499_s27  ;;  %s4501_s16 = smov 128  }
 0x206   : > { %4236 = sst [smem:[#allocation16 + $0x2]] (%p4573_p9), %s4500_s30  ;;  %s4502_s4 = smov 8  }
 0x207   : > { %4237 = sst [smem:[#allocation16 + $0x3]] (%p4573_p9), %s4501_s16  ;;  %s4503_s8 = smov [#allocation15]  }
 0x208   : > { %4238 = sst [smem:[#allocation16 + $0x4]] (%p4573_p9), %s4501_s16  ;;  %s4504_s23 = smov 0  }
 0x209   : > { %4239 = sst [smem:[#allocation16 + $0x5]] (%p4573_p9), %s4502_s4 }
 0x20a   : > { %4240 = dma.general (%p4573_p9), %s2730_s5, 2048, %s2732_s17, %s2707_s29, %s4503_s8, [#allocation16], %s4504_s23, 0  }
 0x20b PF: > { %s2759_s26 = sand.u32 1, %s4462_s12   ;;  %p4243_p2 = pnand %p3248_p11, %p4577_p10 }
 0x20c   : > { %s2760_s11 = scalar_lea.sflag [#allocation4], %s2759_s26 }
 0x20d   : > { %p4244_p3 = pneg %p4243_p2 }
 0x20f   : > { %4457 = dma.done.wait (%p4244_p3), %s2760_s11, 2048  }
 0x210   : > { %4459 = vsyncadd (%p4244_p3), %s2760_s11, 4294965248  ;;  %p19_p4 = scmp.ge.s32.totalorder %s4550_s18, 4   ;;  %s7021_s12 = smov %s4466_s13 }
 0x211   : > { %s7022_s13 = smov %s4470_s14  ;;  %s7023_s14 = smov %s4562_s21 }
 0x212   : > { %s7024_s15 = smov %s4550_s18  ;;  %21 = sbr.rel (!%p19_p4) target bundleno = 7 (0x7), region = 267 }
 0x217   :  { %2766 = vsyncpa [#allocation3], 1 }
 0x218   :  { %2768 = vsyncpa [#allocation3 + $0x1], 1 }
 0x219   :  { %2769 = vsyncpa [#allocation6], 1 }
 0x21a   :  { %2771 = vsyncpa [#allocation6 + $0x1], 1 }
 0x21b   :  { %2772 = vsyncpa [#allocation4], 1 }
 0x21c   :  { %2774 = vsyncpa [#allocation4 + $0x1], 1 }

</bundles_post_ra>
